<compile_context>
chip_gen: v5e
topology: v5e:2x2
jax: 0.10.0
libtpu: 0.0.40
codegen_flags: <defaults>
</compile_context>

<pallas_src>
import functools
import itertools

import numpy as np
import jax
import jax.numpy as jnp
from jax.experimental import pallas as pl
from jax.experimental.pallas import tpu as pltpu


def _round_up(a, b):
    return (a + b - 1) // b * b


def _cost_kernel(rel_ref, hs_ref, he_ref, gold_ref, out_ref, slab_ref, *,
                 nclass, seq_len, off_hs, off_he, slab_w, g_pad,
                 w_rel, w_head, matcher):
    """Per-segment softmax numerators + one fused one-hot MXU gather + combine."""
    # Upcast on load (inputs may be bf16 in HBM); all VALU math stays f32.
    rel = rel_ref[...].astype(jnp.float32)             # (TILE_N, nclass)
    hs = hs_ref[...].astype(jnp.float32)               # (TILE_N, seq_len)
    he = he_ref[...].astype(jnp.float32)                # (TILE_N, seq_len)

    # Separate inputs => plain (unmasked, narrow) per-segment reductions.
    e_rel = jnp.exp(rel - jnp.max(rel, axis=-1, keepdims=True))
    e_hs = jnp.exp(hs - jnp.max(hs, axis=-1, keepdims=True))
    e_he = jnp.exp(he - jnp.max(he, axis=-1, keepdims=True))
    s_rel = jnp.sum(e_rel, axis=-1, keepdims=True)
    s_hs = jnp.sum(e_hs, axis=-1, keepdims=True)
    s_he = jnp.sum(e_he, axis=-1, keepdims=True)

    # Pack the three numerator groups into one 128-lane-aligned VMEM slab so a single
    # MXU matmul gathers all three probability groups.  Zero the slab EVERY iteration:
    # the padding lanes must be exactly 0.0, and a pl.when(program_id == 0) init would
    # only run on one core under "parallel" megacore sharding.
    slab_ref[...] = jnp.zeros_like(slab_ref)
    slab_ref[:, 0:nclass] = e_rel
    slab_ref[:, off_hs:off_hs + seq_len] = e_hs
    slab_ref[:, off_he:off_he + seq_len] = e_he

    # One-hot selection matrix from a (slab_w, 1) iota broadcast-compared against the
    # packed gold row (avoids the dense int32 iota temporary).  Padded / out-of-range
    # gold entries are -1 and never match -> all-zero columns.
    idx = gold_ref[...]                                  # (1, 3*g_pad) int32, offsets baked in
    iota_v = jax.lax.broadcasted_iota(jnp.int32, (slab_w, 1), 0)
    sel = (iota_v == idx).astype(jnp.float32)            # (slab_w, 3*g_pad)

    # Single fused gather on the MXU; HIGHEST precision keeps the f32 numerators exact
    # enough for 1e-5 parity with the plain-softmax reference on bf16-native MXUs.
    p = jnp.dot(slab_ref[...], sel,
                precision=jax.lax.Precision.HIGHEST,
                preferred_element_type=jnp.float32)      # (TILE_N, 3*g_pad)

    # Deferred softmax normalization: scale each g_pad-wide group by its reciprocal.
    r_rel = pl.reciprocal(s_rel, approx=False)
    r_hs = pl.reciprocal(s_hs, approx=False)
    r_he = pl.reciprocal(s_he, approx=False)
    p_rel = p[:, 0:g_pad] * r_rel
    p_hs = p[:, g_pad:2 * g_pad] * r_hs
    p_he = p[:, 2 * g_pad:3 * g_pad] * r_he

    if matcher == "avg":
        out_ref[...] = -(w_rel * p_rel + 0.5 * w_head * (p_hs + p_he))
    elif matcher == "min":
        # Matches the PyTorch 'min' branch: no cost weights, -min over the three probs.
        out_ref[...] = -jnp.minimum(jnp.minimum(p_hs, p_rel), p_he)
    else:
        raise ValueError("Wrong matcher")


@functools.partial(jax.jit, static_argnames=("cost_relation", "cost_head", "matcher"))
def pallas_cost_matrix(pred_rel_logits, head_start_logits, head_end_logits,
                       gold_rel, gold_head_start, gold_head_end,
                       *, cost_relation, cost_head, matcher):
    if matcher not in ("avg", "min"):
        raise ValueError("Wrong matcher")

    bsz, ngen, nclass = pred_rel_logits.shape
    seq_len = head_start_logits.shape[-1]
    N = bsz * ngen
    G = int(gold_rel.shape[0])
    g_pad = _round_up(max(G, 1), 128)                  # lane-dense output slab

    # Row tiling: multiple-of-8 sublane tiles, <=512 rows/tile (fits the scoped VMEM
    # default on every generation and shards across v7x's two TensorCores).
    n8 = _round_up(N, 8)
    tile_n = min(512, n8)
    n_pad = _round_up(n8, tile_n)
    grid_n = n_pad // tile_n

    # 128-lane-aligned slab layout (rel | head_start | head_end) so the in-kernel
    # segment copies are aligned masked stores.
    off_hs = _round_up(nclass, 128)
    off_he = off_hs + _round_up(seq_len, 128)
    slab_w = off_he + _round_up(seq_len, 128)

    # Three separate inputs; only pad rows when N is not already tile-aligned.
    def prep(x, d):
        x = x.reshape(N, d)
        if n_pad != N:
            x = jnp.pad(x, ((0, n_pad - N), (0, 0)))
        return x

    rel = prep(pred_rel_logits, nclass)
    hs = prep(head_start_logits, seq_len)
    he = prep(head_end_logits, seq_len)

    # Gold indices packed into one tiny lane-dense int32 row; slab offsets baked in.
    # Out-of-range (or padded) entries are forced to -1 so they can never select a
    # probability from the wrong segment.
    def pack_idx(v, size, offset):
        v = v.astype(jnp.int32)
        v = jnp.where((v >= 0) & (v < size), v + offset, -1)
        return jnp.pad(v, (0, g_pad - G), constant_values=-1)

    gold = jnp.concatenate(
        [pack_idx(gold_rel, nclass, 0),
         pack_idx(gold_head_start, seq_len, off_hs),
         pack_idx(gold_head_end, seq_len, off_he)]).reshape(1, 3 * g_pad)

    kernel = functools.partial(
        _cost_kernel, nclass=nclass, seq_len=seq_len, off_hs=off_hs, off_he=off_he,
        slab_w=slab_w, g_pad=g_pad, w_rel=float(cost_relation),
        w_head=float(cost_head), matcher=matcher)

    # Explicit VMEM budget (the scoped default — 16 MiB on v5e, 32 MiB on v6e/v7x —
    # would otherwise gate before physical VMEM does at larger N / G).
    in_bytes = jnp.dtype(pred_rel_logits.dtype).itemsize
    est = (2 * tile_n * (nclass + 2 * seq_len) * in_bytes   # double-buffered inputs
           + 2 * tile_n * g_pad * 4                         # double-buffered output
           + 3 * g_pad * 4                                  # resident gold row
           + tile_n * slab_w * 4                            # slab scratch
           + slab_w * 3 * g_pad * 4                         # sel temporary
           + 2 * tile_n * 3 * g_pad * 4)                    # p temporary + headroom
    vmem_limit = int(min(64 * 2**20, max(32 * 2**20, 2 * est)))

    grid_spec = pltpu.PrefetchScalarGridSpec(
        num_scalar_prefetch=0,
        grid=(grid_n,),
        in_specs=[
            pl.BlockSpec((tile_n, nclass), lambda i: (i, 0)),
            pl.BlockSpec((tile_n, seq_len), lambda i: (i, 0)),
            pl.BlockSpec((tile_n, seq_len), lambda i: (i, 0)),
            # Constant index_map: the gold row stays VMEM-resident across tiles.
            pl.BlockSpec((1, 3 * g_pad), lambda i: (0, 0)),
        ],
        out_specs=pl.BlockSpec((tile_n, g_pad), lambda i: (i, 0)),
        scratch_shapes=[pltpu.VMEM((tile_n, slab_w), jnp.float32)],
    )

    cost_pad = pl.pallas_call(
        kernel,
        out_shape=jax.ShapeDtypeStruct((n_pad, g_pad), jnp.float32),
        grid_spec=grid_spec,
        compiler_params=pltpu.CompilerParams(
            dimension_semantics=("parallel",),
            vmem_limit_bytes=vmem_limit),
    )(rel, hs, he, gold)

    return cost_pad[:N, :G].reshape(bsz, ngen, G)


def _linear_sum_assignment_bruteforce(cost):
    """Exact min-cost assignment for tiny matrices (num_gold columns <= num rows)."""
    # TODO(synk): scipy.optimize.linear_sum_assignment (Hungarian algorithm) has no
    # clean Pallas equivalent; this exact brute force is only viable for the tiny
    # (ngen x num_gold_per_batch) matrices used here.
    n_rows, n_cols = cost.shape
    assert n_cols <= n_rows, "brute-force assignment requires num_gold <= num rows"
    best_total = None
    best_rows = None
    for rows in itertools.permutations(range(n_rows), n_cols):
        total = sum(cost[r, c] for c, r in enumerate(rows))
        if best_total is None or total < best_total:
            best_total = total
            best_rows = rows
    rows = np.asarray(best_rows, dtype=np.int64)
    cols = np.arange(n_cols, dtype=np.int64)
    order = np.argsort(rows)
    return rows[order], cols[order]


def hungarian_matcher_forward(outputs, targets, *, loss_weight, matcher):
    gold_rel = jnp.concatenate([t["relation"] for t in targets])
    gold_hs = jnp.concatenate([t["head_start_index"] for t in targets])
    gold_he = jnp.concatenate([t["head_end_index"] for t in targets])

    cost = pallas_cost_matrix(
        outputs["pred_rel_logits"], outputs["head_start_logits"],
        outputs["head_end_logits"], gold_rel, gold_hs, gold_he,
        cost_relation=loss_weight["relation"],
        cost_head=loss_weight["head_entity"],
        matcher=matcher)
    # TODO(synk): the device->host sync + Python assignment dominates end-to-end time;
    # batch multiple matcher calls per sync if this becomes a training bottleneck.
    cost = np.asarray(jax.block_until_ready(cost))

    num_gold = [int(t["relation"].shape[0]) for t in targets]
    splits = np.split(cost, np.cumsum(num_gold)[:-1], axis=-1)
    indices = [_linear_sum_assignment_bruteforce(c[i]) for i, c in enumerate(splits)]
    return [(np.asarray(i, dtype=np.int64), np.asarray(j, dtype=np.int64))
            for i, j in indices]


if __name__ == "__main__":
    key = jax.random.PRNGKey(0)
    bsz, ngen, nclass, seq_len = 2, 8, 24, 32
    k1, k2, k3, k4, k5, k6 = jax.random.split(key, 6)

    outputs = {
        "pred_rel_logits": jax.random.normal(k1, (bsz, ngen, nclass), jnp.float32),
        "head_start_logits": jax.random.normal(k2, (bsz, ngen, seq_len), jnp.float32),
        "head_end_logits": jax.random.normal(k3, (bsz, ngen, seq_len), jnp.float32),
    }

    num_gold = [3, 2]
    kr = jax.random.split(k4, len(num_gold))
    ks = jax.random.split(k5, len(num_gold))
    ke = jax.random.split(k6, len(num_gold))
    targets = []
    for b, n in enumerate(num_gold):
        targets.append({
            "relation": jax.random.randint(kr[b], (n,), 0, nclass, jnp.int32),
            "head_start_index": jax.random.randint(ks[b], (n,), 0, seq_len, jnp.int32),
            "head_end_index": jax.random.randint(ke[b], (n,), 0, seq_len, jnp.int32),
        })

    loss_weight = {"relation": 1.0, "head_entity": 2.0}

    # --- check the Pallas cost matrix against a plain-JAX reference (both matchers) ---
    gold_rel = jnp.concatenate([t["relation"] for t in targets])
    gold_hs = jnp.concatenate([t["head_start_index"] for t in targets])
    gold_he = jnp.concatenate([t["head_end_index"] for t in targets])

    pr = jax.nn.softmax(outputs["pred_rel_logits"].reshape(-1, nclass), axis=-1)
    phs = jax.nn.softmax(outputs["head_start_logits"].reshape(-1, seq_len), axis=-1)
    phe = jax.nn.softmax(outputs["head_end_logits"].reshape(-1, seq_len), axis=-1)

    cost_avg = jax.block_until_ready(pallas_cost_matrix(
        outputs["pred_rel_logits"], outputs["head_start_logits"],
        outputs["head_end_logits"], gold_rel, gold_hs, gold_he,
        cost_relation=loss_weight["relation"],
        cost_head=loss_weight["head_entity"], matcher="avg"))
    ref_avg = (-loss_weight["relation"] * pr[:, gold_rel]
               - loss_weight["head_entity"] * 0.5 * (phs[:, gold_hs] + phe[:, gold_he]))
    ref_avg = ref_avg.reshape(bsz, ngen, -1)
    np.testing.assert_allclose(np.asarray(cost_avg), np.asarray(ref_avg),
                               rtol=1e-5, atol=1e-6)

    cost_min = jax.block_until_ready(pallas_cost_matrix(
        outputs["pred_rel_logits"], outputs["head_start_logits"],
        outputs["head_end_logits"], gold_rel, gold_hs, gold_he,
        cost_relation=loss_weight["relation"],
        cost_head=loss_weight["head_entity"], matcher="min"))
    ref_min = -jnp.minimum(jnp.minimum(phs[:, gold_hs], pr[:, gold_rel]),
                           phe[:, gold_he]).reshape(bsz, ngen, -1)
    np.testing.assert_allclose(np.asarray(cost_min), np.asarray(ref_min),
                               rtol=1e-5, atol=1e-6)

    # --- full forward (cost matrix in Pallas, assignment on host) ---
    indices_avg = hungarian_matcher_forward(outputs, targets,
                                            loss_weight=loss_weight, matcher="avg")
    indices_min = hungarian_matcher_forward(outputs, targets,
                                            loss_weight=loss_weight, matcher="min")
    assert len(indices_avg) == bsz and len(indices_min) == bsz
    for (ri, ci), n in zip(indices_avg, num_gold):
        assert ri.shape == (n,) and ci.shape == (n,)
    for (ri, ci), n in zip(indices_min, num_gold):
        assert ri.shape == (n,) and ci.shape == (n,)

    print("KERNEL_OK")
</pallas_src>

<mosaic_0001>
module attributes {stable_mosaic.version = 11 : i64} {
  func.func @_cost_kernel(%arg0: i32, %arg1: memref<16x24xf32, #tpu.memory_space<vmem>>, %arg2: memref<16x32xf32, #tpu.memory_space<vmem>>, %arg3: memref<16x32xf32, #tpu.memory_space<vmem>>, %arg4: memref<1x384xi32, #tpu.memory_space<vmem>>, %arg5: memref<16x128xf32, #tpu.memory_space<vmem>>, %arg6: memref<16x384xf32, #tpu.memory_space<vmem>>) attributes {dimension_semantics = [#tpu.dimension_semantics<parallel>], iteration_bounds = array<i64: 1>, scalar_prefetch = 0 : i64, scratch_operands = 1 : i64, tpu.core_type = #tpu.core_type<tc>, window_params = [{transform_indices = @transform_0, window_bounds = array<i64: 16, 24>}, {transform_indices = @transform_1, window_bounds = array<i64: 16, 32>}, {transform_indices = @transform_2, window_bounds = array<i64: 16, 32>}, {pipeline_mode = #tpu.pipeline_mode<synchronous>, transform_indices = @transform_3, window_bounds = array<i64: 1, 384>}, {transform_indices = @transform_4, window_bounds = array<i64: 16, 128>}]} {
    %c0 = arith.constant 0 : index
    %c0_0 = arith.constant 0 : index
    %0 = vector.load %arg1[%c0, %c0_0] : memref<16x24xf32, #tpu.memory_space<vmem>>, vector<16x24xf32>
    %c0_1 = arith.constant 0 : index
    %c0_2 = arith.constant 0 : index
    %1 = vector.load %arg2[%c0_1, %c0_2] : memref<16x32xf32, #tpu.memory_space<vmem>>, vector<16x32xf32>
    %c0_3 = arith.constant 0 : index
    %c0_4 = arith.constant 0 : index
    %2 = vector.load %arg3[%c0_3, %c0_4] : memref<16x32xf32, #tpu.memory_space<vmem>>, vector<16x32xf32>
    %cst = arith.constant dense<0xFF800000> : vector<16xf32>
    %3 = vector.multi_reduction <maximumf>, %0, %cst [1] : vector<16x24xf32> to vector<16xf32>
    %4 = vector.shape_cast %3 : vector<16xf32> to vector<16x1xf32>
    %5 = vector.broadcast %4 : vector<16x1xf32> to vector<16x24xf32>
    %6 = arith.subf %0, %5 : vector<16x24xf32>
    %7 = math.exp %6 : vector<16x24xf32>
    %cst_5 = arith.constant dense<0xFF800000> : vector<16xf32>
    %8 = vector.multi_reduction <maximumf>, %1, %cst_5 [1] : vector<16x32xf32> to vector<16xf32>
    %9 = vector.shape_cast %8 : vector<16xf32> to vector<16x1xf32>
    %10 = vector.broadcast %9 : vector<16x1xf32> to vector<16x32xf32>
    %11 = arith.subf %1, %10 : vector<16x32xf32>
    %12 = math.exp %11 : vector<16x32xf32>
    %cst_6 = arith.constant dense<0xFF800000> : vector<16xf32>
    %13 = vector.multi_reduction <maximumf>, %2, %cst_6 [1] : vector<16x32xf32> to vector<16xf32>
    %14 = vector.shape_cast %13 : vector<16xf32> to vector<16x1xf32>
    %15 = vector.broadcast %14 : vector<16x1xf32> to vector<16x32xf32>
    %16 = arith.subf %2, %15 : vector<16x32xf32>
    %17 = math.exp %16 : vector<16x32xf32>
    %cst_7 = arith.constant dense<0.000000e+00> : vector<16xf32>
    %18 = vector.multi_reduction <add>, %7, %cst_7 [1] : vector<16x24xf32> to vector<16xf32>
    %19 = vector.shape_cast %18 : vector<16xf32> to vector<16x1xf32>
    %cst_8 = arith.constant dense<0.000000e+00> : vector<16xf32>
    %20 = vector.multi_reduction <add>, %12, %cst_8 [1] : vector<16x32xf32> to vector<16xf32>
    %21 = vector.shape_cast %20 : vector<16xf32> to vector<16x1xf32>
    %cst_9 = arith.constant dense<0.000000e+00> : vector<16xf32>
    %22 = vector.multi_reduction <add>, %17, %cst_9 [1] : vector<16x32xf32> to vector<16xf32>
    %23 = vector.shape_cast %22 : vector<16xf32> to vector<16x1xf32>
    %cst_10 = arith.constant 0.000000e+00 : f32
    %24 = vector.broadcast %cst_10 : f32 to vector<16x384xf32>
    %c0_11 = arith.constant 0 : index
    %c0_12 = arith.constant 0 : index
    %25 = vector.load %arg6[%c0_11, %c0_12] : memref<16x384xf32, #tpu.memory_space<vmem>>, vector<16x384xf32>
    tpu.vector_store %arg6[%c0_11, %c0_12], %24 {strides = array<i32>} : memref<16x384xf32, #tpu.memory_space<vmem>>, vector<16x384xf32>,
    %c0_13 = arith.constant 0 : index
    %c0_14 = arith.constant 0 : index
    %26 = vector.load %arg6[%c0_13, %c0_14] : memref<16x384xf32, #tpu.memory_space<vmem>>, vector<16x24xf32>
    tpu.vector_store %arg6[%c0_13, %c0_14], %7 {strides = array<i32>} : memref<16x384xf32, #tpu.memory_space<vmem>>, vector<16x24xf32>,
    %c0_15 = arith.constant 0 : index
    %c128 = arith.constant 128 : index
    %27 = vector.load %arg6[%c0_15, %c128] : memref<16x384xf32, #tpu.memory_space<vmem>>, vector<16x32xf32>
    tpu.vector_store %arg6[%c0_15, %c128], %12 {strides = array<i32>} : memref<16x384xf32, #tpu.memory_space<vmem>>, vector<16x32xf32>,
    %c0_16 = arith.constant 0 : index
    %c256 = arith.constant 256 : index
    %28 = vector.load %arg6[%c0_16, %c256] : memref<16x384xf32, #tpu.memory_space<vmem>>, vector<16x32xf32>
    tpu.vector_store %arg6[%c0_16, %c256], %17 {strides = array<i32>} : memref<16x384xf32, #tpu.memory_space<vmem>>, vector<16x32xf32>,
    %c0_17 = arith.constant 0 : index
    %c0_18 = arith.constant 0 : index
    %29 = vector.load %arg4[%c0_17, %c0_18] : memref<1x384xi32, #tpu.memory_space<vmem>>, vector<1x384xi32>
    %30 = tpu.iota {dimensions = array<i32: 0>} : vector<384x1xi32>
    %31 = vector.broadcast %30 : vector<384x1xi32> to vector<384x384xi32>
    %32 = vector.broadcast %29 : vector<1x384xi32> to vector<384x384xi32>
    %33 = arith.cmpi eq, %31, %32 : vector<384x384xi32>
    %34 = arith.extui %33 : vector<384x384xi1> to vector<384x384xi32>
    %35 = arith.sitofp %34 : vector<384x384xi32> to vector<384x384xf32>
    %c0_19 = arith.constant 0 : index
    %c0_20 = arith.constant 0 : index
    %36 = vector.load %arg6[%c0_19, %c0_20] : memref<16x384xf32, #tpu.memory_space<vmem>>, vector<16x384xf32>
    %cst_21 = arith.constant dense<0.000000e+00> : vector<16x384xf32>
    %37 = tpu.matmul %36, %35, %cst_21 {dimension_numbers = #tpu.dot_dimension_numbers<[1], [0], [0], [1], [0, 0, 1, 1], [], []>, precision = #tpu.contract_precision<fp32>} : vector<16x384xf32>, vector<384x384xf32>, vector<16x384xf32> -> vector<16x384xf32>
    %38 = tpu.reciprocal %19 : vector<16x1xf32> -> vector<16x1xf32>
    %39 = tpu.reciprocal %21 : vector<16x1xf32> -> vector<16x1xf32>
    %40 = tpu.reciprocal %23 : vector<16x1xf32> -> vector<16x1xf32>
    %41 = vector.extract_strided_slice %37 {offsets = [0, 0], sizes = [16, 128], strides = [1, 1]} : vector<16x384xf32> to vector<16x128xf32>
    %42 = vector.broadcast %38 : vector<16x1xf32> to vector<16x128xf32>
    %43 = arith.mulf %41, %42 : vector<16x128xf32>
    %44 = vector.extract_strided_slice %37 {offsets = [0, 128], sizes = [16, 128], strides = [1, 1]} : vector<16x384xf32> to vector<16x128xf32>
    %45 = vector.broadcast %39 : vector<16x1xf32> to vector<16x128xf32>
    %46 = arith.mulf %44, %45 : vector<16x128xf32>
    %47 = vector.extract_strided_slice %37 {offsets = [0, 256], sizes = [16, 128], strides = [1, 1]} : vector<16x384xf32> to vector<16x128xf32>
    %48 = vector.broadcast %40 : vector<16x1xf32> to vector<16x128xf32>
    %49 = arith.mulf %47, %48 : vector<16x128xf32>
    %cst_22 = arith.constant 1.000000e+00 : f32
    %50 = vector.broadcast %cst_22 : f32 to vector<16x128xf32>
    %51 = arith.mulf %50, %43 : vector<16x128xf32>
    %52 = arith.addf %46, %49 : vector<16x128xf32>
    %cst_23 = arith.constant 1.000000e+00 : f32
    %53 = vector.broadcast %cst_23 : f32 to vector<16x128xf32>
    %54 = arith.mulf %53, %52 : vector<16x128xf32>
    %55 = arith.addf %51, %54 : vector<16x128xf32>
    %cst_24 = arith.constant 0.000000e+00 : f32
    %56 = vector.broadcast %cst_24 : f32 to vector<16x128xf32>
    %57 = arith.subf %56, %55 : vector<16x128xf32>
    %c0_25 = arith.constant 0 : index
    %c0_26 = arith.constant 0 : index
    %58 = vector.load %arg5[%c0_25, %c0_26] : memref<16x128xf32, #tpu.memory_space<vmem>>, vector<16x128xf32>
    tpu.vector_store %arg5[%c0_25, %c0_26], %57 {strides = array<i32>} : memref<16x128xf32, #tpu.memory_space<vmem>>, vector<16x128xf32>,
    return
  }
  func.func @transform_0(%arg0: i32) -> (i32, i32) {
    %c0_i32 = arith.constant 0 : i32
    %c0_i32_0 = arith.constant 0 : i32
    return %arg0, %c0_i32 : i32, i32
  }
  func.func @transform_1(%arg0: i32) -> (i32, i32) {
    %c0_i32 = arith.constant 0 : i32
    %c0_i32_0 = arith.constant 0 : i32
    return %arg0, %c0_i32 : i32, i32
  }
  func.func @transform_2(%arg0: i32) -> (i32, i32) {
    %c0_i32 = arith.constant 0 : i32
    %c0_i32_0 = arith.constant 0 : i32
    return %arg0, %c0_i32 : i32, i32
  }
  func.func @transform_3(%arg0: i32) -> (i32, i32) {
    %c0_i32 = arith.constant 0 : i32
    %c0_i32_0 = arith.constant 0 : i32
    %c0_i32_1 = arith.constant 0 : i32
    return %c0_i32, %c0_i32_0 : i32, i32
  }
  func.func @transform_4(%arg0: i32) -> (i32, i32) {
    %c0_i32 = arith.constant 0 : i32
    %c0_i32_0 = arith.constant 0 : i32
    return %arg0, %c0_i32 : i32, i32
  }
}

</mosaic_0001>

<bundles_post_ra>
// kernel: pallas_cost_matrix.1
= control target key start
LH: loop header
LB: loop body
LE: loop exit
PB: predicated region body
PF: predicated region fallthrough
CT: control target
= control target key end

     0   :  { %9 = vsyncpa [#allocation4], 0  ;;  %s9373_s0 = inlined_call_operand.vmem [shape: f32[16,24], index: 0, kind: input, shape index: {}]   ;;  %s9374_s1 = inlined_call_operand.hbm [shape: f32[16,32], index: 1, kind: input, shape index: {}]   ;;  %s9375_s2 = inlined_call_operand.hbm [shape: f32[16,32], index: 2, kind: input, shape index: {}]   ;;  %s9376_s3 = inlined_call_operand.vmem [shape: s32[1,384], index: 3, kind: input, shape index: {}]   ;;  %s9377_s4 = inlined_call_operand.vmem [shape: f32[16,128], index: 4, kind: output, shape index: {}]  }
   0x1   :  { %s17_s17 = sshll.u32 %s9374_s1, 4  ;;  %s18_s17 = int_to_ptr.hbm [resolvable:$true] %s17_s17 }
   0x2   :  { %10 = vsyncpa [#allocation6], 0  ;;  %s4759_s18 = smov [#allocation3]   ;;  %s30_s22 = sshll.u32 %s9375_s2, 4  ;;  %s31_s22 = int_to_ptr.hbm [resolvable:$true] %s30_s22 }
   0x3   :  { %s19_s19 = sshll.u32 %s4759_s18, 4  ;;  %s4760_s23 = smov 128   ;;  %s20_s19 = int_to_ptr.vmem [resolvable:$true] %s19_s19 }
   0x4   :  { %s4761_s24 = smov 8   ;;  %s4762_s25 = smov [#allocation5]  }
   0x5   :  { %25 = dma.hbm_to_vmem [thread:$0]  %s18_s17, 256, %s20_s19, [#allocation4], %s4760_s23, %s4760_s23, %s4761_s24  }
   0x6   :  { %s32_s26 = sshll.u32 %s4762_s25, 4  ;;  %s33_s26 = int_to_ptr.vmem [resolvable:$true] %s32_s26 }
   0x7   :  { %38 = dma.hbm_to_vmem [thread:$0]  %s31_s22, 256, %s33_s26, [#allocation6], %s4760_s23, %s4760_s23, %s4761_s24  }
   0x8   :  { %4755 = dma.done.wait [#allocation4], 256  }
   0x9   :  { %4756 = vsyncadd [#allocation4], 4294967040 }
   0xa   :  { %4757 = dma.done.wait [#allocation6], 256  }
   0xb   :  { %4758 = vsyncadd [#allocation6], 4294967040  ;;  %v124_v0 = vlaneseq  ;;  %v9389_v1 = vmov 0.0   ;;  %vm9379_vm0 = vcmask 261120   ;;  %vm9378_vm1 = vcmask 195584   ;;  %v4807_v4 = vld [vmem:[#allocation3] sm:$0xff] }
   0xc   :  { %111 = vst [vmem:[#allocation2] sm:$0xff] %v9389_v1  ;;  %v4812_v5 = vld [vmem:[%s9373_s0] sm:$0xff]  ;;  %v69_v10 = vsel %vm9379_vm0, %v4807_v4, -inf  ;;  %v4831_v13 = vld [vmem:[#allocation3 + $0x8] sm:$0xff]  ;;  %v4836_v14 = vld [vmem:[%s9373_s0 + $0x8] sm:$0xff]  ;;  %v9409_v30 = vmov 1.0  }
   0xd   :  { %v4797_v2 = vshrl.u32 %v124_v0, 7  ;;  %112 = vst [vmem:[#allocation2 + $0x8] sm:$0xff] %v9389_v1  ;;  %v4814_v6 = vld [vmem:[#allocation5] sm:$0xff]  ;;  %v56_v11 = vsel %vm9378_vm1, %v4812_v5, -inf  ;;  %v4838_v15 = vld [vmem:[#allocation5 + $0x8] sm:$0xff]  ;;  %70 = vmax.xlane.f32.xlu1 %v69_v10  ;;  %v72_v23 = vsel %vm9379_vm0, %v4831_v13, -inf }
   0xe   :  { %113 = vst [vmem:[#allocation2 + $0x10] sm:$0xff] %v9389_v1  ;;  %v81_v12 = vsel %vm9379_vm0, %v4814_v6, -inf  ;;  %57 = vmax.xlane.f32.xlu0 %v56_v11  ;;  %v123_v16 = vld [vmem:[%s9376_s3] sm:$0x7]  ;;  %v59_v24 = vsel %vm9378_vm1, %v4836_v14, -inf  ;;  %v84_v25 = vsel %vm9379_vm0, %v4838_v15, -inf }
   0xf   :  { %9672 = vst [vmem:[#allocation9_spill] sm:$0xff] %v4797_v2  ;;  %v4804_v3 = vadd.s32 120, %v4797_v2  ;;  %v4817_v7 = vadd.s32 112, %v4797_v2  ;;  %v4820_v8 = vadd.s32 104, %v4797_v2  ;;  %v4823_v9 = vadd.s32 96, %v4797_v2  ;;  %82 = vmax.xlane.f32.xlu2 %v81_v12 }
  0x10   :  { %114 = vst [vmem:[#allocation2 + $0x18] sm:$0xff] %v9389_v1  ;;  %v4844_v17 = vadd.s32 88, %v4797_v2  ;;  %v4847_v18 = vadd.s32 80, %v4797_v2  ;;  %v4849_v19 = vperm.slane %v123_v16, 0  ;;  %v4852_v20 = vadd.s32 72, %v4797_v2 }
  0x11   :  { %115 = vst [vmem:[#allocation2 + $0x20] sm:$0xff] %v9389_v1  ;;  %v4855_v21 = vadd.s32 64, %v4797_v2  ;;  %v4858_v22 = vadd.s32 56, %v4797_v2  ;;  %v4867_v26 = vadd.s32 48, %v4797_v2  ;;  %v4924_v36 = vadd.s32 40, %v4797_v2 }
  0x12   :  { %9673 = vst [vmem:[#allocation10_spill] sm:$0xff] %v4804_v3  ;;  %vm221_vm2 = vcmp.eq.s32.totalorder %v4804_v3, %v4849_v19  ;;  %vm218_vm3 = vcmp.eq.s32.totalorder %v4817_v7, %v4849_v19  ;;  %vm215_vm4 = vcmp.eq.s32.totalorder %v4820_v8, %v4849_v19  ;;  %vm212_vm5 = vcmp.eq.s32.totalorder %v4823_v9, %v4849_v19 }
  0x13   :  { %116 = vst [vmem:[#allocation2 + $0x28] sm:$0xff] %v9389_v1  ;;  %v4111_v27 = vsel %vm221_vm2, 1.0, %v9389_v1  ;;  %v4108_v28 = vsel %vm218_vm3, 1.0, %v9389_v1  ;;  %v4105_v29 = vsel %vm215_vm4, 1.0, %v9389_v1  ;;  %4226 = vmatpush.msk.msra.mxu3 %vm221_vm2, %v9409_v30  ;;  %v4102_v31 = vsel %vm212_vm5, 1.0, %v9389_v1  ;;  %4210 = vmatpush.msk.msra.mxu0 %vm221_vm2, %v9409_v30 }
  0x14   :  { %9674 = vst [vmem:[#allocation11_spill] sm:$0xff] %v4817_v7  ;;  %v4901_v32 = vsub.f32 %v4111_v27, %v4111_v27  ;;  %v4903_v33 = vsub.f32 %v4108_v28, %v4108_v28  ;;  %v4905_v34 = vsub.f32 %v4105_v29, %v4105_v29  ;;  %v4907_v35 = vsub.f32 %v4102_v31, %v4102_v31 }
  0x15   :  { %9675 = vst [vmem:[#allocation12_spill] sm:$0xff] %v4820_v8  ;;  %4227 = vmatpush.msk.msra.mxu3 %vm218_vm3, %v9409_v30  ;;  %vm209_vm6 = vcmp.eq.s32.totalorder %v4844_v17, %v4849_v19  ;;  %4211 = vmatpush.msk.msra.mxu0 %vm218_vm3, %v9409_v30  ;;  %vm206_vm7 = vcmp.eq.s32.totalorder %v4847_v18, %v4849_v19  ;;  %v4975_v51 = vadd.s32 32, %v4797_v2  ;;  %v4981_v55 = vadd.s32 24, %v4797_v2 }
  0x16   :  { %9676 = vst [vmem:[#allocation13_spill] sm:$0xff] %v4823_v9  ;;  %vm203_vm8 = vcmp.eq.s32.totalorder %v4852_v20, %v4849_v19  ;;  %v665_v37 = vand.u32 4294901760, %v4901_v32  ;;  %v671_v38 = vand.u32 4294901760, %v4903_v33  ;;  %770 = vmatpush.msra.mxu2 %v4901_v32  ;;  %v677_v39 = vand.u32 4294901760, %v4905_v34  ;;  %73 = vmax.xlane.f32.xlu1 %v72_v23 }
  0x17   :  { %9677 = vst [vmem:[#allocation14_spill] sm:$0xff] %v4844_v17  ;;  %v683_v40 = vand.u32 4294901760, %v4907_v35  ;;  %60 = vmax.xlane.f32.xlu0 %v59_v24  ;;  %v4099_v41 = vsel %vm209_vm6, 1.0, %v9389_v1  ;;  %v4096_v42 = vsel %vm206_vm7, 1.0, %v9389_v1  ;;  %v4093_v43 = vsel %vm203_vm8, 1.0, %v9389_v1  ;;  %85 = vmax.xlane.f32.xlu2 %v84_v25 }
  0x18   :  { %9678 = vst [vmem:[#allocation15_spill] sm:$0xff] %v4847_v18  ;;  %vm200_vm9 = vcmp.eq.s32.totalorder %v4855_v21, %v4849_v19  ;;  %v666_v44 = vsub.f32 %v4901_v32, %v665_v37  ;;  %v672_v45 = vsub.f32 %v4903_v33, %v671_v38  ;;  %v678_v46 = vsub.f32 %v4905_v34, %v677_v39 }
  0x19   :  { %9679 = vst [vmem:[#allocation16_spill] sm:$0xff] %v4852_v20  ;;  %773 = vmatpush.msra.mxu2 %v4903_v33  ;;  %v4090_v47 = vsel %vm200_vm9, 1.0, %v9389_v1  ;;  %v684_v48 = vsub.f32 %v4907_v35, %v683_v40  ;;  %v4962_v49 = vsub.f32 %v4099_v41, %v4099_v41  ;;  %4228 = vmatpush.msk.msra.mxu3 %vm215_vm4, %v9409_v30  ;;  %v5047_v25 = vadd.s32 16, %v4797_v2 }
  0x1a   :  { %9680 = vst [vmem:[#allocation17_spill] sm:$0xff] %v4855_v21  ;;  %v4968_v50 = vsub.f32 %v4096_v42, %v4096_v42  ;;  %4212 = vmatpush.msk.msra.mxu0 %vm215_vm4, %v9409_v30  ;;  %v667_v52 = vand.u32 4294901760, %v666_v44  ;;  %v673_v53 = vand.u32 4294901760, %v672_v45  ;;  %v4978_v54 = vsub.f32 %v4093_v43, %v4093_v43 }
  0x1b   :  { %9681 = vst [vmem:[#allocation18_spill] sm:$0xff] %v4858_v22  ;;  %776 = vmatpush.msra.mxu2 %v4905_v34  ;;  %v679_v56 = vand.u32 4294901760, %v678_v46  ;;  %v689_v57 = vand.u32 4294901760, %v4962_v49  ;;  %4229 = vmatpush.msk.msra.mxu3 %vm212_vm5, %v9409_v30  ;;  %v4993_v59 = vsub.f32 %v4090_v47, %v4090_v47  ;;  %vm197_vm10 = vcmp.eq.s32.totalorder %v4858_v22, %v4849_v19 }
  0x1c   :  { %9682 = vst [vmem:[#allocation19_spill] sm:$0xff] %v4867_v26  ;;  %v9397_v58 = vand.u32 4294901760, %v4968_v50  ;;  %4213 = vmatpush.msk.msra.mxu0 %vm212_vm5, %v9409_v30  ;;  %668 = vmatpush.msra.mxu1 %v667_v52  ;;  %v9393_v60 = vand.u32 4294901760, %v4978_v54  ;;  %vm9380_vm11 = vcmp.eq.s32.totalorder %v4867_v26, %v4849_v19  ;;  %vm9382_vm12 = vcmp.eq.s32.totalorder %v4924_v36, %v4849_v19 }
  0x1d   :  { %9683 = vst [vmem:[#allocation20_spill] sm:$0xff] %v4924_v36  ;;  %779 = vmatpush.msra.mxu2 %v4907_v35  ;;  %v685_v61 = vand.u32 4294901760, %v684_v48  ;;  %v690_v62 = vsub.f32 %v4962_v49, %v689_v57  ;;  %4230 = vmatpush.msk.msra.mxu3 %vm209_vm6, %v9409_v30  ;;  %v4087_v0 = vsel %vm197_vm10, 1.0, %v9389_v1  ;;  %v9391_v10 = vand.u32 4294901760, %v4993_v59 }
  0x1e   :  { %9684 = vst [vmem:[#allocation21_spill] sm:$0xff] %v4975_v51  ;;  %v696_v63 = vsub.f32 %v4968_v50, %v9397_v58  ;;  %4214 = vmatpush.msk.msra.mxu0 %vm209_vm6, %v9409_v30  ;;  %674 = vmatpush.msra.mxu1 %v673_v53  ;;  %v5023_v11 = vsub.f32 %v4087_v0, %v4087_v0  ;;  %v4084_v12 = vsel %vm9380_vm11, 1.0, %v9389_v1  ;;  %v4081_v16 = vsel %vm9382_vm12, 1.0, %v9389_v1 }
  0x1f   :  { %9685 = vst [vmem:[#allocation22_spill] sm:$0xff] %v4981_v55  ;;  %782 = vmatpush.msra.mxu2 %v4962_v49  ;;  %v702_v23 = vsub.f32 %v4978_v54, %v9393_v60  ;;  %4231 = vmatpush.msk.msra.mxu3 %vm206_vm7, %v9409_v30  ;;  %v5044_v24 = vsub.f32 %v4084_v12, %v4084_v12  ;;  %v691_v27 = vand.u32 4294901760, %v690_v62  ;;  %v5092_v47 = vadd.s32 8, %v4797_v2 }
  0x20   :  { %4215 = vmatpush.msk.msra.mxu0 %vm206_vm7, %v9409_v30  ;;  %9686 = vst [vmem:[#allocation23_spill] sm:$0xff] %v5047_v25  ;;  %680 = vmatpush.msra.mxu1 %v679_v56  ;;  %v9387_v28 = vand.u32 4294901760, %v5023_v11  ;;  %v5051_v29 = vsub.f32 %v4081_v16, %v4081_v16  ;;  %vm9383_vm13 = vcmp.eq.s32.totalorder %v4975_v51, %v4849_v19  ;;  %v697_v42 = vand.u32 4294901760, %v696_v63 }
  0x21   :  { %785 = vmatpush.msra.mxu2 %v4968_v50  ;;  %4232 = vmatpush.msk.msra.mxu3 %vm203_vm8, %v9409_v30  ;;  %v9386_v31 = vand.u32 4294901760, %v5044_v24  ;;  %v4078_v41 = vsel %vm9383_vm13, 1.0, %v9389_v1  ;;  %vm185_vm14 = vcmp.eq.s32.totalorder %v4981_v55, %v4849_v19  ;;  %v708_v43 = vsub.f32 %v4993_v59, %v9391_v10  ;;  %9687 = vst [vmem:[#allocation24_spill] sm:$0xff] %v5092_v47 }
  0x22   :  { %4216 = vmatpush.msk.msra.mxu0 %vm203_vm8, %v9409_v30  ;;  %686 = vmatpush.msra.mxu1 %v685_v61  ;;  %v5074_v44 = vsub.f32 %v4078_v41, %v4078_v41  ;;  %v4075_v45 = vsel %vm185_vm14, 1.0, %v9389_v1  ;;  %v9384_v46 = vand.u32 4294901760, %v5051_v29  ;;  %vm182_vm15 = vcmp.eq.s32.totalorder %v5047_v25, %v4849_v19 }
  0x23   :  { %788 = vmatpush.msra.mxu2 %v4978_v54  ;;  %4233 = vmatpush.msk.msra.mxu3 %vm200_vm9, %v9409_v30  ;;  %v703_v48 = vand.u32 4294901760, %v702_v23  ;;  %v714_v52 = vsub.f32 %v5023_v11, %v9387_v28  ;;  %v5098_v53 = vsub.f32 %v4075_v45, %v4075_v45  ;;  %v4072_v56 = vsel %vm182_vm15, 1.0, %v9389_v1 }
  0x24   :  { %4217 = vmatpush.msk.msra.mxu0 %vm200_vm9, %v9409_v30  ;;  %692 = vmatpush.msra.mxu1 %v691_v27  ;;  %v720_v61 = vsub.f32 %v5044_v24, %v9386_v31  ;;  %v9381_v62 = vand.u32 4294901760, %v5074_v44  ;;  %vm179_vm1 = vcmp.eq.s32.totalorder %v5092_v47, %v4849_v19  ;;  %v709_v63 = vand.u32 4294901760, %v708_v43 }
  0x25   :  { %791 = vmatpush.msra.mxu2 %v4993_v59  ;;  %4234 = vmatpush.msk.msra.mxu3 %vm197_vm10, %v9409_v30  ;;  %v5119_v0 = vsub.f32 %v4072_v56, %v4072_v56  ;;  %v4069_v12 = vsel %vm179_vm1, 1.0, %v9389_v1  ;;  %vm176_vm0 = vcmp.eq.s32.totalorder %v4797_v2, %v4849_v19  ;;  %v726_v16 = vsub.f32 %v5051_v29, %v9384_v46 }
  0x26   :  { %4218 = vmatpush.msk.msra.mxu0 %vm197_vm10, %v9409_v30  ;;  %698 = vmatpush.msra.mxu1 %v697_v42  ;;  %v4066_v23 = vsel %vm176_vm0, 1.0, %v9389_v1  ;;  %v715_v27 = vand.u32 4294901760, %v714_v52  ;;  %v9385_v41 = vand.u32 4294901760, %v5098_v53  ;;  %v5144_v42 = vsub.f32 %v4069_v12, %v4069_v12 }
  0x27   :  { %794 = vmatpush.msra.mxu2 %v5023_v11  ;;  %4235 = vmatpush.msk.msra.mxu3 %vm9380_vm11, %v9409_v30  ;;  %v5147_v43 = vadd.s32 248, %v4797_v2  ;;  %v721_v45 = vand.u32 4294901760, %v720_v61  ;;  %v732_v56 = vsub.f32 %v5074_v44, %v9381_v62  ;;  %v9388_v52 = vand.u32 4294901760, %v5119_v0 }
  0x28   :  { %4219 = vmatpush.msk.msra.mxu0 %vm9380_vm11, %v9409_v30  ;;  %704 = vmatpush.msra.mxu1 %v703_v48  ;;  %v5161_v48 = vadd.s32 240, %v4797_v2  ;;  %v5165_v61 = vsub.f32 %v4066_v23, %v4066_v23  ;;  %v5170_v12 = vadd.s32 232, %v4797_v2  ;;  %v727_v62 = vand.u32 4294901760, %v726_v16 }
  0x29   :  { %797 = vmatpush.msra.mxu2 %v5044_v24  ;;  %9688 = vst [vmem:[#allocation25_spill] sm:$0xff] %v5147_v43  ;;  %4236 = vmatpush.msk.msra.mxu3 %vm9382_vm12, %v9409_v30  ;;  %vm9398_vm11 = vcmp.eq.s32.totalorder %v5147_v43, %v4849_v19  ;;  %v9392_v16 = vand.u32 4294901760, %v5144_v42  ;;  %v733_v46 = vand.u32 4294901760, %v732_v56  ;;  %v744_v56 = vsub.f32 %v5119_v0, %v9388_v52 }
  0x2a   :  { %4220 = vmatpush.msk.msra.mxu0 %vm9382_vm12, %v9409_v30  ;;  %9689 = vst [vmem:[#allocation26_spill] sm:$0xff] %v5161_v48  ;;  %710 = vmatpush.msra.mxu1 %v709_v63  ;;  %vm266_vm12 = vcmp.eq.s32.totalorder %v5161_v48, %v4849_v19  ;;  %v738_v63 = vsub.f32 %v5098_v53, %v9385_v41  ;;  %v4159_v23 = vsel %vm9398_vm11, 1.0, %v9389_v1  ;;  %v9396_v31 = vand.u32 4294901760, %v5165_v61 }
  0x2b   :  { %800 = vmatpush.msra.mxu2 %v5051_v29  ;;  %9690 = vst [vmem:[#allocation27_spill] sm:$0xff] %v5170_v12  ;;  %4237 = vmatpush.msk.msra.mxu3 %vm9383_vm13, %v9409_v30  ;;  %v4156_v41 = vsel %vm266_vm12, 1.0, %v9389_v1  ;;  %v5272_v58 = vadd.s32 224, %v4797_v2  ;;  %v9693_v32 = vand.u32 4294901760, %v4978_v54  ;;  %v9694_v33 = vand.u32 4294901760, %v4993_v59 }
  0x2c   :  { %4221 = vmatpush.msk.msra.mxu0 %vm9383_vm13, %v9409_v30  ;;  %716 = vmatpush.msra.mxu1 %v715_v27  ;;  %vm263_vm13 = vcmp.eq.s32.totalorder %v5170_v12, %v4849_v19  ;;  %v5201_v27 = vsub.f32 %v4159_v23, %v4159_v23  ;;  %v5212_v28 = vsub.f32 %v4156_v41, %v4156_v41  ;;  %v739_v41 = vand.u32 4294901760, %v738_v63 }
  0x2d   :  { %803 = vmatpush.msra.mxu2 %v5074_v44  ;;  %4238 = vmatpush.msk.msra.mxu3 %vm185_vm14, %v9409_v30  ;;  %v4153_v23 = vsel %vm263_vm13, 1.0, %v9389_v1  ;;  %v750_v1 = vsub.f32 %v5144_v42, %v9392_v16  ;;  %v745_v63 = vand.u32 4294901760, %v744_v56  ;;  %v756_v16 = vsub.f32 %v5165_v61, %v9396_v31  ;;  %9691 = vst [vmem:[#allocation28_spill] sm:$0xff] %v5272_v58 }
  0x2e   :  { %4222 = vmatpush.msk.msra.mxu0 %vm185_vm14, %v9409_v30  ;;  %722 = vmatpush.msra.mxu1 %v721_v45  ;;  %v9394_v45 = vand.u32 4294901760, %v5201_v27  ;;  %v5227_v52 = vsub.f32 %v4153_v23, %v4153_v23  ;;  %v9395_v10 = vand.u32 4294901760, %v5212_v28  ;;  %v9695_v34 = vand.u32 4294901760, %v5023_v11 }
  0x2f   :  { %806 = vmatpush.msra.mxu2 %v5098_v53  ;;  %4239 = vmatpush.msk.msra.mxu3 %vm182_vm15, %v9409_v30  ;;  %v751_v56 = vand.u32 4294901760, %v750_v1  ;;  %v757_v31 = vand.u32 4294901760, %v756_v16  ;;  %v9692_v1 = vand.u32 4294901760, %v4968_v50  ;;  %v9696_v35 = vand.u32 4294901760, %v5044_v24 }
  0x30   :  { %4223 = vmatpush.msk.msra.mxu0 %vm182_vm15, %v9409_v30  ;;  %728 = vmatpush.msra.mxu1 %v727_v62  ;;  %v1038_v23 = vsub.f32 %v5201_v27, %v9394_v45  ;;  %v9408_v62 = vand.u32 4294901760, %v5227_v52  ;;  %v1044_v60 = vsub.f32 %v5212_v28, %v9395_v10  ;;  %v9704_v49 = vand.u32 4294901760, %v5144_v42 }
  0x31   :  { %809 = vmatpush.msra.mxu2 %v5119_v0  ;;  %4240 = vmatpush.msk.msra.mxu3 %vm179_vm1, %v9409_v30  ;;  %v9705_v50 = vand.u32 4294901760, %v5165_v61  ;;  %v5383_v54 = vadd.s32 216, %v4797_v2  ;;  %v9719_v47 = vmov 1.0  }
  0x32   :  { %4224 = vmatpush.msk.msra.mxu0 %vm179_vm1, %v9409_v30  ;;  %734 = vmatpush.msra.mxu1 %v733_v46  ;;  %v1039_v45 = vand.u32 4294901760, %v1038_v23  ;;  %v1050_v46 = vsub.f32 %v5227_v52, %v9408_v62  ;;  %v1045_v10 = vand.u32 4294901760, %v1044_v60 }
  0x33   :  { %812 = vmatpush.msra.mxu2 %v5144_v42  ;;  %4241 = vmatpush.msk.msra.mxu3 %vm176_vm0, %v9409_v30  ;;  %9706 = vst [vmem:[#allocation29_spill] sm:$0xff] %v5383_v54 }
  0x34   :  { %4225 = vmatpush.msk.msra.mxu0 %vm176_vm0, %v9409_v30  ;;  %740 = vmatpush.msra.mxu1 %v739_v41  ;;  %v1051_v23 = vand.u32 4294901760, %v1050_v46 }
  0x35   :  { %815 = vmatpush.msra.mxu2 %v5165_v61  ;;  %1040 = vmatpush.msrb.mxu3 %v1039_v45  ;;  %v5433_v61 = vadd.s32 192, %v4797_v2 }
  0x36   :  { %746 = vmatpush.msra.mxu1 %v745_v63  ;;  %875 = vmatpush.msrb.mxu0 %v665_v37  ;;  %v9697_v37 = vand.u32 4294901760, %v5051_v29 }
  0x37   :  { %4258 = vmatpush.msk.msrb.mxu2 %vm9398_vm11, %v9409_v30  ;;  %1046 = vmatpush.msrb.mxu3 %v1045_v10  ;;  %vm260_vm11 = vcmp.eq.s32.totalorder %v5272_v58, %v4849_v19  ;;  %v5394_v10 = vadd.s32 208, %v4797_v2  ;;  %9710 = vst [vmem:[#allocation32_spill] sm:$0xff] %v5433_v61 }
  0x38   :  { %752 = vmatpush.msra.mxu1 %v751_v56  ;;  %879 = vmatpush.msrb.mxu0 %v671_v38  ;;  %v9698_v38 = vand.u32 4294901760, %v5074_v44  ;;  %v5448_v56 = vadd.s32 184, %v4797_v2 }
  0x39   :  { %4259 = vmatpush.msk.msrb.mxu2 %vm266_vm12, %v9409_v30  ;;  %1052 = vmatpush.msrb.mxu3 %v1051_v23  ;;  %9708 = vst [vmem:[#allocation30_spill] sm:$0xff] %v5394_v10 }
  0x3a   :  { %758 = vmatpush.msra.mxu1 %v757_v31  ;;  %883 = vmatpush.msrb.mxu0 %v677_v39  ;;  %v9700_v39 = vand.u32 4294901760, %v5098_v53  ;;  %v5410_v31 = vadd.s32 200, %v4797_v2  ;;  %9711 = vst [vmem:[#allocation33_spill] sm:$0xff] %v5448_v56 }
  0x3b   :  { %4260 = vmatpush.msk.msrb.mxu2 %vm263_vm13, %v9409_v30 }
  0x3c   :  { %4242 = vmatpush.msk.msrb.mxu1 %vm221_vm2, %v9409_v30  ;;  %887 = vmatpush.msrb.mxu0 %v683_v40  ;;  %vm9699_vm2 = vcmp.eq.s32.totalorder %v4867_v26, %v4849_v19  ;;  %v9702_v40 = vand.u32 4294901760, %v5119_v0  ;;  %9709 = vst [vmem:[#allocation31_spill] sm:$0xff] %v5410_v31 }
  0x3d   :  { %4261 = vmatpush.msk.msrb.mxu2 %vm260_vm11, %v9409_v30 }
  0x3e   :  { %4243 = vmatpush.msk.msrb.mxu1 %vm218_vm3, %v9409_v30  ;;  %891 = vmatpush.msrb.mxu0 %v689_v57  ;;  %vm9701_vm3 = vcmp.eq.s32.totalorder %v4924_v36, %v4849_v19  ;;  %v9707_v57 = vmov 0.0  }
  0x3f   :  { %v4150_v59 = vsel %vm260_vm11, 1.0, %v9707_v57 }
  0x40   :  { %4244 = vmatpush.msk.msrb.mxu1 %vm215_vm4, %v9409_v30  ;;  %895 = vmatpush.msrb.mxu0 %v9692_v1  ;;  %vm9703_vm4 = vcmp.eq.s32.totalorder %v4975_v51, %v4849_v19  ;;  %v5391_v60 = vsub.f32 %v4150_v59, %v4150_v59 }
  0x42   :  { %4245 = vmatpush.msk.msrb.mxu1 %vm212_vm5, %v9409_v30  ;;  %899 = vmatpush.msrb.mxu0 %v9693_v32  ;;  %vm257_vm5 = vcmp.eq.s32.totalorder %v5383_v54, %v4849_v19  ;;  %v9407_v24 = vand.u32 4294901760, %v5391_v60 }
  0x43   :  { %4262 = vmatpush.msk.msrb.mxu2 %vm257_vm5, %v9409_v30  ;;  %v4147_v11 = vsel %vm257_vm5, 1.0, %v9707_v57 }
  0x44   :  { %4246 = vmatpush.msk.msrb.mxu1 %vm209_vm6, %v9409_v30  ;;  %903 = vmatpush.msrb.mxu0 %v9694_v33  ;;  %v5407_v29 = vsub.f32 %v4147_v11, %v4147_v11  ;;  %v1056_v53 = vsub.f32 %v5391_v60, %v9407_v24  ;;  %vm248_vm6 = vcmp.eq.s32.totalorder %v5433_v61, %v4849_v19 }
  0x45   :  { %v4138_v33 = vsel %vm248_vm6, 1.0, %v9707_v57 }
  0x46   :  { %4247 = vmatpush.msk.msrb.mxu1 %vm206_vm7, %v9409_v30  ;;  %907 = vmatpush.msrb.mxu0 %v9695_v34  ;;  %v9406_v0 = vand.u32 4294901760, %v5407_v29  ;;  %v1057_v45 = vand.u32 4294901760, %v1056_v53  ;;  %vm245_vm7 = vcmp.eq.s32.totalorder %v5448_v56, %v4849_v19  ;;  %v5464_v34 = vsub.f32 %v4138_v33, %v4138_v33 }
  0x48   :  { %4248 = vmatpush.msk.msrb.mxu1 %vm203_vm8, %v9409_v30  ;;  %911 = vmatpush.msrb.mxu0 %v9696_v35  ;;  %v1062_v41 = vsub.f32 %v5407_v29, %v9406_v0  ;;  %v5467_v35 = vadd.s32 176, %v4797_v2 }
  0x49   :  { %1058 = vmatpush.msrb.mxu3 %v1057_v45 }
  0x4a   :  { %4249 = vmatpush.msk.msrb.mxu1 %vm200_vm9, %v9409_v30  ;;  %915 = vmatpush.msrb.mxu0 %v9697_v37  ;;  %v1063_v23 = vand.u32 4294901760, %v1062_v41  ;;  %9712 = vst [vmem:[#allocation34_spill] sm:$0xff] %v5467_v35  ;;  %vm242_vm8 = vcmp.eq.s32.totalorder %v5467_v35, %v4849_v19 }
  0x4b   :  { %v4132_v11 = vsel %vm242_vm8, 1.0, %v9707_v57 }
  0x4c   :  { %4250 = vmatpush.msk.msrb.mxu1 %vm197_vm10, %v9409_v30  ;;  %919 = vmatpush.msrb.mxu0 %v9698_v38  ;;  %v5505_v45 = vsub.f32 %v4132_v11, %v4132_v11 }
  0x4d   :  { %1064 = vmatpush.msrb.mxu3 %v1063_v23 }
  0x4e   :  { %4251 = vmatpush.msk.msrb.mxu1 %vm9699_vm2, %v9409_v30  ;;  %923 = vmatpush.msrb.mxu0 %v9700_v39  ;;  %v4135_v39 = vsel %vm245_vm7, 1.0, %v9707_v57 }
  0x50   :  { %4252 = vmatpush.msk.msrb.mxu1 %vm9701_vm3, %v9409_v30  ;;  %927 = vmatpush.msrb.mxu0 %v9702_v40  ;;  %v5481_v40 = vadd.s32 168, %v4797_v2 }
  0x52   :  { %4253 = vmatpush.msk.msrb.mxu1 %vm9703_vm4, %v9409_v30  ;;  %931 = vmatpush.msrb.mxu0 %v9704_v49  ;;  %9713 = vst [vmem:[#allocation35_spill] sm:$0xff] %v5481_v40  ;;  %v9400_v49 = vand.u32 4294901760, %v5464_v34  ;;  %vm9436_vm9 = vcmp.eq.s32.totalorder %v5481_v40, %v4849_v19  ;;  %vm9720_vm4 = vcmask 261120  }
  0x53   :  { %v4129_v41 = vsel %vm9436_vm9, 1.0, %v9707_v57 }
  0x54   :  { %4254 = vmatpush.msk.msrb.mxu1 %vm185_vm14, %v9409_v30  ;;  %935 = vmatpush.msrb.mxu0 %v9705_v50  ;;  %v5486_v50 = vsub.f32 %v4135_v39, %v4135_v39  ;;  %v1080_v53 = vsub.f32 %v5464_v34, %v9400_v49  ;;  %v5517_v23 = vsub.f32 %v4129_v41, %v4129_v41 }
  0x56   :  { %4255 = vmatpush.msk.msrb.mxu1 %vm182_vm15, %v9409_v30  ;;  %v1081_v33 = vand.u32 4294901760, %v1080_v53  ;;  %v5540_v53 = vadd.s32 144, %v4797_v2 }
  0x58   :  { %4256 = vmatpush.msk.msrb.mxu1 %vm179_vm1, %v9409_v30  ;;  %vm251_vm1 = vcmp.eq.s32.totalorder %v5410_v31, %v4849_v19  ;;  %9716 = vst [vmem:[#allocation38_spill] sm:$0xff] %v5540_v53  ;;  %vm9433_vm15 = vcmp.eq.s32.totalorder %v5540_v53, %v4849_v19 }
  0x59   :  { %v4141_v16 = vsel %vm251_vm1, 1.0, %v9707_v57 }
  0x5a   :  { %4257 = vmatpush.msk.msrb.mxu1 %vm176_vm0, %v9409_v30  ;;  %vm254_vm0 = vcmp.eq.s32.totalorder %v5394_v10, %v4849_v19  ;;  %v5443_v46 = vsub.f32 %v4141_v16, %v4141_v16  ;;  %v9399_v16 = vand.u32 4294901760, %v5486_v50 }
  0x5b   :  { %4263 = vmatpush.msk.msrb.mxu2 %vm254_vm0, %v9409_v30  ;;  %v4144_v44 = vsel %vm254_vm0, 1.0, %v9707_v57 }
  0x5c   :  { %v5426_v42 = vsub.f32 %v4144_v44, %v4144_v44  ;;  %v9401_v32 = vand.u32 4294901760, %v5443_v46  ;;  %v5499_v44 = vadd.s32 160, %v4797_v2 }
  0x5d   :  { %4264 = vmatpush.msk.msrb.mxu2 %vm251_vm1, %v9409_v30 }
  0x5e   :  { %v9404_v63 = vand.u32 4294901760, %v5426_v42  ;;  %v1074_v38 = vsub.f32 %v5443_v46, %v9401_v32  ;;  %9714 = vst [vmem:[#allocation36_spill] sm:$0xff] %v5499_v44  ;;  %vm9435_vm10 = vcmp.eq.s32.totalorder %v5499_v44, %v4849_v19 }
  0x5f   :  { %4265 = vmatpush.msk.msrb.mxu2 %vm248_vm6, %v9409_v30  ;;  %v4126_v39 = vsel %vm9435_vm10, 1.0, %v9707_v57 }
  0x60   :  { %v1068_v1 = vsub.f32 %v5426_v42, %v9404_v63  ;;  %v1075_v59 = vand.u32 4294901760, %v1074_v38  ;;  %v9402_v38 = vand.u32 4294901760, %v5505_v45  ;;  %v5537_v11 = vsub.f32 %v4126_v39, %v4126_v39 }
  0x61   :  { %4266 = vmatpush.msk.msrb.mxu2 %vm245_vm7, %v9409_v30 }
  0x62   :  { %v1069_v37 = vand.u32 4294901760, %v1068_v1  ;;  %v5520_v1 = vadd.s32 152, %v4797_v2 }
  0x63   :  { %4267 = vmatpush.msk.msrb.mxu2 %vm242_vm8, %v9409_v30 }
  0x64   :  { %1070 = vmatpush.msrb.mxu3 %v1069_v37  ;;  %9715 = vst [vmem:[#allocation37_spill] sm:$0xff] %v5520_v1  ;;  %v1086_v37 = vsub.f32 %v5486_v50, %v9399_v16  ;;  %vm9434_vm14 = vcmp.eq.s32.totalorder %v5520_v1, %v4849_v19  ;;  %v1092_v16 = vsub.f32 %v5505_v45, %v9402_v38  ;;  %v5562_v38 = vadd.s32 136, %v4797_v2 }
  0x65   :  { %4268 = vmatpush.msk.msrb.mxu2 %vm9436_vm9, %v9409_v30  ;;  %v4123_v49 = vsel %vm9434_vm14, 1.0, %v9707_v57 }
  0x66   :  { %1076 = vmatpush.msrb.mxu3 %v1075_v59  ;;  %v9403_v59 = vand.u32 4294901760, %v5517_v23  ;;  %v1087_v41 = vand.u32 4294901760, %v1086_v37  ;;  %v5559_v37 = vsub.f32 %v4123_v49, %v4123_v49  ;;  %v1093_v39 = vand.u32 4294901760, %v1092_v16  ;;  %9717 = vst [vmem:[#allocation39_spill] sm:$0xff] %v5562_v38 }
  0x67   :  { %4269 = vmatpush.msk.msrb.mxu2 %vm9435_vm10, %v9409_v30  ;;  %vm9432_vm2 = vcmp.eq.s32.totalorder %v5562_v38, %v4849_v19 }
  0x68   :  { %1082 = vmatpush.msrb.mxu3 %v1081_v33  ;;  %v1098_v32 = vsub.f32 %v5517_v23, %v9403_v59  ;;  %v9405_v33 = vand.u32 4294901760, %v5537_v11  ;;  %v4120_v59 = vsel %vm9433_vm15, 1.0, %v9707_v57  ;;  %v9414_v16 = vand.u32 4294901760, %v5559_v37 }
  0x69   :  { %4270 = vmatpush.msk.msrb.mxu2 %vm9434_vm14, %v9409_v30 }
  0x6a   :  { %1088 = vmatpush.msrb.mxu3 %v1087_v41  ;;  %v1099_v63 = vand.u32 4294901760, %v1098_v32  ;;  %v1104_v49 = vsub.f32 %v5537_v11, %v9405_v33  ;;  %v5578_v41 = vsub.f32 %v4120_v59, %v4120_v59  ;;  %v5585_v32 = vadd.s32 128, %v4797_v2 }
  0x6b   :  { %4271 = vmatpush.msk.msrb.mxu2 %vm9433_vm15, %v9409_v30  ;;  %v1110_v59 = vsub.f32 %v5559_v37, %v9414_v16 }
  0x6c   :  { %1094 = vmatpush.msrb.mxu3 %v1093_v39  ;;  %9718 = vst [vmem:[#allocation40_spill] sm:$0xff] %v5585_v32  ;;  %v4117_v39 = vsel %vm9432_vm2, 1.0, %v9707_v57  ;;  %v1105_v33 = vand.u32 4294901760, %v1104_v49  ;;  %v9413_v0 = vand.u32 4294901760, %v5578_v41  ;;  %vm9431_vm3 = vcmp.eq.s32.totalorder %v5585_v32, %v4849_v19 }
  0x6d   :  { %4272 = vmatpush.msk.msrb.mxu2 %vm9432_vm2, %v9409_v30  ;;  %v5595_v24 = vsub.f32 %v4117_v39, %v4117_v39  ;;  %v1111_v62 = vand.u32 4294901760, %v1110_v59  ;;  %v4114_v49 = vsel %vm9431_vm3, 1.0, %v9707_v57  ;;  %vm9722_vm2 = vcmask 195584  }
  0x6e   :  { %1100 = vmatpush.msrb.mxu3 %v1099_v63  ;;  %v1116_v30 = vsub.f32 %v5578_v41, %v9413_v0  ;;  %v5611_v39 = vsub.f32 %v4114_v49, %v4114_v49 }
  0x6f   :  { %4273 = vmatpush.msk.msrb.mxu2 %vm9431_vm3, %v9719_v47  ;;  %v9423_v63 = vand.u32 4294901760, %v5595_v24  ;;  %vm9721_vm3 = vmmov %vm9720_vm4 }
  0x70   :  { %1106 = vmatpush.msrb.mxu3 %v1105_v33  ;;  %v1117_v33 = vand.u32 4294901760, %v1116_v30  ;;  %v9428_v0 = vand.u32 4294901760, %v5611_v39  ;;  %vm9723_vm15 = vmmov %vm9721_vm3 }
  0x71   :  { %v1122_v59 = vsub.f32 %v5595_v24, %v9423_v63  ;;  %vm9724_vm14 = vmmov %vm9721_vm3 }
  0x72   :  { %1112 = vmatpush.msrb.mxu3 %v1111_v62  ;;  %v1128_v25 = vsub.f32 %v5611_v39, %v9428_v0  ;;  %vm9725_vm10 = vmmov %vm9721_vm3 }
  0x73   :  { %v1123_v16 = vand.u32 4294901760, %v1122_v59  ;;  %vm9726_vm9 = vmmov %vm9721_vm3 }
  0x74   :  { %1118 = vmatpush.msrb.mxu3 %v1117_v33  ;;  %v1129_v55 = vand.u32 4294901760, %v1128_v25 }
  0x76   :  { %1124 = vmatpush.msrb.mxu3 %v1123_v16 }
  0x78   :  { %1130 = vmatpush.msrb.mxu3 %v1129_v55 }
  0x80   :  { %v71_v51 = vpop.xlane.xlu1 %70 }
  0x81   :  { %v58_v49 = vpop.xlane.xlu0 %57  ;;  %v75_v62 = vsub.f32 %v4807_v4, %v71_v51 }
  0x82   :  { %v62_v30 = vsub.f32 %v4812_v5, %v58_v49  ;;  %v83_v36 = vpop.xlane.xlu2 %82 }
  0x83   :  { %v87_v63 = vsub.f32 %v4814_v6, %v83_v36  ;;  %v77_v26 = vmul.f32 1.442695, %v75_v62 }
  0x84   :  { %v64_v22 = vmul.f32 1.442695, %v62_v30 }
  0x85   :  { %v89_v33 = vmul.f32 1.442695, %v87_v63  ;;  %4680 = vpow2.f32 %v77_v26 }
  0x86   :  { %4682 = vpow2.f32 %v64_v22 }
  0x87   :  { %4684 = vpow2.f32 %v89_v33  ;;  %v9733_v33 = vand.u32 4294901760, %v5201_v27 }
  0x89   :  { %v74_v59 = vpop.xlane.xlu1 %73 }
  0x8a   :  { %v61_v0 = vpop.xlane.xlu0 %60  ;;  %v76_v25 = vsub.f32 %v4831_v13, %v74_v59 }
  0x8b   :  { %v63_v55 = vsub.f32 %v4836_v14, %v61_v0  ;;  %v4681_v16 = vpop.eup %4680 }
  0x8c   :  { %v79_v21 = vmul.f32 1.442695, %v76_v25  ;;  %v4683_v51 = vpop.eup %4682  ;;  %119 = vst.msk [vmem:[#allocation2 + $0x8] sm:$0xff] %vm9720_vm4, %v4681_v16  ;;  %v99_v5 = vsel %vm9721_vm3, %v4681_v16, 0.0  ;;  %vm9727_vm4 = vmmov %vm9722_vm2  ;;  %v9734_v25 = vand.u32 4294901760, %v5212_v28 }
  0x8d   :  { %v66_v4 = vmul.f32 1.442695, %v63_v55  ;;  %v4685_v6 = vpop.eup %4684  ;;  %117 = vst.msk [vmem:[#allocation2] sm:$0xff] %vm9722_vm2, %v4683_v51  ;;  %100 = vadd.xlane.f32.xlu0 %v99_v5 }
  0x8e   :  { %4686 = vpow2.f32 %v79_v21  ;;  %121 = vst.msk [vmem:[#allocation2 + $0x10] sm:$0xff] %vm9723_vm15, %v4685_v6  ;;  %v105_v13 = vsel %vm9724_vm14, %v4685_v6, 0.0 }
  0x8f   :  { %4688 = vpow2.f32 %v66_v4  ;;  %106 = vadd.xlane.f32.xlu2 %v105_v13 }
  0x93   :  { %v609_v63 = vld [vmem:[#allocation2 + $0x8] sm:$0xff] }
  0x94   :  { %v4687_v14 = vpop.eup %4686  ;;  %v608_v36 = vld [vmem:[#allocation2] sm:$0xff]  ;;  %v5644_v62 = vand.u32 4294901760, %v609_v63 }
  0x95   :  { %v4689_v22 = vpop.eup %4688  ;;  %120 = vst.msk [vmem:[#allocation2 + $0x20] sm:$0xff] %vm9725_vm10, %v4687_v14  ;;  %v102_v26 = vsel %vm9726_vm9, %v4687_v14, 0.0  ;;  %v5633_v0 = vand.u32 4294901760, %v608_v36  ;;  %vm9730_vm10 = vcmp.eq.s32.totalorder %v5147_v43, %v4849_v19  ;;  %vm9735_vm9 = vmmov %vm9722_vm2 }
  0x96   :  { %118 = vst.msk [vmem:[#allocation2 + $0x18] sm:$0xff] %vm9727_vm4, %v4689_v22  ;;  %103 = vadd.xlane.f32.xlu1 %v102_v26  ;;  %v96_v21 = vsel %vm9722_vm2, %v4689_v22, 0.0  ;;  %v93_v55 = vsel %vm9735_vm9, %v4683_v51, 0.0  ;;  %v5667_v4 = vsub.f32 %v609_v63, %v5644_v62  ;;  %vm9737_vm14 = vmmov %vm9730_vm10  ;;  %v9740_v51 = vand.u32 4294901760, %v5227_v52 }
  0x97   :  { %9728 = vst [vmem:[#allocation41_spill] sm:$0xff] %v5633_v0  ;;  %760 = vmatmul.f32.vlgmr.msra.gmra.mxu1 %v5633_v0  ;;  %97 = vadd.xlane.f32.xlu2 %v96_v21  ;;  %v5638_v49 = vsub.f32 %v608_v36, %v5633_v0  ;;  %v9743_v26 = vand.u32 4294901760, %v5391_v60  ;;  %v5720_v63 = vadd.s32 376, %v4797_v2  ;;  %vm9772_vm4 = vcmp.eq.s32.totalorder %v5540_v53, %v4849_v19 }
  0x98   :  { %4274 = vmatpush.msk.msra.mxu1 %vm9730_vm10, %v9719_v47  ;;  %9731 = vst [vmem:[#allocation43_spill] sm:$0xff] %v5644_v62  ;;  %v5694_v22 = vand.u32 4294901760, %v5667_v4  ;;  %vm9777_vm9 = vcmp.eq.s32.totalorder %v5562_v38, %v4849_v19 }
  0x99   :  { %9729 = vst [vmem:[#allocation42_spill] sm:$0xff] %v5638_v49  ;;  %818 = vmatmul.f32.vlgmr.msra.gmra.mxu2 %v5638_v49  ;;  %v5648_v30 = vand.u32 4294901760, %v5638_v49 }
  0x9a   :  { %4275 = vmatpush.msk.msra.mxu1 %vm266_vm12, %v9719_v47  ;;  %1247 = vmatpush.msra.mxu2 %v9733_v33  ;;  %9736 = vst [vmem:[#allocation45_spill] sm:$0xff] %v5667_v4  ;;  %v9747_v33 = vand.u32 4294901760, %v5407_v29 }
  0x9b   :  { %9732 = vst [vmem:[#allocation44_spill] sm:$0xff] %v5648_v30  ;;  %862 = vmatmul.f32.vlgmr.msra.gmra.mxu3 %v5648_v30  ;;  %v649_v59 = vsub.f32 %v5638_v49, %v5648_v30 }
  0x9c   :  { %4276 = vmatpush.msk.msra.mxu1 %vm263_vm13, %v9719_v47  ;;  %1251 = vmatpush.msra.mxu2 %v9734_v25  ;;  %v612_v14 = vld [vmem:[#allocation2 + $0x20] sm:$0xff]  ;;  %9742 = vst [vmem:[#allocation49_spill] sm:$0xff] %v5694_v22  ;;  %v9749_v25 = vand.u32 4294901760, %v5426_v42 }
  0x9d   :  { %v611_v16 = vld [vmem:[#allocation2 + $0x18] sm:$0xff]  ;;  %4290 = vmatpush.msk.msra.mxu3 %vm9737_vm14, %v9719_v47  ;;  %v5673_v5 = vand.u32 4294901760, %v649_v59  ;;  %9746 = vst [vmem:[#allocation52_spill] sm:$0xff] %v5720_v63 }
  0x9e   :  { %94 = vadd.xlane.f32.xlu1 %v93_v55  ;;  %v5675_v6 = vand.u32 4294901760, %v611_v16  ;;  %4277 = vmatpush.msk.msra.mxu1 %vm260_vm11, %v9719_v47 }
  0x9f   :  { %9738 = vst [vmem:[#allocation46_spill] sm:$0xff] %v5673_v5  ;;  %1255 = vmatpush.msra.mxu2 %v9740_v51  ;;  %4291 = vmatpush.msk.msra.mxu3 %vm266_vm12, %v9719_v47 }
  0xa0   :  { %9739 = vst [vmem:[#allocation47_spill] sm:$0xff] %v5675_v6  ;;  %651 = vmatmul.f32.vlgmr.msra.gmra.mxu0 %v5673_v5  ;;  %v5689_v13 = vsub.f32 %v611_v16, %v5675_v6  ;;  %764 = vmatmul.f32.gmra.mxu1 %v5675_v6  ;;  %v5744_v16 = vadd.s32 368, %v4797_v2 }
  0xa1   :  { %1142 = vmatpush.msra.mxu0 %v5201_v27  ;;  %4278 = vmatpush.msk.msra.mxu1 %vm257_vm5, %v9719_v47  ;;  %v5710_v27 = vand.u32 4294901760, %v612_v14 }
  0xa2   :  { %9741 = vst [vmem:[#allocation48_spill] sm:$0xff] %v5689_v13  ;;  %1259 = vmatpush.msra.mxu2 %v9743_v26  ;;  %v5703_v36 = vand.u32 4294901760, %v5689_v13  ;;  %4292 = vmatpush.msk.msra.mxu3 %vm263_vm13, %v9719_v47  ;;  %vm314_vm12 = vcmp.eq.s32.totalorder %v5744_v16, %v4849_v19 }
  0xa3   :  { %823 = vmatmul.f32.gmra.mxu2 %v5689_v13  ;;  %9745 = vst [vmem:[#allocation51_spill] sm:$0xff] %v5710_v27  ;;  %1145 = vmatpush.msra.mxu0 %v5212_v28  ;;  %v1021_v28 = vsub.f32 %v5667_v4, %v5694_v22  ;;  %v5741_v55 = vsub.f32 %v612_v14, %v5710_v27 }
  0xa4   :  { %9744 = vst [vmem:[#allocation50_spill] sm:$0xff] %v5703_v36  ;;  %4279 = vmatpush.msk.msra.mxu1 %vm254_vm0, %v9719_v47  ;;  %v657_v21 = vsub.f32 %v5689_v13, %v5703_v36  ;;  %1263 = vmatpush.msra.mxu2 %v9747_v33  ;;  %v86_v13 = vpop.xlane.xlu2 %85 }
  0xa5   :  { %4293 = vmatpush.msk.msra.mxu3 %vm260_vm11, %v9719_v47  ;;  %1148 = vmatpush.msra.mxu0 %v5227_v52  ;;  %9750 = vst [vmem:[#allocation54_spill] sm:$0xff] %v5741_v55  ;;  %vm317_vm11 = vcmp.eq.s32.totalorder %v5720_v63, %v4849_v19  ;;  %v9752_v52 = vand.u32 4294901760, %v5443_v46  ;;  %v5759_v51 = vand.u32 4294901760, %v1021_v28  ;;  %v5772_v14 = vand.u32 4294901760, %v5741_v55  ;;  %v9822_v63 = vld [vmem:[#allocation19_spill] sm:$0xff] }
  0xa6   :  { %868 = vmatmul.f32.gmra.mxu3 %v5703_v36  ;;  %v5732_v59 = vand.u32 4294901760, %v657_v21  ;;  %4280 = vmatpush.msk.msra.mxu1 %vm251_vm1, %v9719_v47  ;;  %9751 = vst [vmem:[#allocation55_spill] sm:$0xff] %v5744_v16  ;;  %v4207_v26 = vsel %vm317_vm11, 1.0, %v9707_v57  ;;  %v9756_v21 = vand.u32 4294901760, %v5464_v34  ;;  %v4204_v28 = vsel %vm314_vm12, 1.0, %v9707_v57 }
  0xa7   :  { %1267 = vmatpush.msra.mxu2 %v9749_v25  ;;  %4294 = vmatpush.msk.msra.mxu3 %vm257_vm5, %v9719_v47  ;;  %9753 = vst [vmem:[#allocation56_spill] sm:$0xff] %v5759_v51  ;;  %v5799_v33 = vsub.f32 %v4207_v26, %v4207_v26  ;;  %v5808_v25 = vadd.s32 344, %v4797_v2  ;;  %v5823_v26 = vadd.s32 336, %v4797_v2 }
  0xa8   :  { %9748 = vst [vmem:[#allocation53_spill] sm:$0xff] %v5732_v59  ;;  %1151 = vmatpush.msra.mxu0 %v5391_v60  ;;  %4281 = vmatpush.msk.msra.mxu1 %vm248_vm6, %v9719_v47  ;;  %v5767_v60 = vadd.s32 360, %v4797_v2 }
  0xa9   :  { %1271 = vmatpush.msra.mxu2 %v9752_v52  ;;  %4295 = vmatpush.msk.msra.mxu3 %vm254_vm0, %v9719_v47  ;;  %9755 = vst [vmem:[#allocation58_spill] sm:$0xff] %v5772_v14  ;;  %v1029_v52 = vsub.f32 %v5741_v55, %v5772_v14  ;;  %vm9761_vm0 = vcmp.eq.s32.totalorder %v5481_v40, %v4849_v19 }
  0xaa   :  { %659 = vmatmul.f32.gmra.mxu0 %v5732_v59  ;;  %9754 = vst [vmem:[#allocation57_spill] sm:$0xff] %v5767_v60  ;;  %978 = vmatmul.f32.vlgmr.msrb.gmra.mxu1 %v5633_v0  ;;  %vm311_vm13 = vcmp.eq.s32.totalorder %v5767_v60, %v4849_v19  ;;  %vm9771_vm15 = vmmov %vm9761_vm0 }
  0xab   :  { %1154 = vmatpush.msra.mxu0 %v5407_v29  ;;  %4282 = vmatpush.msk.msra.mxu1 %vm245_vm7, %v9719_v47  ;;  %v5787_v29 = vadd.s32 352, %v4797_v2  ;;  %9758 = vst [vmem:[#allocation60_spill] sm:$0xff] %v5808_v25 }
  0xac   :  { %1275 = vmatpush.msra.mxu2 %v9756_v21  ;;  %4296 = vmatpush.msk.msra.mxu3 %vm251_vm1, %v9719_v47  ;;  %9760 = vst [vmem:[#allocation61_spill] sm:$0xff] %v5823_v26  ;;  %v9762_v21 = vand.u32 4294901760, %v5505_v45  ;;  %vm9481_vm1 = vcmp.eq.s32.totalorder %v5808_v25, %v4849_v19 }
  0xad   :  { %9757 = vst [vmem:[#allocation59_spill] sm:$0xff] %v5787_v29  ;;  %1023 = vmatmul.f32.vlgmr.msrb.gmra.mxu2 %v5759_v51  ;;  %1157 = vmatpush.msra.mxu0 %v5426_v42  ;;  %v9759_v42 = vand.u32 4294901760, %v5486_v50  ;;  %vm9480_vm5 = vcmp.eq.s32.totalorder %v5787_v29, %v4849_v19  ;;  %v5858_v51 = vadd.s32 328, %v4797_v2 }
  0xae   :  { %4283 = vmatpush.msk.msra.mxu1 %vm242_vm8, %v9719_v47  ;;  %4297 = vmatpush.msk.msra.mxu3 %vm248_vm6, %v9719_v47  ;;  %vm9763_vm6 = vcmp.eq.s32.totalorder %v5499_v44, %v4849_v19 }
  0xaf   :  { %1279 = vmatpush.msra.mxu2 %v9759_v42  ;;  %1132 = vmatmul.f32.vlgmr.msrb.gmra.mxu3 %v5644_v62  ;;  %v5831_v42 = vsub.f32 %v4204_v28, %v4204_v28  ;;  %v9764_v28 = vand.u32 4294901760, %v5517_v23  ;;  %9766 = vst [vmem:[#allocation63_spill] sm:$0xff] %v5858_v51  ;;  %vm9490_vm3 = vcmp.eq.s32.totalorder %v5858_v51, %v4849_v19  ;;  %vm9775_vm2 = vmmov %vm9763_vm6 }
  0xb0   :  { %1160 = vmatpush.msra.mxu0 %v5443_v46  ;;  %4284 = vmatpush.msk.msra.mxu1 %vm9761_vm0, %v9719_v47  ;;  %v4201_v46 = vsel %vm311_vm13, 1.0, %v9707_v57 }
  0xb1   :  { %1283 = vmatpush.msra.mxu2 %v9762_v21  ;;  %4298 = vmatpush.msk.msra.mxu3 %vm245_vm7, %v9719_v47  ;;  %v5851_v21 = vand.u32 4294901760, %v1029_v52  ;;  %v5865_v36 = vsub.f32 %v4201_v46, %v4201_v46  ;;  %vm9493_vm7 = vcmp.eq.s32.totalorder %v5823_v26, %v4849_v19  ;;  %v88_v52 = vsub.f32 %v4838_v15, %v86_v13 }
  0xb2   :  { %1163 = vmatpush.msra.mxu0 %v5464_v34  ;;  %4285 = vmatpush.msk.msra.mxu1 %vm9763_vm6, %v9719_v47  ;;  %v4198_v34 = vsel %vm9480_vm5, 1.0, %v9707_v57  ;;  %v5880_v46 = vadd.s32 320, %v4797_v2  ;;  %v9769_v15 = vand.u32 4294901760, %v5537_v11  ;;  %vm9782_vm6 = vcmp.eq.s32.totalorder %v5585_v32, %v4849_v19 }
  0xb3   :  { %1287 = vmatpush.msra.mxu2 %v9764_v28  ;;  %9765 = vst [vmem:[#allocation62_spill] sm:$0xff] %v5851_v21  ;;  %4299 = vmatpush.msk.msra.mxu3 %vm242_vm8, %v9719_v47  ;;  %v5873_v28 = vld [vmem:[#allocation2 + $0x28] sm:$0xff]  ;;  %vm9768_vm8 = vcmp.eq.s32.totalorder %v5520_v1, %v4849_v19  ;;  %v5891_v57 = vsub.f32 %v4198_v34, %v4198_v34  ;;  %v91_v30 = vmul.f32 1.442695, %v88_v52 }
  0xb4   :  { %937 = vmatmul.f32.vlgmr.msrb.gmra.mxu0 %v5633_v0  ;;  %982 = vmatmul.f32.gmra.mxu1 %v5675_v6  ;;  %v4195_v49 = vsel %vm9481_vm1, 1.0, %v5873_v28  ;;  %9767 = vst [vmem:[#allocation64_spill] sm:$0xff] %v5880_v46  ;;  %v4192_v35 = vsel %vm9493_vm7, 1.0, %v5873_v28  ;;  %vm9495_vm10 = vcmp.eq.s32.totalorder %v5880_v46, %v4849_v19  ;;  %v4189_v34 = vsel %vm9490_vm3, 1.0, %v5873_v28  ;;  %vm9780_vm14 = vmmov %vm9768_vm8 }
  0xb5   :  { %1166 = vmatpush.msra.mxu0 %v5486_v50  ;;  %4286 = vmatpush.msk.msra.mxu1 %vm9768_vm8, %v9719_v47  ;;  %v9770_v50 = vand.u32 4294901760, %v5799_v33  ;;  %v5910_v52 = vsub.f32 %v4195_v49, %v4195_v49  ;;  %4690 = vpow2.f32 %v91_v30  ;;  %v5968_v30 = vadd.s32 296, %v4797_v2  ;;  %vm9785_vm8 = vmmov %vm9772_vm4 }
  0xb6   :  { %1291 = vmatpush.msra.mxu2 %v9769_v15  ;;  %4300 = vmatpush.msk.msra.mxu3 %vm9771_vm15, %v9719_v47  ;;  %v5913_v15 = vadd.s32 312, %v4797_v2  ;;  %v9786_v40 = vand.u32 4294901760, %v5891_v57  ;;  %vm9787_vm15 = vcmask 261120  }
  0xb7   :  { %v1410_v13 = vsub.f32 %v5799_v33, %v9770_v50  ;;  %1031 = vmatmul.f32.gmra.mxu2 %v5851_v21  ;;  %1169 = vmatpush.msra.mxu0 %v5505_v45  ;;  %v9774_v50 = vand.u32 4294901760, %v5559_v37  ;;  %v9776_v45 = vand.u32 4294901760, %v5831_v42  ;;  %9784 = vst [vmem:[#allocation67_spill] sm:$0xff] %v5968_v30 }
  0xb8   :  { %4287 = vmatpush.msk.msra.mxu1 %vm9772_vm4, %v9719_v47  ;;  %9773 = vst [vmem:[#allocation65_spill] sm:$0xff] %v5913_v15  ;;  %4301 = vmatpush.msk.msra.mxu3 %vm9775_vm2, %v9719_v47  ;;  %vm9494_vm0 = vcmp.eq.s32.totalorder %v5913_v15, %v4849_v19  ;;  %v1428_v56 = vsub.f32 %v5891_v57, %v9786_v40  ;;  %v5993_v40 = vadd.s32 288, %v4797_v2  ;;  %vm9791_vm2 = vmmov %vm9777_vm9 }
  0xb9   :  { %1295 = vmatpush.msra.mxu2 %v9774_v50  ;;  %v1416_v21 = vsub.f32 %v5831_v42, %v9776_v45  ;;  %1136 = vmatmul.f32.gmra.mxu3 %v5710_v27  ;;  %v1411_v49 = vand.u32 4294901760, %v1410_v13  ;;  %v5929_v50 = vsub.f32 %v4192_v35, %v4192_v35  ;;  %v9778_v45 = vand.u32 4294901760, %v5578_v41 }
  0xba   :  { %1172 = vmatpush.msra.mxu0 %v5517_v23  ;;  %4288 = vmatpush.msk.msra.mxu1 %vm9777_vm9, %v9719_v47  ;;  %v5942_v23 = vadd.s32 304, %v4797_v2  ;;  %v9781_v35 = vand.u32 4294901760, %v5865_v36  ;;  %9788 = vst [vmem:[#allocation68_spill] sm:$0xff] %v5993_v40  ;;  %vm9506_vm9 = vcmp.eq.s32.totalorder %v5968_v30, %v4849_v19 }
  0xbb   :  { %1299 = vmatpush.msra.mxu2 %v9778_v45  ;;  %4302 = vmatpush.msk.msra.mxu3 %vm9780_vm14, %v9719_v47  ;;  %v4186_v45 = vsel %vm9495_vm10, 1.0, %v5873_v28  ;;  %v1417_v1 = vand.u32 4294901760, %v1416_v21  ;;  %v5970_v44 = vpop.eup %4690  ;;  %vm9794_vm14 = vmmov %vm9782_vm6 }
  0xbc   :  { %9779 = vst [vmem:[#allocation66_spill] sm:$0xff] %v5942_v23  ;;  %1175 = vmatpush.msra.mxu0 %v5537_v11  ;;  %v1422_v13 = vsub.f32 %v5865_v36, %v9781_v35  ;;  %4289 = vmatpush.msk.msra.mxu1 %vm9782_vm6, %v9719_v47  ;;  %v9783_v11 = vand.u32 4294901760, %v5595_v24  ;;  %v5965_v35 = vsub.f32 %v4189_v34, %v4189_v34  ;;  %v4183_v34 = vsel %vm9494_vm0, 1.0, %v5873_v28 }
  0xbd   :  { %4303 = vmatpush.msk.msra.mxu3 %vm9785_vm8, %v9719_v47  ;;  %941 = vmatmul.f32.gmra.mxu0 %v5675_v6  ;;  %v5982_v21 = vsub.f32 %v4186_v45, %v4186_v45  ;;  %122 = vst.msk [vmem:[#allocation2 + $0x28] sm:$0xff] %vm9787_vm15, %v5970_v44  ;;  %vm290_vm4 = vcmp.eq.s32.totalorder %v5942_v23, %v4849_v19 }
  0xbe   :  { %1303 = vmatpush.msra.mxu2 %v9783_v11  ;;  %1412 = vmatpush.msrb.mxu1 %v1411_v49  ;;  %v9789_v49 = vand.u32 4294901760, %v5611_v39  ;;  %v1423_v45 = vand.u32 4294901760, %v1422_v13  ;;  %v9790_v11 = vand.u32 4294901760, %v5910_v52  ;;  %v9469_v53 = vand.u32 4294901760, %v5965_v35 }
  0xbf   :  { %1234 = vmatmul.f32.vlgmr.msra.gmra.mxu1 %v5694_v22  ;;  %1178 = vmatpush.msra.mxu0 %v5559_v37  ;;  %v6009_v37 = vadd.s32 280, %v4797_v2  ;;  %v1429_v13 = vand.u32 4294901760, %v1428_v56  ;;  %v6016_v38 = vsub.f32 %v4183_v34, %v4183_v34  ;;  %vm9505_vm6 = vcmp.eq.s32.totalorder %v5993_v40, %v4849_v19 }
  0xc0   :  { %1307 = vmatpush.msra.mxu2 %v9789_v49  ;;  %v1434_v22 = vsub.f32 %v5910_v52, %v9790_v11  ;;  %4304 = vmatpush.msk.msra.mxu3 %vm9791_vm2, %v9719_v47  ;;  %v9793_v11 = vand.u32 4294901760, %v5929_v50  ;;  %v1446_v56 = vsub.f32 %v5965_v35, %v9469_v53 }
  0xc1   :  { %1418 = vmatpush.msrb.mxu1 %v1417_v1  ;;  %9792 = vst [vmem:[#allocation69_spill] sm:$0xff] %v6009_v37  ;;  %1181 = vmatpush.msra.mxu0 %v5578_v41  ;;  %v4180_v1 = vsel %vm290_vm4, 1.0, %v5873_v28  ;;  %v6031_v41 = vadd.s32 272, %v4797_v2  ;;  %vm281_vm8 = vcmp.eq.s32.totalorder %v6009_v37, %v4849_v19 }
  0xc2   :  { %1514 = vmatpush.msrb.mxu2 %v5799_v33  ;;  %v1440_v49 = vsub.f32 %v5929_v50, %v9793_v11  ;;  %4305 = vmatpush.msk.msra.mxu3 %vm9794_vm14, %v9719_v47  ;;  %v1435_v34 = vand.u32 4294901760, %v1434_v22  ;;  %v4177_v11 = vsel %vm9506_vm9, 1.0, %v5873_v28  ;;  %v6051_v22 = vadd.s32 264, %v4797_v2 }
  0xc3   :  { %1309 = vmatmul.f32.vlgmr.msra.gmra.mxu2 %v5644_v62  ;;  %9795 = vst [vmem:[#allocation70_spill] sm:$0xff] %v6031_v41  ;;  %1424 = vmatpush.msrb.mxu1 %v1423_v45  ;;  %v6046_v45 = vsub.f32 %v4180_v1, %v4180_v1  ;;  %v9797_v1 = vand.u32 4294901760, %v5982_v21  ;;  %vm278_vm15 = vcmp.eq.s32.totalorder %v6031_v41, %v4849_v19  ;;  %v4171_v61 = vsel %vm281_vm8, 1.0, %v5873_v28 }
  0xc4   :  { %1517 = vmatpush.msrb.mxu2 %v5831_v42  ;;  %4322 = vmatpush.msk.msrb.mxu3 %vm317_vm11, %v9719_v47  ;;  %9796 = vst [vmem:[#allocation71_spill] sm:$0xff] %v6051_v22  ;;  %v1441_v32 = vand.u32 4294901760, %v1440_v49  ;;  %v6072_v49 = vadd.s32 256, %v4797_v2  ;;  %vm275_vm2 = vcmp.eq.s32.totalorder %v6051_v22, %v4849_v19  ;;  %v6106_v31 = vsub.f32 %v4171_v61, %v4171_v61 }
  0xc5   :  { %1184 = vmatpush.msra.mxu0 %v5595_v24  ;;  %1350 = vmatmul.f32.vlgmr.msra.gmra.mxu3 %v5644_v62  ;;  %v4174_v24 = vsel %vm9505_vm6, 1.0, %v5873_v28  ;;  %v1452_v53 = vsub.f32 %v5982_v21, %v9797_v1  ;;  %v9800_v61 = vand.u32 4294901760, %v6046_v45 }
  0xc6   :  { %1430 = vmatpush.msrb.mxu1 %v1429_v13  ;;  %1520 = vmatpush.msrb.mxu2 %v5865_v36  ;;  %v6067_v13 = vsub.f32 %v4177_v11, %v4177_v11  ;;  %9798 = vst [vmem:[#allocation72_spill] sm:$0xff] %v6072_v49  ;;  %v1447_v11 = vand.u32 4294901760, %v1446_v56  ;;  %v6085_v62 = vsub.f32 %v4174_v24, %v4174_v24  ;;  %v4168_v56 = vsel %vm278_vm15, 1.0, %v5873_v28 }
  0xc7   :  { %4323 = vmatpush.msk.msrb.mxu3 %vm314_vm12, %v9719_v47  ;;  %1187 = vmatpush.msra.mxu0 %v5611_v39  ;;  %v9799_v39 = vand.u32 4294901760, %v6016_v38  ;;  %v1453_v24 = vand.u32 4294901760, %v1452_v53  ;;  %vm272_vm14 = vcmp.eq.s32.totalorder %v6072_v49, %v4849_v19  ;;  %v1464_v53 = vsub.f32 %v6046_v45, %v9800_v61 }
  0xc8   :  { %1436 = vmatpush.msrb.mxu1 %v1435_v34  ;;  %1523 = vmatpush.msrb.mxu2 %v5891_v57  ;;  %v6127_v1 = vsub.f32 %v4168_v56, %v4168_v56  ;;  %v4162_v56 = vsel %vm272_vm14, 1.0, %v5873_v28 }
  0xc9   :  { %4306 = vmatpush.msk.msrb.mxu0 %vm317_vm11, %v9719_v47  ;;  %4324 = vmatpush.msk.msrb.mxu3 %vm311_vm13, %v9719_v47  ;;  %v1458_v34 = vsub.f32 %v6016_v38, %v9799_v39  ;;  %v6167_v39 = vsub.f32 %v4162_v56, %v4162_v56 }
  0xca   :  { %1190 = vmatmul.f32.vlgmr.msra.gmra.mxu0 %v5667_v4  ;;  %1442 = vmatpush.msrb.mxu1 %v1441_v32  ;;  %v4165_v32 = vsel %vm275_vm2, 1.0, %v5873_v28  ;;  %v4705_v4 = vld [vmem:[%s9376_s3] sm:$0x7] }
  0xcb   :  { %4307 = vmatpush.msk.msrb.mxu0 %vm314_vm12, %v9719_v47  ;;  %1526 = vmatpush.msrb.mxu2 %v5910_v52  ;;  %v6132_v10 = vperm.slane %v4705_v4, 1  ;;  %v9801_v4 = vand.u32 4294901760, %v6067_v13  ;;  %v6151_v54 = vsub.f32 %v4165_v32, %v4165_v32  ;;  %9804 = vst [vmem:[#allocation74_spill] sm:$0xff] %v6167_v39 }
  0xcc   :  { %4325 = vmatpush.msk.msrb.mxu3 %vm9480_vm5, %v9719_v47  ;;  %1448 = vmatpush.msrb.mxu1 %v1447_v11  ;;  %v1459_v11 = vand.u32 4294901760, %v1458_v34  ;;  %v1465_v34 = vand.u32 4294901760, %v1464_v53 }
  0xcd   :  { %4308 = vmatpush.msk.msrb.mxu0 %vm311_vm13, %v9719_v47  ;;  %1529 = vmatpush.msrb.mxu2 %v5929_v50  ;;  %v1470_v61 = vsub.f32 %v6067_v13, %v9801_v4  ;;  %9802 = vst [vmem:[#allocation73_spill] sm:$0xff] %v6151_v54 }
  0xce   :  { %4326 = vmatpush.msk.msrb.mxu3 %vm9481_vm1, %v9719_v47  ;;  %1454 = vmatpush.msrb.mxu1 %v1453_v24  ;;  %v9803_v24 = vand.u32 4294901760, %v6085_v62 }
  0xcf   :  { %4309 = vmatpush.msk.msrb.mxu0 %vm9480_vm5, %v9719_v47  ;;  %1532 = vmatpush.msrb.mxu2 %v5965_v35  ;;  %vm9540_vm5 = vcmp.eq.s32.totalorder %v4804_v3, %v6132_v10  ;;  %v1471_v53 = vand.u32 4294901760, %v1470_v61  ;;  %v9806_v61 = vand.u32 4294901760, %v6127_v1 }
  0xd0   :  { %4327 = vmatpush.msk.msrb.mxu3 %vm9493_vm7, %v9719_v47  ;;  %1313 = vmatmul.f32.gmra.mxu2 %v5710_v27  ;;  %v1476_v32 = vsub.f32 %v6085_v62, %v9803_v24  ;;  %v9805_v24 = vand.u32 4294901760, %v6106_v31 }
  0xd1   :  { %4310 = vmatpush.msk.msrb.mxu0 %vm9481_vm1, %v9719_v47  ;;  %1460 = vmatpush.msrb.mxu1 %v1459_v11  ;;  %vm9532_vm1 = vcmp.eq.s32.totalorder %v4817_v7, %v6132_v10 }
  0xd2   :  { %1535 = vmatpush.msrb.mxu2 %v5982_v21  ;;  %4328 = vmatpush.msk.msrb.mxu3 %vm9490_vm3, %v9719_v47  ;;  %v1482_v4 = vsub.f32 %v6106_v31, %v9805_v24  ;;  %v1477_v11 = vand.u32 4294901760, %v1476_v32  ;;  %v1488_v24 = vsub.f32 %v6127_v1, %v9806_v61  ;;  %v9807_v61 = vand.u32 4294901760, %v6151_v54 }
  0xd3   :  { %1195 = vmatmul.f32.gmra.mxu0 %v5741_v55  ;;  %1354 = vmatmul.f32.gmra.mxu3 %v5710_v27  ;;  %v4112_v55 = vsel %vm9540_vm5, 1.0, %v5873_v28  ;;  %v610_v27 = vld [vmem:[#allocation2 + $0x10] sm:$0xff] }
  0xd4   :  { %4311 = vmatpush.msk.msrb.mxu0 %vm9493_vm7, %v9719_v47  ;;  %1466 = vmatpush.msrb.mxu1 %v1465_v34  ;;  %v4109_v34 = vsel %vm9532_vm1, 1.0, %v5873_v28  ;;  %v1483_v32 = vand.u32 4294901760, %v1482_v4  ;;  %v1494_v56 = vsub.f32 %v6151_v54, %v9807_v61  ;;  %v6220_v58 = vand.u32 4294901760, %v610_v27 }
  0xd5   :  { %1538 = vmatpush.msrb.mxu2 %v6016_v38  ;;  %4329 = vmatpush.msk.msrb.mxu3 %vm9495_vm10, %v9719_v47  ;;  %v1489_v4 = vand.u32 4294901760, %v1488_v24  ;;  %v6231_v12 = vsub.f32 %v4109_v34, %v4109_v34  ;;  %vm9537_vm7 = vcmp.eq.s32.totalorder %v4823_v9, %v6132_v10 }
  0xd6   :  { %1240 = vmatmul.f32.gmra.mxu1 %v5772_v14  ;;  %4312 = vmatpush.msk.msrb.mxu0 %vm9490_vm3, %v9719_v47  ;;  %v6218_v14 = vsub.f32 %v4112_v55, %v4112_v55  ;;  %9808 = vst [vmem:[#allocation75_spill] sm:$0xff] %v6220_v58  ;;  %vm9525_vm3 = vcmp.eq.s32.totalorder %v4820_v8, %v6132_v10  ;;  %v1495_v55 = vand.u32 4294901760, %v1494_v56  ;;  %v9832_v8 = vld [vmem:[#allocation21_spill] sm:$0xff] }
  0xd7   :  { %1472 = vmatpush.msrb.mxu1 %v1471_v53  ;;  %1541 = vmatpush.msrb.mxu2 %v6046_v45  ;;  %v9809_v53 = vand.u32 4294901760, %v6167_v39  ;;  %9810 = vst [vmem:[#allocation76_spill] sm:$0xff] %v6231_v12  ;;  %v6255_v34 = vsub.f32 %v610_v27, %v6220_v58  ;;  %v9815_v6 = vand.u32 4294901760, %v6231_v12 }
  0xd8   :  { %4330 = vmatpush.msk.msrb.mxu3 %vm9494_vm0, %v9719_v47  ;;  %4313 = vmatpush.msk.msrb.mxu0 %vm9495_vm10, %v9719_v47  ;;  %v9500_v24 = vand.u32 4294901760, %v6218_v14  ;;  %vm9543_vm10 = vcmp.eq.s32.totalorder %v4847_v18, %v6132_v10 }
  0xd9   :  { %1478 = vmatpush.msrb.mxu1 %v1477_v11  ;;  %v1500_v61 = vsub.f32 %v6167_v39, %v9809_v53  ;;  %1544 = vmatpush.msrb.mxu2 %v6067_v13  ;;  %v4106_v11 = vsel %vm9525_vm3, 1.0, %v5873_v28  ;;  %9811 = vst [vmem:[#allocation77_spill] sm:$0xff] %v6255_v34  ;;  %v4103_v53 = vsel %vm9537_vm7, 1.0, %v5873_v28  ;;  %v4097_v48 = vsel %vm9543_vm10, 1.0, %v5873_v28 }
  0xda   :  { %4331 = vmatpush.msk.msrb.mxu3 %vm290_vm4, %v9719_v47  ;;  %4314 = vmatpush.msk.msrb.mxu0 %vm9494_vm0, %v9719_v47  ;;  %vm210_vm0 = vcmp.eq.s32.totalorder %v4844_v17, %v6132_v10  ;;  %v6275_v27 = vsub.f32 %v4106_v11, %v4106_v11  ;;  %v1782_v11 = vsub.f32 %v6218_v14, %v9500_v24 }
  0xdb   :  { %1484 = vmatpush.msrb.mxu1 %v1483_v32  ;;  %1547 = vmatpush.msrb.mxu2 %v6085_v62  ;;  %v1501_v56 = vand.u32 4294901760, %v1500_v61  ;;  %v4100_v61 = vsel %vm210_vm0, 1.0, %v5873_v28  ;;  %v6294_v32 = vand.u32 4294901760, %v6255_v34  ;;  %v1788_v24 = vsub.f32 %v6231_v12, %v9815_v6 }
  0xdc   :  { %4332 = vmatpush.msk.msrb.mxu3 %vm9506_vm9, %v9719_v47  ;;  %4315 = vmatpush.msk.msrb.mxu0 %vm290_vm4, %v9719_v47  ;;  %9812 = vst [vmem:[#allocation78_spill] sm:$0xff] %v6275_v27  ;;  %v6317_v59 = vsub.f32 %v4100_v61, %v4100_v61  ;;  %v6329_v6 = vsub.f32 %v4097_v48, %v4097_v48  ;;  %v1783_v61 = vand.u32 4294901760, %v1782_v11 }
  0xdd   :  { %1490 = vmatpush.msrb.mxu1 %v1489_v4  ;;  %1550 = vmatpush.msrb.mxu2 %v6106_v31  ;;  %v613_v4 = vld [vmem:[#allocation2 + $0x28] sm:$0xff]  ;;  %9813 = vst [vmem:[#allocation79_spill] sm:$0xff] %v6294_v32  ;;  %v1789_v48 = vand.u32 4294901760, %v1788_v24  ;;  %v9820_v24 = vand.u32 4294901760, %v6275_v27 }
  0xde   :  { %4333 = vmatpush.msk.msrb.mxu3 %vm9505_vm6, %v9719_v47  ;;  %4316 = vmatpush.msk.msrb.mxu0 %vm9506_vm9, %v9719_v47  ;;  %v6309_v43 = vand.u32 4294901760, %v613_v4  ;;  %9817 = vst [vmem:[#allocation82_spill] sm:$0xff] %v6317_v59 }
  0xdf   :  { %1496 = vmatpush.msrb.mxu1 %v1495_v55  ;;  %1553 = vmatpush.msrb.mxu2 %v6127_v1  ;;  %v6296_v55 = vsub.f32 %v4103_v53, %v4103_v53  ;;  %v1393_v53 = vsub.f32 %v6255_v34, %v6294_v32 }
  0xe0   :  { %4334 = vmatpush.msk.msrb.mxu3 %vm281_vm8, %v9719_v47  ;;  %4317 = vmatpush.msk.msrb.mxu0 %vm9505_vm6, %v9719_v47  ;;  %9816 = vst [vmem:[#allocation81_spill] sm:$0xff] %v6309_v43  ;;  %vm9552_vm6 = vcmp.eq.s32.totalorder %v4852_v20, %v6132_v10 }
  0xe1   :  { %9814 = vst [vmem:[#allocation80_spill] sm:$0xff] %v6296_v55  ;;  %1502 = vmatpush.msrb.mxu1 %v1501_v56  ;;  %1556 = vmatpush.msrb.mxu2 %v6151_v54  ;;  %v9818_v56 = vld [vmem:[#allocation17_spill] sm:$0xff]  ;;  %v4094_v11 = vsel %vm9552_vm6, 1.0, %v5873_v28  ;;  %v9821_v54 = vld [vmem:[#allocation18_spill] sm:$0xff]  ;;  %v9824_v60 = vand.u32 4294901760, %v6296_v55 }
  0xe2   :  { %4335 = vmatpush.msk.msrb.mxu3 %vm278_vm15, %v9719_v47  ;;  %4318 = vmatpush.msk.msrb.mxu0 %vm281_vm8, %v9719_v47  ;;  %vm201_vm9 = vcmp.eq.s32.totalorder %v9818_v56, %v6132_v10  ;;  %v6394_v0 = vsub.f32 %v4094_v11, %v4094_v11  ;;  %v9828_v11 = vand.u32 4294901760, %v6317_v59 }
  0xe3   :  { %4338 = vmatpush.msk.msra.mxu1 %vm317_vm11, %v9719_v47  ;;  %1559 = vmatpush.msrb.mxu2 %v6167_v39  ;;  %v6350_v39 = vsub.f32 %v613_v4, %v6309_v43  ;;  %v1794_v4 = vsub.f32 %v6275_v27, %v9820_v24  ;;  %v4091_v16 = vsel %vm201_vm9, 1.0, %v5873_v28  ;;  %vm198_vm11 = vcmp.eq.s32.totalorder %v9821_v54, %v6132_v10 }
  0xe4   :  { %4336 = vmatpush.msk.msrb.mxu3 %vm275_vm2, %v9719_v47  ;;  %4319 = vmatpush.msk.msrb.mxu0 %vm278_vm15, %v9719_v47  ;;  %v6389_v27 = vand.u32 4294901760, %v1393_v53  ;;  %v1800_v12 = vsub.f32 %v6296_v55, %v9824_v60  ;;  %v6404_v24 = vsub.f32 %v4091_v16, %v4091_v16  ;;  %v4088_v53 = vsel %vm198_vm11, 1.0, %v5873_v28 }
  0xe5   :  { %4339 = vmatpush.msk.msra.mxu1 %vm314_vm12, %v9719_v47  ;;  %4354 = vmatpush.msk.msra.mxu2 %vm9540_vm5, %v9719_v47  ;;  %9819 = vst [vmem:[#allocation83_spill] sm:$0xff] %v6350_v39  ;;  %vm195_vm12 = vcmp.eq.s32.totalorder %v9822_v63, %v6132_v10  ;;  %v1795_v60 = vand.u32 4294901760, %v1794_v4  ;;  %v6437_v55 = vsub.f32 %v4088_v53, %v4088_v53  ;;  %v9912_v63 = vld [vmem:[#allocation35_spill] sm:$0xff] }
  0xe6   :  { %4337 = vmatpush.msk.msrb.mxu3 %vm272_vm14, %v9719_v47  ;;  %4320 = vmatpush.msk.msrb.mxu0 %vm275_vm2, %v9719_v47  ;;  %9823 = vst [vmem:[#allocation84_spill] sm:$0xff] %v6389_v27  ;;  %v4085_v16 = vsel %vm195_vm12, 1.0, %v5873_v28  ;;  %vm9840_vm5 = vcmp.eq.s32.totalorder %v5858_v51, %v4849_v19 }
  0xe7   :  { %4340 = vmatpush.msk.msra.mxu1 %vm311_vm13, %v9719_v47  ;;  %4355 = vmatpush.msk.msra.mxu2 %vm9532_vm1, %v9719_v47  ;;  %vm9825_vm13 = vcmp.eq.s32.totalorder %v5787_v29, %v4849_v19  ;;  %9827 = vst [vmem:[#allocation86_spill] sm:$0xff] %v6404_v24  ;;  %v9829_v29 = vld [vmem:[#allocation20_spill] sm:$0xff]  ;;  %vm189_vm1 = vcmp.eq.s32.totalorder %v9832_v8, %v6132_v10  ;;  %v9907_v8 = vld [vmem:[#allocation33_spill] sm:$0xff] }
  0xe8   :  { %1784 = vmatpush.msra.mxu3 %v1783_v61  ;;  %1562 = vmatmul.f32.vlgmr.msrb.gmra.mxu2 %v6255_v34  ;;  %v6402_v61 = vand.u32 4294901760, %v6350_v39  ;;  %v1806_v34 = vsub.f32 %v6317_v59, %v9828_v11  ;;  %v1801_v11 = vand.u32 4294901760, %v1800_v12  ;;  %v9835_v59 = vand.u32 4294901760, %v5831_v42 }
  0xe9   :  { %4341 = vmatpush.msk.msra.mxu1 %vm9825_vm13, %v9719_v47  ;;  %4356 = vmatpush.msk.msra.mxu2 %vm9525_vm3, %v9719_v47  ;;  %vm192_vm13 = vcmp.eq.s32.totalorder %v9829_v29, %v6132_v10  ;;  %vm9831_vm3 = vcmp.eq.s32.totalorder %v5808_v25, %v4849_v19  ;;  %v9837_v42 = vand.u32 4294901760, %v6394_v0  ;;  %v9842_v25 = vand.u32 4294901760, %v6404_v24  ;;  %v9909_v29 = vld [vmem:[#allocation34_spill] sm:$0xff] }
  0xea   :  { %9826 = vst [vmem:[#allocation85_spill] sm:$0xff] %v6402_v61  ;;  %1790 = vmatpush.msra.mxu3 %v1789_v48  ;;  %4321 = vmatpush.msk.msrb.mxu0 %vm272_vm14, %v9719_v47  ;;  %v9830_v48 = vand.u32 4294901760, %v6329_v6  ;;  %v4082_v53 = vsel %vm192_vm13, 1.0, %v5873_v28 }
  0xeb   :  { %1606 = vmatmul.f32.vlgmr.msrb.gmra.mxu3 %v6294_v32  ;;  %1395 = vmatmul.f32.vlgmr.msrb.gmra.mxu0 %v6389_v27  ;;  %v9833_v32 = vand.u32 4294901760, %v5799_v33  ;;  %v6450_v27 = vsub.f32 %v4085_v16, %v4085_v16  ;;  %v1807_v33 = vand.u32 4294901760, %v1806_v34  ;;  %v6477_v12 = vsub.f32 %v4082_v53, %v4082_v53 }
  0xec   :  { %v1812_v4 = vsub.f32 %v6329_v6, %v9830_v48  ;;  %4342 = vmatpush.msk.msra.mxu1 %vm9831_vm3, %v9719_v47  ;;  %4357 = vmatpush.msk.msra.mxu2 %vm9537_vm7, %v9719_v47  ;;  %v1401_v48 = vsub.f32 %v6350_v39, %v6402_v61  ;;  %vm9836_vm7 = vcmp.eq.s32.totalorder %v5823_v26, %v4849_v19  ;;  %v9839_v26 = vand.u32 4294901760, %v5865_v36 }
  0xed   :  { %1619 = vmatpush.msra.mxu0 %v9833_v32  ;;  %1796 = vmatpush.msra.mxu3 %v1795_v60  ;;  %v9834_v32 = vld [vmem:[#allocation22_spill] sm:$0xff]  ;;  %v4079_v60 = vsel %vm189_vm1, 1.0, %v5873_v28 }
  0xee   :  { %1504 = vmatmul.f32.vlgmr.msrb.gmra.mxu1 %v6220_v58  ;;  %vm186_vm3 = vcmp.eq.s32.totalorder %v9834_v32, %v6132_v10  ;;  %v1813_v16 = vand.u32 4294901760, %v1812_v4  ;;  %4358 = vmatpush.msk.msra.mxu2 %vm210_vm0, %v9719_v47  ;;  %v9838_v4 = vld [vmem:[#allocation23_spill] sm:$0xff]  ;;  %v6501_v36 = vsub.f32 %v4079_v60, %v4079_v60 }
  0xef   :  { %1623 = vmatpush.msra.mxu0 %v9835_v59  ;;  %4343 = vmatpush.msk.msra.mxu1 %vm9836_vm7, %v9719_v47  ;;  %v1818_v59 = vsub.f32 %v6394_v0, %v9837_v42  ;;  %vm183_vm7 = vcmp.eq.s32.totalorder %v9838_v4, %v6132_v10  ;;  %v1824_v42 = vsub.f32 %v6404_v24, %v9842_v25  ;;  %v4076_v34 = vsel %vm186_vm3, 1.0, %v5873_v28 }
  0xf0   :  { %1802 = vmatpush.msra.mxu3 %v1801_v11  ;;  %v6487_v11 = vand.u32 4294901760, %v1401_v48  ;;  %4359 = vmatpush.msk.msra.mxu2 %vm9543_vm10, %v9719_v47  ;;  %v4073_v25 = vsel %vm183_vm7, 1.0, %v5873_v28  ;;  %v9844_v48 = vld [vmem:[#allocation24_spill] sm:$0xff]  ;;  %vm9845_vm10 = vcmp.eq.s32.totalorder %v5880_v46, %v4849_v19  ;;  %v6524_v53 = vsub.f32 %v4076_v34, %v4076_v34 }
  0xf1   :  { %1627 = vmatpush.msra.mxu0 %v9839_v26  ;;  %4344 = vmatpush.msk.msra.mxu1 %vm9840_vm5, %v9719_v47  ;;  %v9843_v26 = vand.u32 4294901760, %v5891_v57  ;;  %vm180_vm5 = vcmp.eq.s32.totalorder %v9844_v48, %v6132_v10  ;;  %v1819_v57 = vand.u32 4294901760, %v1818_v59  ;;  %v9847_v46 = vand.u32 4294901760, %v6450_v27 }
  0xf2   :  { %9841 = vst [vmem:[#allocation87_spill] sm:$0xff] %v6487_v11  ;;  %1808 = vmatpush.msra.mxu3 %v1807_v33  ;;  %1567 = vmatmul.f32.gmra.mxu2 %v6350_v39  ;;  %v9846_v33 = vand.u32 4294901760, %v6437_v55  ;;  %v1825_v39 = vand.u32 4294901760, %v1824_v42  ;;  %v9848_v59 = vand.u32 4294901760, %v5910_v52  ;;  %v1847_v24 = vand.u32 4294901760, %v6501_v36 }
  0xf3   :  { %1631 = vmatpush.msra.mxu0 %v9843_v26  ;;  %4345 = vmatpush.msk.msra.mxu1 %vm9845_vm10, %v9719_v47  ;;  %v1841_v26 = vand.u32 4294901760, %v6477_v12  ;;  %v1836_v51 = vsub.f32 %v6450_v27, %v9847_v46  ;;  %vm177_vm10 = vcmp.eq.s32.totalorder %v4797_v2, %v6132_v10  ;;  %v1853_v34 = vand.u32 4294901760, %v6524_v53 }
  0xf4   :  { %4360 = vmatpush.msk.msra.mxu2 %vm9552_vm6, %v9719_v47  ;;  %v1830_v60 = vsub.f32 %v6437_v55, %v9846_v33  ;;  %1814 = vmatpush.msra.mxu3 %v1813_v16  ;;  %v6534_v33 = vsub.f32 %v4073_v25, %v4073_v25  ;;  %v4070_v16 = vsel %vm180_vm5, 1.0, %v5873_v28  ;;  %vm9849_vm6 = vcmp.eq.s32.totalorder %v5913_v15, %v4849_v19 }
  0xf5   :  { %1403 = vmatmul.f32.gmra.mxu0 %v6487_v11  ;;  %1612 = vmatmul.f32.gmra.mxu3 %v6402_v61  ;;  %v1842_v52 = vsub.f32 %v6477_v12, %v1841_v26  ;;  %v9850_v42 = vand.u32 4294901760, %v5929_v50  ;;  %v6561_v25 = vsub.f32 %v4070_v16, %v4070_v16  ;;  %v1837_v50 = vand.u32 4294901760, %v1836_v51 }
  0xf6   :  { %1635 = vmatpush.msra.mxu0 %v9848_v59  ;;  %4346 = vmatpush.msk.msra.mxu1 %vm9849_vm6, %v9719_v47  ;;  %v1831_v46 = vand.u32 4294901760, %v1830_v60  ;;  %v1848_v60 = vsub.f32 %v6501_v36, %v1847_v24  ;;  %v9555_v59 = vand.u32 4294901760, %v6534_v33  ;;  %v9851_v16 = vand.u32 4294901760, %v5965_v35 }
  0xf7   :  { %4361 = vmatpush.msk.msra.mxu2 %vm201_vm9, %v9719_v47  ;;  %1820 = vmatpush.msra.mxu3 %v1819_v57  ;;  %v4067_v57 = vsel %vm177_vm10, 1.0, %v5873_v28  ;;  %v1843_v51 = vand.u32 4294901760, %v1842_v52  ;;  %v9853_v35 = vand.u32 4294901760, %v5982_v21  ;;  %vm9854_vm6 = vcmp.eq.s32.totalorder %v5993_v40, %v4849_v19 }
  0xf8   :  { %1508 = vmatmul.f32.gmra.mxu1 %v6309_v43  ;;  %1639 = vmatpush.msra.mxu0 %v9850_v42  ;;  %v6588_v42 = vsub.f32 %v4067_v57, %v4067_v57  ;;  %v1860_v52 = vsub.f32 %v6534_v33, %v9555_v59  ;;  %v9855_v21 = vand.u32 4294901760, %v6016_v38  ;;  %v9903_v59 = vld [vmem:[#allocation31_spill] sm:$0xff] }
  0xf9   :  { %4347 = vmatpush.msk.msra.mxu1 %vm290_vm4, %v9719_v47  ;;  %4362 = vmatpush.msk.msra.mxu2 %vm198_vm11, %v9719_v47  ;;  %vm9852_vm4 = vcmp.eq.s32.totalorder %v5968_v30, %v4849_v19 }
  0xfa   :  { %1826 = vmatpush.msra.mxu3 %v1825_v39  ;;  %1643 = vmatpush.msra.mxu0 %v9851_v16  ;;  %v1854_v39 = vsub.f32 %v6524_v53, %v1853_v34  ;;  %v9554_v16 = vand.u32 4294901760, %v6561_v25 }
  0xfb   :  { %4348 = vmatpush.msk.msra.mxu1 %vm9852_vm4, %v9719_v47  ;;  %4363 = vmatpush.msk.msra.mxu2 %vm195_vm12, %v9719_v47 }
  0xfc   :  { %1832 = vmatpush.msra.mxu3 %v1831_v46  ;;  %1647 = vmatpush.msra.mxu0 %v9853_v35  ;;  %v1849_v46 = vand.u32 4294901760, %v1848_v60  ;;  %v1855_v57 = vand.u32 4294901760, %v1854_v39  ;;  %v9856_v60 = vand.u32 4294901760, %v6046_v45  ;;  %v1866_v38 = vsub.f32 %v6561_v25, %v9554_v16 }
  0xfd   :  { %4349 = vmatpush.msk.msra.mxu1 %vm9854_vm6, %v9719_v47  ;;  %4364 = vmatpush.msk.msra.mxu2 %vm192_vm13, %v9719_v47  ;;  %v9857_v39 = vand.u32 4294901760, %v6067_v13  ;;  %v9859_v13 = vand.u32 4294901760, %v6085_v62  ;;  %v9863_v62 = vand.u32 4294901760, %v6218_v14  ;;  %vm9873_vm6 = vcmp.eq.s32.totalorder %v4823_v9, %v6132_v10 }
  0xfe   :  { %1838 = vmatpush.msra.mxu3 %v1837_v50  ;;  %1651 = vmatpush.msra.mxu0 %v9855_v21  ;;  %v9553_v50 = vand.u32 4294901760, %v6588_v42  ;;  %v9867_v21 = vld [vmem:[#allocation41_spill] sm:$0xff] }
  0xff   :  { %4350 = vmatpush.msk.msra.mxu1 %vm281_vm8, %v9719_v47  ;;  %4365 = vmatpush.msk.msra.mxu2 %vm189_vm1, %v9719_v47  ;;  %vm9858_vm8 = vcmask 261120  }
 0x100   :  { %1844 = vmatpush.msra.mxu3 %v1843_v51  ;;  %1655 = vmatpush.msra.mxu0 %v9856_v60  ;;  %v1861_v51 = vand.u32 4294901760, %v1860_v52  ;;  %v108_v45 = vsel %vm9858_vm8, %v5970_v44, 0.0  ;;  %v1872_v35 = vsub.f32 %v6588_v42, %v9553_v50  ;;  %v9861_v44 = vand.u32 4294901760, %v6106_v31  ;;  %v9865_v52 = vld [vmem:[#allocation12_spill] sm:$0xff] }
 0x101   :  { %4351 = vmatpush.msk.msra.mxu1 %vm278_vm15, %v9719_v47  ;;  %4366 = vmatpush.msk.msra.mxu2 %vm186_vm3, %v9719_v47  ;;  %vm9860_vm15 = vcmp.eq.s32.totalorder %v4804_v3, %v6132_v10  ;;  %v9864_v31 = vand.u32 4294901760, %v6127_v1  ;;  %v9874_v1 = vld [vmem:[#allocation78_spill] sm:$0xff] }
 0x102   :  { %1850 = vmatpush.msra.mxu3 %v1849_v46  ;;  %1659 = vmatpush.msra.mxu0 %v9857_v39  ;;  %v1867_v46 = vand.u32 4294901760, %v1866_v38  ;;  %v1873_v19 = vand.u32 4294901760, %v1872_v35  ;;  %vm9870_vm4 = vmmov %vm9860_vm15  ;;  %v9871_v38 = vld [vmem:[#allocation73_spill] sm:$0xff]  ;;  %v9875_v39 = vand.u32 4294901760, %v9874_v1 }
 0x103   :  { %4352 = vmatpush.msk.msra.mxu1 %vm275_vm2, %v9719_v47  ;;  %4367 = vmatpush.msk.msra.mxu2 %vm183_vm7, %v9719_v47  ;;  %vm9862_vm2 = vcmp.eq.s32.totalorder %v4817_v7, %v6132_v10 }
 0x104   :  { %1856 = vmatpush.msra.mxu3 %v1855_v57  ;;  %1663 = vmatpush.msra.mxu0 %v9859_v13  ;;  %v9868_v57 = vld [vmem:[#allocation76_spill] sm:$0xff]  ;;  %vm9876_vm8 = vmmov %vm9862_vm2 }
 0x105   :  { %4353 = vmatpush.msk.msra.mxu1 %vm272_vm14, %v9719_v47  ;;  %4368 = vmatpush.msk.msra.mxu2 %vm180_vm5, %v9719_v47  ;;  %vm9866_vm14 = vcmp.eq.s32.totalorder %v9865_v52, %v6132_v10  ;;  %v9869_v60 = vand.u32 4294901760, %v9868_v57  ;;  %v9879_v13 = vld [vmem:[#allocation80_spill] sm:$0xff] }
 0x106   :  { %1862 = vmatpush.msra.mxu3 %v1861_v51  ;;  %1722 = vmatmul.f32.vlgmr.msra.gmra.mxu1 %v6220_v58  ;;  %v9872_v51 = vand.u32 4294901760, %v9871_v38  ;;  %v9892_v38 = vand.u32 4294901760, %v6394_v0 }
 0x107   :  { %109 = vadd.xlane.f32.xlu0 %v108_v45  ;;  %4370 = vmatpush.msk.msrb.mxu1 %vm9860_vm15, %v9719_v47  ;;  %v9877_v45 = vld [vmem:[#allocation74_spill] sm:$0xff]  ;;  %vm9881_vm15 = vmmov %vm9866_vm14 }
 0x108   :  { %1667 = vmatpush.msra.mxu0 %v9861_v44  ;;  %4369 = vmatpush.msk.msra.mxu2 %vm177_vm10, %v9719_v47  ;;  %v9878_v35 = vand.u32 4294901760, %v9877_v45  ;;  %v9882_v44 = vld [vmem:[#allocation53_spill] sm:$0xff]  ;;  %v9895_v45 = vld [vmem:[#allocation86_spill] sm:$0xff] }
 0x109   :  { %1868 = vmatpush.msra.mxu3 %v1867_v46  ;;  %1767 = vmatmul.f32.vlgmr.msra.gmra.mxu2 %v5673_v5  ;;  %v9880_v46 = vand.u32 4294901760, %v9879_v13 }
 0x10a   :  { %4371 = vmatpush.msk.msrb.mxu1 %vm9862_vm2, %v9719_v47  ;;  %1991 = vmatpush.msrb.mxu2 %v9863_v62  ;;  %vm9883_vm2 = vcmp.eq.s32.totalorder %v4847_v18, %v6132_v10 }
 0x10b   :  { %1671 = vmatpush.msra.mxu0 %v9864_v31  ;;  %1874 = vmatpush.msra.mxu3 %v1873_v19  ;;  %v9884_v19 = vld [vmem:[#allocation82_spill] sm:$0xff]  ;;  %v9888_v31 = vld [vmem:[#allocation47_spill] sm:$0xff] }
 0x10c   :  { %4372 = vmatpush.msk.msrb.mxu1 %vm9866_vm14, %v9719_v47  ;;  %1876 = vmatmul.f32.vlgmr.msra.gmra.mxu3 %v9867_v21  ;;  %v9885_v62 = vand.u32 4294901760, %v9884_v19  ;;  %vm9886_vm14 = vmmov %vm9873_vm6 }
 0x10d   :  { %1995 = vmatpush.msrb.mxu2 %v9869_v60  ;;  %4386 = vmatpush.msk.msrb.mxu3 %vm9870_vm4, %v9719_v47  ;;  %v9891_v60 = vld [vmem:[#allocation26_spill] sm:$0xff] }
 0x10e   :  { %1675 = vmatpush.msra.mxu0 %v9872_v51  ;;  %4373 = vmatpush.msk.msrb.mxu1 %vm9873_vm6, %v9719_v47  ;;  %vm9889_vm6 = vcmp.eq.s32.totalorder %v4852_v20, %v6132_v10  ;;  %v9913_v20 = vand.u32 4294901760, %v6588_v42 }
 0x10f   :  { %1999 = vmatpush.msrb.mxu2 %v9875_v39  ;;  %4387 = vmatpush.msk.msrb.mxu3 %vm9876_vm8, %v9719_v47  ;;  %vm267_vm8 = vcmp.eq.s32.totalorder %v9891_v60, %v6132_v10 }
 0x110   :  { %1679 = vmatpush.msra.mxu0 %v9878_v35  ;;  %4374 = vmatpush.msk.msrb.mxu1 %vm210_vm0, %v9719_v47  ;;  %v4157_v39 = vsel %vm267_vm8, 1.0, %v5873_v28  ;;  %v9896_v35 = vand.u32 4294901760, %v9895_v45 }
 0x111   :  { %1681 = vmatmul.f32.vlgmr.msra.gmra.mxu0 %v6220_v58  ;;  %2003 = vmatpush.msrb.mxu2 %v9880_v46  ;;  %v9898_v46 = vld [vmem:[#allocation28_spill] sm:$0xff] }
 0x112   :  { %1886 = vmatpush.msrb.mxu0 %v6218_v14  ;;  %4388 = vmatpush.msk.msrb.mxu3 %vm9881_vm15, %v9719_v47  ;;  %v9887_v14 = vld [vmem:[#allocation25_spill] sm:$0xff]  ;;  %v9947_v58 = vld [vmem:[#allocation64_spill] sm:$0xff] }
 0x113   :  { %1775 = vmatmul.f32.gmra.mxu2 %v9882_v44  ;;  %4375 = vmatpush.msk.msrb.mxu1 %vm9883_vm2, %v9719_v47  ;;  %vm270_vm4 = vcmp.eq.s32.totalorder %v9887_v14, %v6132_v10 }
 0x114   :  { %1889 = vmatpush.msrb.mxu0 %v9868_v57  ;;  %2007 = vmatpush.msrb.mxu2 %v9885_v62  ;;  %v9890_v57 = vand.u32 4294901760, %v6329_v6  ;;  %v4160_v51 = vsel %vm270_vm4, 1.0, %v5873_v28  ;;  %v9899_v62 = vand.u32 4294901760, %v6437_v55 }
 0x115   :  { %4389 = vmatpush.msk.msrb.mxu3 %vm9886_vm14, %v9719_v47  ;;  %4376 = vmatpush.msk.msrb.mxu1 %vm9889_vm6, %v9719_v47  ;;  %vm9588_vm14 = vcmp.eq.s32.totalorder %v9898_v46, %v6132_v10 }
 0x116   :  { %1880 = vmatmul.f32.gmra.mxu3 %v9888_v31  ;;  %1892 = vmatpush.msrb.mxu0 %v9874_v1  ;;  %v9893_v1 = vld [vmem:[#allocation27_spill] sm:$0xff] }
 0x117   :  { %2011 = vmatpush.msrb.mxu2 %v9890_v57  ;;  %4390 = vmatpush.msk.msrb.mxu3 %vm210_vm0, %v9719_v47  ;;  %vm264_vm15 = vcmp.eq.s32.totalorder %v9893_v1, %v6132_v10  ;;  %vm9894_vm0 = vmmov %vm9883_vm2  ;;  %v6787_v57 = vsub.f32 %v4157_v39, %v4157_v39 }
 0x118   :  { %1895 = vmatpush.msrb.mxu0 %v9879_v13  ;;  %4377 = vmatpush.msk.msrb.mxu1 %vm201_vm9, %v9719_v47  ;;  %vm9897_vm2 = vmmov %vm9889_vm6  ;;  %v6771_v13 = vsub.f32 %v4160_v51, %v4160_v51  ;;  %v9901_v51 = vand.u32 4294901760, %v6450_v27 }
 0x119   :  { %2015 = vmatpush.msrb.mxu2 %v9892_v38  ;;  %4391 = vmatpush.msk.msrb.mxu3 %vm9894_vm0, %v9719_v47 }
 0x11a   :  { %1685 = vmatmul.f32.gmra.mxu0 %v6309_v43  ;;  %4378 = vmatpush.msk.msrb.mxu1 %vm198_vm11, %v9719_v47  ;;  %v9556_v39 = vand.u32 4294901760, %v6771_v13 }
 0x11b   :  { %1898 = vmatpush.msrb.mxu0 %v9884_v19  ;;  %2019 = vmatpush.msrb.mxu2 %v9896_v35  ;;  %v4154_v19 = vsel %vm264_vm15, 1.0, %v5873_v28  ;;  %v6805_v35 = vpop.f32.mrf.mxu1 }
 0x11c   :  { %4392 = vmatpush.msk.msrb.mxu3 %vm9897_vm2, %v9719_v47  ;;  %1726 = vmatmul.f32.gmra.mxu1 %v6309_v43  ;;  %v6827_v50 = vpop.f32.mrf.mxu2 }
 0x11d   :  { %1901 = vmatpush.msrb.mxu0 %v6329_v6  ;;  %4379 = vmatpush.msk.msrb.mxu1 %vm195_vm12, %v9719_v47  ;;  %v6789_v38 = vpop.f32.mrf.mxu0  ;;  %v9900_v6 = vld [vmem:[#allocation29_spill] sm:$0xff] }
 0x11e   :  { %2023 = vmatpush.msrb.mxu2 %v9899_v62  ;;  %4393 = vmatpush.msk.msrb.mxu3 %vm201_vm9, %v9719_v47  ;;  %vm9589_vm6 = vcmp.eq.s32.totalorder %v9900_v6, %v6132_v10  ;;  %v6807_v62 = vsub.f32 %v4154_v19, %v4154_v19  ;;  %v9557_v19 = vand.u32 4294901760, %v6787_v57 }
 0x11f   :  { %1904 = vmatpush.msrb.mxu0 %v6394_v0  ;;  %4380 = vmatpush.msk.msrb.mxu1 %vm192_vm13, %v9719_v47  ;;  %v4151_v0 = vsel %vm9588_vm14, 1.0, %v5873_v28  ;;  %v4148_v16 = vsel %vm9589_vm6, 1.0, %v5873_v28 }
 0x120   :  { %2027 = vmatpush.msrb.mxu2 %v9901_v51  ;;  %4394 = vmatpush.msk.msrb.mxu3 %vm198_vm11, %v9719_v47  ;;  %v9902_v51 = vld [vmem:[#allocation30_spill] sm:$0xff]  ;;  %vm9590_vm11 = vcmp.eq.s32.totalorder %v9903_v59, %v6132_v10 }
 0x121   :  { %1907 = vmatpush.msrb.mxu0 %v9895_v45  ;;  %vm255_vm9 = vcmp.eq.s32.totalorder %v9902_v51, %v6132_v10  ;;  %4381 = vmatpush.msk.msrb.mxu1 %vm189_vm1, %v9719_v47  ;;  %v6834_v45 = vsub.f32 %v4151_v0, %v4151_v0  ;;  %v6850_v0 = vpop.f32.mrf.mxu3 }
 0x122   :  { %2031 = vmatpush.msrb.mxu2 %v1841_v26  ;;  %4395 = vmatpush.msk.msrb.mxu3 %vm195_vm12, %v9719_v47  ;;  %v2154_v26 = vsub.f32 %v6771_v13, %v9556_v39  ;;  %v2160_v39 = vsub.f32 %v6787_v57, %v9557_v19  ;;  %v9906_v19 = vand.u32 4294901760, %v6807_v62 }
 0x123   :  { %1910 = vmatpush.msrb.mxu0 %v6437_v55  ;;  %4382 = vmatpush.msk.msrb.mxu1 %vm186_vm3, %v9719_v47  ;;  %v6872_v55 = vsub.f32 %v4148_v16, %v4148_v16 }
 0x124   :  { %2035 = vmatpush.msrb.mxu2 %v1847_v24  ;;  %4396 = vmatpush.msk.msrb.mxu3 %vm192_vm13, %v9719_v47  ;;  %v4145_v24 = vsel %vm255_vm9, 1.0, %v5873_v28  ;;  %v2155_v16 = vand.u32 4294901760, %v2154_v26  ;;  %v2166_v5 = vsub.f32 %v6807_v62, %v9906_v19  ;;  %v9908_v19 = vand.u32 4294901760, %v6561_v25 }
 0x125   :  { %1913 = vmatpush.msrb.mxu0 %v6450_v27  ;;  %4383 = vmatpush.msk.msrb.mxu1 %vm183_vm7, %v9719_v47  ;;  %v9904_v27 = vld [vmem:[#allocation32_spill] sm:$0xff]  ;;  %v6891_v61 = vsub.f32 %v4145_v24, %v4145_v24  ;;  %v2161_v26 = vand.u32 4294901760, %v2160_v39  ;;  %vm9595_vm13 = vcmp.eq.s32.totalorder %v9909_v29, %v6132_v10  ;;  %v9911_v39 = vand.u32 4294901760, %v6834_v45 }
 0x126   :  { %2039 = vmatpush.msrb.mxu2 %v1853_v34  ;;  %vm9591_vm12 = vcmp.eq.s32.totalorder %v9904_v27, %v6132_v10  ;;  %4397 = vmatpush.msk.msrb.mxu3 %vm189_vm1, %v9719_v47  ;;  %v9905_v34 = vand.u32 4294901760, %v6534_v33  ;;  %vm9594_vm1 = vcmp.eq.s32.totalorder %v9907_v8, %v6132_v10  ;;  %v2167_v54 = vand.u32 4294901760, %v2166_v5  ;;  %v824_v4 = vpop.f32.mrf.mxu2  ;;  %v9914_v5 = vld [vmem:[#allocation36_spill] sm:$0xff] }
 0x127   :  { %1916 = vmatpush.msrb.mxu0 %v6477_v12  ;;  %4384 = vmatpush.msk.msrb.mxu1 %vm180_vm5, %v9719_v47  ;;  %v4142_v12 = vsel %vm9590_vm11, 1.0, %v5873_v28  ;;  %v660_v44 = vpop.f32.mrf.mxu0  ;;  %v4139_v32 = vsel %vm9591_vm12, 1.0, %v5873_v28 }
 0x128   :  { %2043 = vmatpush.msrb.mxu2 %v9905_v34  ;;  %4398 = vmatpush.msk.msrb.mxu3 %vm186_vm3, %v9719_v47  ;;  %v765_v34 = vpop.f32.mrf.mxu1  ;;  %v6925_v24 = vsub.f32 %v4142_v12, %v4142_v12  ;;  %vm240_vm3 = vcmp.eq.s32.totalorder %v9912_v63, %v6132_v10 }
 0x129   :  { %1919 = vmatpush.msrb.mxu0 %v6501_v36  ;;  %4385 = vmatpush.msk.msrb.mxu1 %vm177_vm10, %v9719_v47  ;;  %v9910_v36 = vld [vmem:[#allocation44_spill] sm:$0xff]  ;;  %v766_v17 = vadd.f32 %v765_v34, %v660_v44  ;;  %v9921_v44 = vld [vmem:[#allocation42_spill] sm:$0xff] }
 0x12a   :  { %2047 = vmatpush.msrb.mxu2 %v9908_v19  ;;  %4399 = vmatpush.msk.msrb.mxu3 %vm183_vm7, %v9719_v47  ;;  %v2172_v19 = vsub.f32 %v6834_v45, %v9911_v39  ;;  %vm9600_vm7 = vcmp.eq.s32.totalorder %v9914_v5, %v6132_v10  ;;  %v6953_v39 = vpop.f32.mrf.mxu3  ;;  %v9919_v56 = vand.u32 4294901760, %v6925_v24  ;;  %v9922_v34 = vld [vmem:[#allocation50_spill] sm:$0xff] }
 0x12b   :  { %1978 = vmatmul.f32.vlgmr.msrb.gmra.mxu1 %v9910_v36  ;;  %1922 = vmatpush.msrb.mxu0 %v6524_v53  ;;  %v4136_v36 = vsel %vm9594_vm1, 1.0, %v5873_v28  ;;  %v9915_v53 = vand.u32 4294901760, %v6872_v55 }
 0x12c   :  { %2156 = vmatpush.msra.mxu1 %v2155_v16  ;;  %2051 = vmatpush.msrb.mxu2 %v9913_v20  ;;  %v6941_v16 = vsub.f32 %v4139_v32, %v4139_v32  ;;  %v4133_v20 = vsel %vm9595_vm13, 1.0, %v5873_v28  ;;  %v2173_v32 = vand.u32 4294901760, %v2172_v19  ;;  %v6958_v48 = vsub.f32 %v4136_v36, %v4136_v36  ;;  %v9917_v36 = vld [vmem:[#allocation37_spill] sm:$0xff] }
 0x12d   :  { %4400 = vmatpush.msk.msrb.mxu3 %vm180_vm5, %v9719_v47  ;;  %2053 = vmatmul.f32.vlgmr.msrb.gmra.mxu2 %v9867_v21  ;;  %v2178_v12 = vsub.f32 %v6872_v55, %v9915_v53  ;;  %v762_v53 = vadd.f32 %v6805_v35, %v6789_v38  ;;  %vm9607_vm5 = vcmp.eq.s32.totalorder %v9917_v36, %v6132_v10 }
 0x12e   :  { %2162 = vmatpush.msra.mxu1 %v2161_v26  ;;  %2258 = vmatpush.msra.mxu2 %v6771_v13  ;;  %v4130_v26 = vsel %vm240_vm3, 1.0, %v5873_v28  ;;  %v6978_v18 = vsub.f32 %v4133_v20, %v4133_v20  ;;  %v9923_v2 = vand.u32 4294901760, %v6941_v16  ;;  %v9925_v52 = vand.u32 4294901760, %v6958_v48 }
 0x12f   :  { %1925 = vmatpush.msrb.mxu0 %v6534_v33  ;;  %4401 = vmatpush.msk.msrb.mxu3 %vm177_vm10, %v9719_v47  ;;  %v9916_v33 = vand.u32 4294901760, %v6891_v61  ;;  %v2179_v38 = vand.u32 4294901760, %v2178_v12  ;;  %v6987_v35 = vsub.f32 %v4130_v26, %v4130_v26  ;;  %v820_v12 = vadd.f32 %v6827_v50, %v762_v53  ;;  %v9924_v53 = vld [vmem:[#allocation40_spill] sm:$0xff] }
 0x130   :  { %2168 = vmatpush.msra.mxu1 %v2167_v54  ;;  %2094 = vmatmul.f32.vlgmr.msrb.gmra.mxu3 %v9867_v21  ;;  %v9918_v54 = vld [vmem:[#allocation38_spill] sm:$0xff]  ;;  %v2190_v21 = vsub.f32 %v6925_v24, %v9919_v56  ;;  %v979_v26 = vpop.f32.mrf.mxu1  ;;  %v4124_v56 = vsel %vm9607_vm5, 1.0, %v5873_v28  ;;  %v2196_v9 = vsub.f32 %v6941_v16, %v9923_v2  ;;  %vm225_vm2 = vcmp.eq.s32.totalorder %v9924_v53, %v6132_v10 }
 0x131   :  { %v2184_v19 = vsub.f32 %v6891_v61, %v9916_v33  ;;  %2261 = vmatpush.msra.mxu2 %v6787_v57  ;;  %vm231_vm10 = vcmp.eq.s32.totalorder %v9918_v54, %v6132_v10  ;;  %4418 = vmatpush.msk.msra.mxu3 %vm270_vm4, %v9719_v47  ;;  %v4127_v33 = vsel %vm9600_vm7, 1.0, %v5873_v28  ;;  %v938_v20 = vpop.f32.mrf.mxu0  ;;  %v7037_v7 = vsub.f32 %v4124_v56, %v4124_v56 }
 0x132   :  { %1928 = vmatpush.msrb.mxu0 %v6561_v25  ;;  %2174 = vmatpush.msra.mxu1 %v2173_v32  ;;  %v9920_v25 = vld [vmem:[#allocation39_spill] sm:$0xff]  ;;  %v4121_v50 = vsel %vm231_vm10, 1.0, %v5873_v28  ;;  %v7047_v43 = vpop.f32.mrf.mxu3 }
 0x133   :  { %2264 = vmatpush.msra.mxu2 %v6807_v62  ;;  %vm228_vm0 = vcmp.eq.s32.totalorder %v9920_v25, %v6132_v10  ;;  %4419 = vmatpush.msk.msra.mxu3 %vm267_vm8, %v9719_v47  ;;  %v2185_v32 = vand.u32 4294901760, %v2184_v19  ;;  %v1024_v19 = vpop.f32.mrf.mxu2  ;;  %v7045_v2 = vsub.f32 %v4121_v50, %v4121_v50 }
 0x134   :  { %1931 = vmatpush.msrb.mxu0 %v6588_v42  ;;  %1984 = vmatmul.f32.gmra.mxu1 %v9922_v34  ;;  %v7016_v42 = vsub.f32 %v4127_v33, %v4127_v33  ;;  %v2191_v33 = vand.u32 4294901760, %v2190_v21  ;;  %v2202_v34 = vsub.f32 %v6958_v48, %v9925_v52  ;;  %v9927_v52 = vand.u32 4294901760, %v6978_v18 }
 0x135   :  { %1934 = vmatmul.f32.vlgmr.msrb.gmra.mxu0 %v9921_v44  ;;  %2180 = vmatpush.msra.mxu1 %v2179_v38  ;;  %v825_v44 = vadd.f32 %v824_v4, %v766_v17  ;;  %v864_v38 = vadd.f32 %v6850_v0, %v820_v12  ;;  %9926 = vst [vmem:[#allocation76_spill] sm:$0xff] %v7045_v2  ;;  %v4118_v17 = vsel %vm228_vm0, 1.0, %v5873_v28  ;;  %v2197_v4 = vand.u32 4294901760, %v2196_v9 }
 0x136   :  { %4402 = vmatpush.msk.msra.mxu0 %vm270_vm4, %v9719_v47  ;;  %2267 = vmatpush.msra.mxu2 %v6834_v45  ;;  %v2208_v21 = vsub.f32 %v6978_v18, %v9927_v52  ;;  %v9928_v0 = vand.u32 4294901760, %v6987_v35  ;;  %v2203_v50 = vand.u32 4294901760, %v2202_v34  ;;  %v7076_v3 = vsub.f32 %v4118_v17, %v4118_v17 }
 0x137   :  { %4420 = vmatpush.msk.msra.mxu3 %vm264_vm15, %v9719_v47  ;;  %2057 = vmatmul.f32.gmra.mxu2 %v9888_v31  ;;  %v939_v12 = vadd.f32 %v938_v20, %v864_v38  ;;  %v870_v52 = vadd.f32 %v6953_v39, %v825_v44  ;;  %v9930_v44 = vand.u32 4294901760, %v7016_v42 }
 0x138   :  { %4403 = vmatpush.msk.msra.mxu0 %vm267_vm8, %v9719_v47  ;;  %2186 = vmatpush.msra.mxu1 %v2185_v32  ;;  %v2214_v9 = vsub.f32 %v6987_v35, %v9928_v0  ;;  %v4115_v32 = vsel %vm225_vm2, 1.0, %v5873_v28  ;;  %9929 = vst [vmem:[#allocation73_spill] sm:$0xff] %v7076_v3  ;;  %v2209_v39 = vand.u32 4294901760, %v2208_v21  ;;  %v983_v20 = vpop.f32.mrf.mxu1 }
 0x139   :  { %2270 = vmatpush.msra.mxu2 %v6872_v55  ;;  %4421 = vmatpush.msk.msra.mxu3 %vm9588_vm14, %v9719_v47  ;;  %v2220_v34 = vsub.f32 %v7016_v42, %v9930_v44  ;;  %v980_v56 = vadd.f32 %v979_v26, %v939_v12  ;;  %v9935_v26 = vand.u32 4294901760, %v7045_v2 }
 0x13a   :  { %4404 = vmatpush.msk.msra.mxu0 %vm264_vm15, %v9719_v47  ;;  %2098 = vmatmul.f32.gmra.mxu3 %v9888_v31  ;;  %v942_v38 = vpop.f32.mrf.mxu0  ;;  %v2215_v0 = vand.u32 4294901760, %v2214_v9  ;;  %v9932_v31 = vld [vmem:[#allocation48_spill] sm:$0xff] }
 0x13b   :  { %2192 = vmatpush.msra.mxu1 %v2191_v33  ;;  %2273 = vmatpush.msra.mxu2 %v6891_v61  ;;  %v7091_v33 = vsub.f32 %v4115_v32, %v4115_v32  ;;  %v943_v17 = vadd.f32 %v942_v38, %v870_v52  ;;  %v9593_v32 = vand.u32 4294901760, %v7076_v3  ;;  %v9934_v38 = vld [vmem:[#allocation52_spill] sm:$0xff]  ;;  %v2232_v9 = vsub.f32 %v7045_v2, %v9935_v26  ;;  %v1032_v12 = vpop.f32.mrf.mxu2 }
 0x13c   :  { %4422 = vmatpush.msk.msra.mxu3 %vm9589_vm6, %v9719_v47  ;;  %4405 = vmatpush.msk.msra.mxu0 %vm9588_vm14, %v9719_v47  ;;  %vm318_vm14 = vcmp.eq.s32.totalorder %v9934_v38, %v6132_v10  ;;  %v1137_v26 = vpop.f32.mrf.mxu3  ;;  %v10067_v38 = vld [vmem:[#allocation29_spill] sm:$0xff] }
 0x13d   :  { %2198 = vmatpush.msra.mxu1 %v2197_v4  ;;  %9931 = vst [vmem:[#allocation78_spill] sm:$0xff] %v7091_v33  ;;  %2276 = vmatpush.msra.mxu2 %v6925_v24  ;;  %v9933_v4 = vand.u32 4294901760, %v7037_v7  ;;  %v984_v52 = vadd.f32 %v983_v20, %v943_v17  ;;  %v9592_v20 = vand.u32 4294901760, %v7091_v33  ;;  %v1025_v17 = vadd.f32 %v1024_v19, %v980_v56 }
 0x13e   :  { %4423 = vmatpush.msk.msra.mxu3 %vm255_vm9, %v9719_v47  ;;  %1939 = vmatmul.f32.gmra.mxu0 %v9932_v31  ;;  %v2238_v19 = vsub.f32 %v7076_v3, %v9593_v32 }
 0x13f   :  { %2204 = vmatpush.msra.mxu1 %v2203_v50  ;;  %v2226_v21 = vsub.f32 %v7037_v7, %v9933_v4  ;;  %4406 = vmatpush.msk.msra.mxu0 %vm9589_vm6, %v9719_v47  ;;  %v2221_v50 = vand.u32 4294901760, %v2220_v34  ;;  %v1033_v44 = vadd.f32 %v1032_v12, %v984_v52  ;;  %v4208_v4 = vsel %vm318_vm14, 1.0, %v5873_v28 }
 0x140   :  { %2279 = vmatpush.msra.mxu2 %v6941_v16  ;;  %4424 = vmatpush.msk.msra.mxu3 %vm9590_vm11, %v9719_v47  ;;  %v2233_v52 = vand.u32 4294901760, %v2232_v9  ;;  %v1134_v9 = vadd.f32 %v7047_v43, %v1025_v17  ;;  %v9940_v17 = vld [vmem:[#allocation59_spill] sm:$0xff] }
 0x141   :  { %2210 = vmatpush.msra.mxu1 %v2209_v39  ;;  %4407 = vmatpush.msk.msra.mxu0 %vm255_vm9, %v9719_v47  ;;  %v9936_v39 = vld [vmem:[#allocation55_spill] sm:$0xff]  ;;  %v2227_v34 = vand.u32 4294901760, %v2226_v21  ;;  %v7136_v56 = vadd.f32 %v1137_v26, %v1033_v44  ;;  %v7150_v21 = vsub.f32 %v4208_v4, %v4208_v4  ;;  %v9938_v44 = vld [vmem:[#allocation57_spill] sm:$0xff] }
 0x142   :  { %2282 = vmatpush.msra.mxu2 %v6958_v48  ;;  %vm9614_vm6 = vcmp.eq.s32.totalorder %v9936_v39, %v6132_v10  ;;  %4425 = vmatpush.msk.msra.mxu3 %vm9591_vm12, %v9719_v47 }
 0x143   :  { %2216 = vmatpush.msra.mxu1 %v2215_v0  ;;  %4408 = vmatpush.msk.msra.mxu0 %vm9590_vm11, %v9719_v47  ;;  %v2244_v0 = vsub.f32 %v7091_v33, %v9592_v20  ;;  %9937 = vst [vmem:[#allocation74_spill] sm:$0xff] %v7150_v21  ;;  %v4205_v12 = vsel %vm9614_vm6, 1.0, %v5873_v28  ;;  %vm9617_vm11 = vcmp.eq.s32.totalorder %v9938_v44, %v6132_v10  ;;  %v1235_v20 = vpop.f32.mrf.mxu1 }
 0x144   :  { %2285 = vmatpush.msra.mxu2 %v6978_v18  ;;  %4426 = vmatpush.msk.msra.mxu3 %vm9594_vm1, %v9719_v47  ;;  %v7173_v26 = vsub.f32 %v4205_v12, %v4205_v12  ;;  %v4202_v43 = vsel %vm9617_vm11, 1.0, %v5873_v28  ;;  %v9596_v12 = vand.u32 4294901760, %v7150_v21 }
 0x145   :  { %2222 = vmatpush.msra.mxu1 %v2221_v50  ;;  %4409 = vmatpush.msk.msra.mxu0 %vm9591_vm12, %v9719_v47  ;;  %v2239_v50 = vand.u32 4294901760, %v2238_v19  ;;  %vm9619_vm12 = vcmp.eq.s32.totalorder %v9940_v17, %v6132_v10  ;;  %v2245_v19 = vand.u32 4294901760, %v2244_v0 }
 0x146   :  { %2288 = vmatpush.msra.mxu2 %v6987_v35  ;;  %4427 = vmatpush.msk.msra.mxu3 %vm9595_vm13, %v9719_v47  ;;  %9939 = vst [vmem:[#allocation80_spill] sm:$0xff] %v7173_v26  ;;  %v4199_v0 = vsel %vm9619_vm12, 1.0, %v5873_v28 }
 0x147   :  { %2228 = vmatpush.msra.mxu1 %v2227_v34  ;;  %v1191_v4 = vpop.f32.mrf.mxu0  ;;  %4410 = vmatpush.msk.msra.mxu0 %vm9594_vm1, %v9719_v47 }
 0x148   :  { %2291 = vmatpush.msra.mxu2 %v7016_v42  ;;  %v1192_v34 = vadd.f32 %v1191_v4, %v1134_v9  ;;  %4428 = vmatpush.msk.msra.mxu3 %vm240_vm3, %v9719_v47  ;;  %v9941_v9 = vld [vmem:[#allocation60_spill] sm:$0xff]  ;;  %v1310_v4 = vpop.f32.mrf.mxu2 }
 0x149   :  { %2234 = vmatpush.msra.mxu1 %v2233_v52  ;;  %4411 = vmatpush.msk.msra.mxu0 %vm9595_vm13, %v9719_v47  ;;  %vm9620_vm1 = vcmp.eq.s32.totalorder %v9941_v9, %v6132_v10  ;;  %v7197_v52 = vsub.f32 %v4202_v43, %v4202_v43  ;;  %v2526_v43 = vsub.f32 %v7150_v21, %v9596_v12  ;;  %v9948_v21 = vld [vmem:[#allocation45_spill] sm:$0xff] }
 0x14a   :  { %2294 = vmatpush.msra.mxu2 %v7037_v7  ;;  %v1236_v32 = vadd.f32 %v1235_v20, %v1192_v34  ;;  %4429 = vmatpush.msk.msra.mxu3 %vm9600_vm7, %v9719_v47  ;;  %v4196_v31 = vsel %vm9620_vm1, 1.0, %v5873_v28  ;;  %v1351_v20 = vpop.f32.mrf.mxu3 }
 0x14b   :  { %2240 = vmatpush.msra.mxu1 %v2239_v50  ;;  %9942 = vst [vmem:[#allocation82_spill] sm:$0xff] %v7197_v52  ;;  %4412 = vmatpush.msk.msra.mxu0 %vm240_vm3, %v9719_v47  ;;  %v9943_v50 = vld [vmem:[#allocation61_spill] sm:$0xff]  ;;  %v2527_v14 = vand.u32 4294901760, %v2526_v43 }
 0x14c   :  { %2297 = vmatpush.msra.mxu2 %v7045_v2  ;;  %v1311_v34 = vadd.f32 %v1310_v4, %v1236_v32  ;;  %vm9621_vm13 = vcmp.eq.s32.totalorder %v9943_v50, %v6132_v10  ;;  %4430 = vmatpush.msk.msra.mxu3 %vm9607_vm5, %v9719_v47  ;;  %v7227_v32 = vsub.f32 %v4199_v0, %v4199_v0  ;;  %v9944_v4 = vld [vmem:[#allocation43_spill] sm:$0xff]  ;;  %v9946_v0 = vand.u32 4294901760, %v7173_v26 }
 0x14d   :  { %2246 = vmatpush.msra.mxu1 %v2245_v19  ;;  %4413 = vmatpush.msk.msra.mxu0 %vm9600_vm7, %v9719_v47  ;;  %v4193_v11 = vsel %vm9621_vm13, 1.0, %v5873_v28 }
 0x14e   :  { %2300 = vmatpush.msra.mxu2 %v7076_v3  ;;  %v7229_v19 = vadd.f32 %v1351_v20, %v1311_v34  ;;  %4431 = vmatpush.msk.msra.mxu3 %vm231_vm10, %v9719_v47  ;;  %v9945_v3 = vld [vmem:[#allocation63_spill] sm:$0xff]  ;;  %v2532_v20 = vsub.f32 %v7173_v26, %v9946_v0  ;;  %v7254_v34 = vsub.f32 %v4196_v31, %v4196_v31 }
 0x14f   :  { %2248 = vmatmul.f32.vlgmr.msra.gmra.mxu1 %v9944_v4  ;;  %vm300_vm7 = vcmp.eq.s32.totalorder %v9945_v3, %v6132_v10  ;;  %4414 = vmatpush.msk.msra.mxu0 %vm9607_vm5, %v9719_v47  ;;  %v7270_v0 = vsub.f32 %v4193_v11, %v4193_v11  ;;  %vm294_vm5 = vcmp.eq.s32.totalorder %v5913_v15, %v6132_v10  ;;  %v9949_v11 = vand.u32 4294901760, %v7197_v52 }
 0x150   :  { %4434 = vmatpush.msk.msrb.mxu1 %vm270_vm4, %v9719_v47  ;;  %v1196_v12 = vpop.f32.mrf.mxu0  ;;  %2303 = vmatpush.msra.mxu2 %v7091_v33  ;;  %vm297_vm4 = vcmp.eq.s32.totalorder %v9947_v58, %v6132_v10  ;;  %v4190_v43 = vsel %vm300_vm7, 1.0, %v5873_v28  ;;  %v2533_v31 = vand.u32 4294901760, %v2532_v20  ;;  %v4184_v20 = vsel %vm294_vm5, 1.0, %v5873_v28 }
 0x151   :  { %4432 = vmatpush.msk.msra.mxu3 %vm228_vm0, %v9719_v47  ;;  %v1197_v2 = vadd.f32 %v1196_v12, %v7136_v56  ;;  %2306 = vmatmul.f32.vlgmr.msra.gmra.mxu2 %v9948_v21  ;;  %v2538_v56 = vsub.f32 %v7197_v52, %v9949_v11  ;;  %v4187_v60 = vsel %vm297_vm4, 1.0, %v5873_v28  ;;  %v9950_v52 = vld [vmem:[#allocation49_spill] sm:$0xff]  ;;  %v7307_v26 = vsub.f32 %v4190_v43, %v4190_v43 }
 0x152   :  { %4435 = vmatpush.msk.msrb.mxu1 %vm267_vm8, %v9719_v47  ;;  %4450 = vmatpush.msk.msrb.mxu2 %vm318_vm14, %v9719_v47  ;;  %vm291_vm8 = vcmp.eq.s32.totalorder %v5942_v23, %v6132_v10  ;;  %v7342_v43 = vsub.f32 %v4184_v20, %v4184_v20 }
 0x153   :  { %4415 = vmatpush.msk.msra.mxu0 %vm231_vm10, %v9719_v47  ;;  %v1241_v12 = vpop.f32.mrf.mxu1  ;;  %4433 = vmatpush.msk.msra.mxu3 %vm225_vm2, %v9719_v47  ;;  %v1314_v33 = vpop.f32.mrf.mxu2 }
 0x154   :  { %4436 = vmatpush.msk.msrb.mxu1 %vm264_vm15, %v9719_v47  ;;  %v1242_v11 = vadd.f32 %v1241_v12, %v1197_v2  ;;  %2350 = vmatmul.f32.vlgmr.msra.gmra.mxu3 %v9950_v52  ;;  %v9951_v2 = vand.u32 4294901760, %v7227_v32  ;;  %vm9952_vm15 = vcmp.eq.s32.totalorder %v9898_v46, %v6132_v10  ;;  %v7331_v52 = vsub.f32 %v4187_v60, %v4187_v60  ;;  %v9954_v46 = vld [vmem:[#allocation56_spill] sm:$0xff] }
 0x155   :  { %4451 = vmatpush.msk.msrb.mxu2 %vm9614_vm6, %v9719_v47  ;;  %2528 = vmatpush.msrb.mxu3 %v2527_v14  ;;  %v2539_v14 = vand.u32 4294901760, %v2538_v56  ;;  %vm288_vm6 = vcmp.eq.s32.totalorder %v5968_v30, %v6132_v10  ;;  %v4181_v60 = vsel %vm291_vm8, 1.0, %v5873_v28 }
 0x156   :  { %4416 = vmatpush.msk.msra.mxu0 %vm228_vm0, %v9719_v47  ;;  %v2544_v12 = vsub.f32 %v7227_v32, %v9951_v2  ;;  %v1315_v21 = vadd.f32 %v1314_v33, %v1242_v11  ;;  %4437 = vmatpush.msk.msrb.mxu1 %vm9952_vm15, %v9719_v47  ;;  %v1355_v2 = vpop.f32.mrf.mxu3  ;;  %v9953_v33 = vand.u32 4294901760, %v7254_v34  ;;  %vm285_vm15 = vcmp.eq.s32.totalorder %v5993_v40, %v6132_v10 }
 0x157   :  { %4452 = vmatpush.msk.msrb.mxu2 %vm9617_vm11, %v9719_v47  ;;  %2534 = vmatpush.msrb.mxu3 %v2533_v31  ;;  %v9955_v31 = vld [vmem:[#allocation51_spill] sm:$0xff]  ;;  %vm9957_vm11 = vcmp.eq.s32.totalorder %v9900_v6, %v6132_v10  ;;  %v4178_v1 = vsel %vm288_vm6, 1.0, %v5873_v28 }
 0x158   :  { %4417 = vmatpush.msk.msra.mxu0 %vm225_vm2, %v9719_v47  ;;  %v2550_v11 = vsub.f32 %v7254_v34, %v9953_v33  ;;  %v7348_v56 = vadd.f32 %v1355_v2, %v1315_v21  ;;  %2252 = vmatmul.f32.gmra.mxu1 %v9955_v31  ;;  %v9956_v33 = vand.u32 4294901760, %v6771_v13  ;;  %v2545_v20 = vand.u32 4294901760, %v2544_v12  ;;  %v9959_v12 = vld [vmem:[#allocation54_spill] sm:$0xff] }
 0x159   :  { %2139 = vmatmul.f32.vlgmr.msra.gmra.mxu0 %v9954_v46  ;;  %4438 = vmatpush.msk.msrb.mxu1 %vm9957_vm11, %v9719_v47  ;;  %v9958_v21 = vand.u32 4294901760, %v7270_v0  ;;  %vm282_vm11 = vcmp.eq.s32.totalorder %v6009_v37, %v6132_v10 }
 0x15a   :  { %2363 = vmatpush.msrb.mxu0 %v9956_v33  ;;  %4453 = vmatpush.msk.msrb.mxu2 %vm9619_vm12, %v9719_v47  ;;  %v7373_v33 = vsub.f32 %v4181_v60, %v4181_v60  ;;  %v2551_v46 = vand.u32 4294901760, %v2550_v11  ;;  %v7396_v60 = vsub.f32 %v4178_v1, %v4178_v1  ;;  %vm279_vm12 = vcmp.eq.s32.totalorder %v6031_v41, %v6132_v10 }
 0x15b   :  { %v2556_v2 = vsub.f32 %v7270_v0, %v9958_v21  ;;  %2540 = vmatpush.msrb.mxu3 %v2539_v14  ;;  %2311 = vmatmul.f32.gmra.mxu2 %v9959_v12  ;;  %v9960_v21 = vand.u32 4294901760, %v6787_v57  ;;  %v4175_v14 = vsel %vm285_vm15, 1.0, %v5873_v28  ;;  %v9961_v57 = vand.u32 4294901760, %v7307_v26  ;;  %v9963_v12 = vld [vmem:[#allocation58_spill] sm:$0xff] }
 0x15c   :  { %4439 = vmatpush.msk.msrb.mxu1 %vm255_vm9, %v9719_v47  ;;  %4454 = vmatpush.msk.msrb.mxu2 %vm9620_vm1, %v9719_v47  ;;  %v4172_v13 = vsel %vm282_vm11, 1.0, %v5873_v28  ;;  %vm9964_vm9 = vcmp.eq.s32.totalorder %v9903_v59, %v6132_v10  ;;  %v9965_v1 = vand.u32 4294901760, %v7331_v52  ;;  %vm276_vm1 = vcmp.eq.s32.totalorder %v6051_v22, %v6132_v10 }
 0x15d   :  { %2367 = vmatpush.msrb.mxu0 %v9960_v21  ;;  %v2562_v11 = vsub.f32 %v7307_v26, %v9961_v57  ;;  %2546 = vmatpush.msrb.mxu3 %v2545_v20  ;;  %v9962_v21 = vand.u32 4294901760, %v6807_v62  ;;  %v2557_v6 = vand.u32 4294901760, %v2556_v2  ;;  %v7415_v57 = vsub.f32 %v4175_v14, %v4175_v14 }
 0x15e   :  { %2356 = vmatmul.f32.gmra.mxu3 %v9963_v12  ;;  %4440 = vmatpush.msk.msrb.mxu1 %vm9964_vm9, %v9719_v47  ;;  %v2568_v20 = vsub.f32 %v7331_v52, %v9965_v1  ;;  %v9966_v2 = vand.u32 4294901760, %v7342_v43  ;;  %v4169_v1 = vsel %vm279_vm12, 1.0, %v5873_v28  ;;  %v9967_v14 = vand.u32 4294901760, %v6834_v45 }
 0x15f   :  { %2371 = vmatpush.msrb.mxu0 %v9962_v21  ;;  %4455 = vmatpush.msk.msrb.mxu2 %vm9621_vm13, %v9719_v47  ;;  %vm9968_vm9 = vcmp.eq.s32.totalorder %v9904_v27, %v6132_v10  ;;  %v2563_v62 = vand.u32 4294901760, %v2562_v11  ;;  %v7437_v12 = vsub.f32 %v4172_v13, %v4172_v13  ;;  %v4166_v45 = vsel %vm276_vm1, 1.0, %v5873_v28 }
 0x160   :  { %2552 = vmatpush.msrb.mxu3 %v2551_v46  ;;  %v2574_v21 = vsub.f32 %v7342_v43, %v9966_v2  ;;  %4441 = vmatpush.msk.msrb.mxu1 %vm9968_vm9, %v9719_v47  ;;  %vm273_vm13 = vcmp.eq.s32.totalorder %v6072_v49, %v6132_v10  ;;  %v9969_v2 = vld [vmem:[#allocation62_spill] sm:$0xff]  ;;  %vm9970_vm9 = vcmp.eq.s32.totalorder %v9907_v8, %v6132_v10  ;;  %v2569_v13 = vand.u32 4294901760, %v2568_v20  ;;  %v10050_v49 = vld [vmem:[#allocation9_spill] sm:$0xff] }
 0x161   :  { %2375 = vmatpush.msrb.mxu0 %v9967_v14  ;;  %4456 = vmatpush.msk.msrb.mxu2 %vm300_vm7, %v9719_v47  ;;  %v9971_v11 = vand.u32 4294901760, %v7373_v33  ;;  %v9623_v14 = vand.u32 4294901760, %v7415_v57  ;;  %v7458_v46 = vsub.f32 %v4169_v1, %v4169_v1  ;;  %v9972_v27 = vand.u32 4294901760, %v6872_v55 }
 0x162   :  { %2558 = vmatpush.msrb.mxu3 %v2557_v6  ;;  %2147 = vmatmul.f32.gmra.mxu0 %v9969_v2  ;;  %v2575_v2 = vand.u32 4294901760, %v2574_v21  ;;  %v9974_v20 = vand.u32 4294901760, %v7396_v60  ;;  %v7474_v55 = vsub.f32 %v4166_v45, %v4166_v45 }
 0x163   :  { %4442 = vmatpush.msk.msrb.mxu1 %vm9970_vm9, %v9719_v47  ;;  %v2580_v6 = vsub.f32 %v7373_v33, %v9971_v11  ;;  %2379 = vmatpush.msrb.mxu0 %v9972_v27  ;;  %vm9973_vm9 = vcmp.eq.s32.totalorder %v9909_v29, %v6132_v10  ;;  %v9627_v11 = vand.u32 4294901760, %v7437_v12  ;;  %v4163_v27 = vsel %vm273_vm13, 1.0, %v5873_v28 }
 0x164   :  { %4457 = vmatpush.msk.msrb.mxu2 %vm297_vm4, %v9719_v47  ;;  %2564 = vmatpush.msrb.mxu3 %v2563_v62  ;;  %v2586_v1 = vsub.f32 %v7396_v60, %v9974_v20  ;;  %v9975_v62 = vand.u32 4294901760, %v6891_v61  ;;  %v2592_v45 = vsub.f32 %v7415_v57, %v9623_v14  ;;  %v9626_v20 = vand.u32 4294901760, %v7458_v46 }
 0x165   :  { %4443 = vmatpush.msk.msrb.mxu1 %vm9973_vm9, %v9719_v47  ;;  %v2581_v21 = vand.u32 4294901760, %v2580_v6  ;;  %v9976_v61 = vand.u32 4294901760, %v6925_v24  ;;  %v9625_v24 = vand.u32 4294901760, %v7474_v55  ;;  %v9978_v14 = vand.u32 4294901760, %v6941_v16 }
 0x166   :  { %2383 = vmatpush.msrb.mxu0 %v9975_v62  ;;  %4458 = vmatpush.msk.msrb.mxu2 %vm294_vm5, %v9719_v47  ;;  %v2587_v6 = vand.u32 4294901760, %v2586_v1  ;;  %v2598_v62 = vsub.f32 %v7437_v12, %v9627_v11  ;;  %vm9979_vm9 = vcmp.eq.s32.totalorder %v9917_v36, %v6132_v10  ;;  %v2593_v1 = vand.u32 4294901760, %v2592_v45 }
 0x167   :  { %2570 = vmatpush.msrb.mxu3 %v2569_v13  ;;  %4444 = vmatpush.msk.msrb.mxu1 %vm240_vm3, %v9719_v47  ;;  %v7500_v13 = vsub.f32 %v4163_v27, %v4163_v27  ;;  %vm9977_vm3 = vcmp.eq.s32.totalorder %v9914_v5, %v6132_v10  ;;  %v2604_v27 = vsub.f32 %v7458_v46, %v9626_v20  ;;  %v10024_v11 = vand.u32 4294901760, %v7415_v57 }
 0x168   :  { %2387 = vmatpush.msrb.mxu0 %v9976_v61  ;;  %4459 = vmatpush.msk.msrb.mxu2 %vm291_vm8, %v9719_v47  ;;  %v1396_v61 = vpop.f32.mrf.mxu0  ;;  %v2599_v45 = vand.u32 4294901760, %v2598_v62 }
 0x169   :  { %2576 = vmatpush.msrb.mxu3 %v2575_v2  ;;  %4445 = vmatpush.msk.msrb.mxu1 %vm9977_vm3, %v9719_v47  ;;  %v1397_v2 = vadd.f32 %v1396_v61, %v7229_v19  ;;  %v9624_v19 = vand.u32 4294901760, %v7500_v13  ;;  %v2605_v62 = vand.u32 4294901760, %v2604_v27 }
 0x16a   :  { %2391 = vmatpush.msrb.mxu0 %v9978_v14  ;;  %4460 = vmatpush.msk.msrb.mxu2 %vm288_vm6, %v9719_v47  ;;  %v9980_v14 = vand.u32 4294901760, %v6958_v48  ;;  %v2610_v48 = vsub.f32 %v7474_v55, %v9625_v24 }
 0x16b   :  { %2582 = vmatpush.msrb.mxu3 %v2581_v21  ;;  %4446 = vmatpush.msk.msrb.mxu1 %vm9979_vm9, %v9719_v47  ;;  %v1505_v16 = vpop.f32.mrf.mxu1  ;;  %v1563_v61 = vpop.f32.mrf.mxu2 }
 0x16c   :  { %2395 = vmatpush.msrb.mxu0 %v9980_v14  ;;  %4461 = vmatpush.msk.msrb.mxu2 %vm285_vm15, %v9719_v47  ;;  %v1506_v21 = vadd.f32 %v1505_v16, %v1397_v2  ;;  %v9981_v14 = vand.u32 4294901760, %v6978_v18  ;;  %v9982_v16 = vand.u32 4294901760, %v6987_v35  ;;  %v2616_v18 = vsub.f32 %v7500_v13, %v9624_v19  ;;  %v10023_v19 = vld [vmem:[#allocation15_spill] sm:$0xff] }
 0x16d   :  { %2588 = vmatpush.msrb.mxu3 %v2587_v6  ;;  %4447 = vmatpush.msk.msrb.mxu1 %vm231_vm10, %v9719_v47  ;;  %v9983_v35 = vand.u32 4294901760, %v7016_v42  ;;  %vm9986_vm10 = vcmp.eq.s32.totalorder %v9936_v39, %v6132_v10 }
 0x16e   :  { %2399 = vmatpush.msrb.mxu0 %v9981_v14  ;;  %4462 = vmatpush.msk.msrb.mxu2 %vm282_vm11, %v9719_v47  ;;  %v1564_v2 = vadd.f32 %v1563_v61, %v1506_v21  ;;  %v1607_v6 = vpop.f32.mrf.mxu3  ;;  %v2617_v42 = vand.u32 4294901760, %v2616_v18  ;;  %v9985_v14 = vld [vmem:[#allocation84_spill] sm:$0xff]  ;;  %vm10000_vm3 = vmmov %vm9986_vm10 }
 0x16f   :  { %2594 = vmatpush.msrb.mxu3 %v2593_v1  ;;  %4448 = vmatpush.msk.msrb.mxu1 %vm228_vm0, %v9719_v47  ;;  %v2611_v1 = vand.u32 4294901760, %v2610_v48  ;;  %vm9991_vm0 = vcmp.eq.s32.totalorder %v9938_v44, %v6132_v10  ;;  %v10065_v44 = vld [vmem:[#allocation27_spill] sm:$0xff] }
 0x170   :  { %2403 = vmatpush.msrb.mxu0 %v9982_v16  ;;  %4463 = vmatpush.msk.msrb.mxu2 %vm279_vm12, %v9719_v47  ;;  %v7557_v21 = vadd.f32 %v1607_v6, %v1564_v2  ;;  %v9987_v6 = vld [vmem:[#allocation74_spill] sm:$0xff]  ;;  %vm10005_vm9 = vmmov %vm9991_vm0 }
 0x171   :  { %2600 = vmatpush.msrb.mxu3 %v2599_v45  ;;  %4449 = vmatpush.msk.msrb.mxu1 %vm225_vm2, %v9719_v47  ;;  %v9984_v45 = vand.u32 4294901760, %v7037_v7  ;;  %v9988_v7 = vand.u32 4294901760, %v9987_v6  ;;  %vm9997_vm2 = vcmp.eq.s32.totalorder %v9940_v17, %v6132_v10 }
 0x172   :  { %2407 = vmatpush.msrb.mxu0 %v9983_v35  ;;  %4464 = vmatpush.msk.msrb.mxu2 %vm276_vm1, %v9719_v47  ;;  %v1404_v27 = vpop.f32.mrf.mxu0  ;;  %v9993_v35 = vld [vmem:[#allocation80_spill] sm:$0xff] }
 0x173   :  { %2606 = vmatpush.msrb.mxu3 %v2605_v62  ;;  %2466 = vmatmul.f32.vlgmr.msrb.gmra.mxu1 %v9944_v4  ;;  %v1405_v61 = vadd.f32 %v1404_v27, %v7348_v56  ;;  %v9989_v62 = vld [vmem:[#allocation76_spill] sm:$0xff]  ;;  %v9994_v27 = vand.u32 4294901760, %v9993_v35 }
 0x174   :  { %4466 = vmatpush.msk.msra.mxu1 %vm318_vm14, %v9719_v47  ;;  %2411 = vmatpush.msrb.mxu0 %v9984_v45  ;;  %v9990_v16 = vand.u32 4294901760, %v9989_v62  ;;  %v9995_v45 = vld [vmem:[#allocation73_spill] sm:$0xff] }
 0x175   :  { %4465 = vmatpush.msk.msrb.mxu2 %vm273_vm13, %v9719_v47  ;;  %2612 = vmatpush.msrb.mxu3 %v2611_v1  ;;  %v1509_v48 = vpop.f32.mrf.mxu1  ;;  %v1568_v2 = vpop.f32.mrf.mxu2  ;;  %v9992_v1 = vld [vmem:[#allocation75_spill] sm:$0xff] }
 0x176   :  { %2511 = vmatmul.f32.vlgmr.msrb.gmra.mxu2 %v9985_v14  ;;  %4467 = vmatpush.msk.msra.mxu1 %vm9986_vm10, %v9719_v47  ;;  %v1510_v56 = vadd.f32 %v1509_v48, %v1405_v61  ;;  %v9996_v48 = vand.u32 4294901760, %v9995_v45  ;;  %vm10007_vm10 = vcmp.eq.s32.totalorder %v9943_v50, %v6132_v10  ;;  %v10010_v45 = vld [vmem:[#allocation10_spill] sm:$0xff]  ;;  %v10025_v14 = vld [vmem:[#allocation16_spill] sm:$0xff] }
 0x177   :  { %2735 = vmatpush.msra.mxu2 %v9988_v7  ;;  %2415 = vmatpush.msrb.mxu0 %v9990_v16  ;;  %v10001_v7 = vld [vmem:[#allocation78_spill] sm:$0xff]  ;;  %v4706_v16 = vld [vmem:[%s9376_s3] sm:$0x7] }
 0x178   :  { %2618 = vmatpush.msrb.mxu3 %v2617_v42  ;;  %4468 = vmatpush.msk.msra.mxu1 %vm9991_vm0, %v9719_v47  ;;  %v1569_v18 = vadd.f32 %v1568_v2, %v1510_v56  ;;  %v1613_v61 = vpop.f32.mrf.mxu3  ;;  %v9998_v56 = vld [vmem:[#allocation82_spill] sm:$0xff]  ;;  %v10002_v62 = vand.u32 4294901760, %v10001_v7  ;;  %vm10009_vm0 = vmmov %vm9997_vm2  ;;  %v10015_v7 = vld [vmem:[#allocation12_spill] sm:$0xff] }
 0x179   :  { %2620 = vmatmul.f32.vlgmr.msrb.gmra.mxu3 %v9992_v1  ;;  %2739 = vmatpush.msra.mxu2 %v9994_v27  ;;  %v9999_v2 = vand.u32 4294901760, %v9998_v56  ;;  %v10004_v27 = vand.u32 4294901760, %v7227_v32 }
 0x17a   :  { %4482 = vmatpush.msk.msra.mxu3 %vm318_vm14, %v9719_v47  ;;  %2419 = vmatpush.msrb.mxu0 %v9996_v48  ;;  %v7603_v42 = vadd.f32 %v1613_v61, %v1569_v18  ;;  %v7622_v18 = vperm.slane %v4706_v16, 2  ;;  %vm10003_vm14 = vcmp.eq.s32.totalorder %v9941_v9, %v6132_v10  ;;  %v10006_v61 = vld [vmem:[#allocation87_spill] sm:$0xff]  ;;  %v10011_v48 = vld [vmem:[#allocation81_spill] sm:$0xff]  ;;  %v10017_v16 = vand.u32 4294901760, %v7331_v52  ;;  %v10043_v10 = vld [vmem:[#allocation22_spill] sm:$0xff] }
 0x17b   :  { %4469 = vmatpush.msk.msra.mxu1 %vm9997_vm2, %v9719_v47  ;;  %2743 = vmatpush.msra.mxu2 %v9999_v2  ;;  %v10057_v9 = vld [vmem:[#allocation83_spill] sm:$0xff] }
 0x17c   :  { %4483 = vmatpush.msk.msra.mxu3 %vm10000_vm3, %v9719_v47  ;;  %2423 = vmatpush.msrb.mxu0 %v10002_v62  ;;  %vm223_vm2 = vcmp.eq.s32.totalorder %v10010_v45, %v7622_v18  ;;  %vm10013_vm3 = vmmov %vm10003_vm14  ;;  %v10016_v62 = vand.u32 4294901760, %v7307_v26 }
 0x17d   :  { %2425 = vmatmul.f32.vlgmr.msrb.gmra.mxu0 %v9944_v4  ;;  %2470 = vmatmul.f32.gmra.mxu1 %v9955_v31  ;;  %v4113_v2 = vsel %vm223_vm2, 1.0, %v5873_v28  ;;  %v10072_v4 = vld [vmem:[#allocation32_spill] sm:$0xff] }
 0x17e   :  { %2630 = vmatpush.msra.mxu0 %v9987_v6  ;;  %4470 = vmatpush.msk.msra.mxu1 %vm10003_vm14, %v9719_v47  ;;  %v10008_v6 = vand.u32 4294901760, %v7254_v34 }
 0x17f   :  { %2747 = vmatpush.msra.mxu2 %v10004_v27  ;;  %4484 = vmatpush.msk.msra.mxu3 %vm10005_vm9, %v9719_v47  ;;  %vm217_vm9 = vcmp.eq.s32.totalorder %v10015_v7, %v7622_v18  ;;  %v7692_v27 = vsub.f32 %v4113_v2, %v4113_v2 }
 0x180   :  { %2519 = vmatmul.f32.gmra.mxu2 %v10006_v61  ;;  %2633 = vmatpush.msra.mxu0 %v9993_v35  ;;  %v10012_v35 = vand.u32 4294901760, %v7270_v0 }
 0x181   :  { %4471 = vmatpush.msk.msra.mxu1 %vm10007_vm10, %v9719_v47  ;;  %2751 = vmatpush.msra.mxu2 %v10008_v6  ;;  %v4107_v6 = vsel %vm217_vm9, 1.0, %v5873_v28 }
 0x182   :  { %4485 = vmatpush.msk.msra.mxu3 %vm10009_vm0, %v9719_v47  ;;  %2636 = vmatpush.msra.mxu0 %v9998_v56  ;;  %v10014_v56 = vld [vmem:[#allocation11_spill] sm:$0xff] }
 0x183   :  { %2624 = vmatmul.f32.gmra.mxu3 %v10011_v48  ;;  %4472 = vmatpush.msk.msra.mxu1 %vm300_vm7, %v9719_v47  ;;  %vm220_vm14 = vcmp.eq.s32.totalorder %v10014_v56, %v7622_v18 }
 0x184   :  { %2755 = vmatpush.msra.mxu2 %v10012_v35  ;;  %4486 = vmatpush.msk.msra.mxu3 %vm10013_vm3, %v9719_v47  ;;  %v10019_v35 = vand.u32 4294901760, %v7342_v43 }
 0x185   :  { %2639 = vmatpush.msra.mxu0 %v7227_v32  ;;  %4473 = vmatpush.msk.msra.mxu1 %vm297_vm4, %v9719_v47  ;;  %v4110_v32 = vsel %vm220_vm14, 1.0, %v5873_v28 }
 0x186   :  { %2759 = vmatpush.msra.mxu2 %v10016_v62  ;;  %4487 = vmatpush.msk.msra.mxu3 %vm10007_vm10, %v9719_v47  ;;  %v7711_v2 = vsub.f32 %v4110_v32, %v4110_v32  ;;  %v7721_v62 = vsub.f32 %v4107_v6, %v4107_v6  ;;  %v9628_v32 = vand.u32 4294901760, %v7692_v27  ;;  %vm178_vm10 = vcmp.eq.s32.totalorder %v10050_v49, %v7622_v18 }
 0x187   :  { %2429 = vmatmul.f32.gmra.mxu0 %v9955_v31  ;;  %4474 = vmatpush.msk.msra.mxu1 %vm294_vm5, %v9719_v47 }
 0x188   :  { %2642 = vmatpush.msra.mxu0 %v7254_v34  ;;  %2763 = vmatpush.msra.mxu2 %v10017_v16  ;;  %v10018_v34 = vld [vmem:[#allocation13_spill] sm:$0xff]  ;;  %v2898_v61 = vsub.f32 %v7692_v27, %v9628_v32  ;;  %v10028_v32 = vand.u32 4294901760, %v7711_v2 }
 0x189   :  { %4488 = vmatpush.msk.msra.mxu3 %vm300_vm7, %v9719_v47  ;;  %4475 = vmatpush.msk.msra.mxu1 %vm291_vm8, %v9719_v47  ;;  %vm9644_vm0 = vcmp.eq.s32.totalorder %v10018_v34, %v7622_v18 }
 0x18a   :  { %2645 = vmatpush.msra.mxu0 %v7270_v0  ;;  %2767 = vmatpush.msra.mxu2 %v10019_v35  ;;  %v10020_v0 = vand.u32 4294901760, %v7373_v33  ;;  %v4104_v16 = vsel %vm9644_vm0, 1.0, %v5873_v28  ;;  %v10021_v35 = vld [vmem:[#allocation14_spill] sm:$0xff]  ;;  %v2904_v30 = vsub.f32 %v7711_v2, %v10028_v32 }
 0x18b   :  { %4489 = vmatpush.msk.msra.mxu3 %vm297_vm4, %v9719_v47  ;;  %4476 = vmatpush.msk.msra.mxu1 %vm288_vm6, %v9719_v47  ;;  %vm9645_vm7 = vcmp.eq.s32.totalorder %v10021_v35, %v7622_v18  ;;  %vm208_vm4 = vcmp.eq.s32.totalorder %v10023_v19, %v7622_v18  ;;  %v7756_v24 = vsub.f32 %v4104_v16, %v4104_v16 }
 0x18c   :  { %2648 = vmatpush.msra.mxu0 %v7307_v26  ;;  %2771 = vmatpush.msra.mxu2 %v10020_v0  ;;  %v10022_v26 = vand.u32 4294901760, %v7396_v60  ;;  %v1768_v6 = vpop.f32.mrf.mxu2 }
 0x18d   :  { %4490 = vmatpush.msk.msra.mxu3 %vm294_vm5, %v9719_v47  ;;  %4477 = vmatpush.msk.msra.mxu1 %vm285_vm15, %v9719_v47  ;;  %vm9648_vm5 = vcmp.eq.s32.totalorder %v10025_v14, %v7622_v18  ;;  %v10035_v40 = vand.u32 4294901760, %v7756_v24 }
 0x18e   :  { %2651 = vmatpush.msra.mxu0 %v7331_v52  ;;  %2775 = vmatpush.msra.mxu2 %v10022_v26  ;;  %v1682_v0 = vpop.f32.mrf.mxu0  ;;  %v4101_v26 = vsel %vm9645_vm7, 1.0, %v5873_v28  ;;  %v1723_v52 = vpop.f32.mrf.mxu1 }
 0x18f   :  { %4491 = vmatpush.msk.msra.mxu3 %vm291_vm8, %v9719_v47  ;;  %4478 = vmatpush.msk.msra.mxu1 %vm282_vm11, %v9719_v47  ;;  %v1683_v20 = vadd.f32 %v1682_v0, %v7557_v21  ;;  %v1877_v16 = vpop.f32.mrf.mxu3  ;;  %v10027_v0 = vand.u32 4294901760, %v7437_v12  ;;  %v7793_v23 = vsub.f32 %v4101_v26, %v4101_v26  ;;  %v10031_v26 = vand.u32 4294901760, %v7458_v46 }
 0x190   :  { %2654 = vmatpush.msra.mxu0 %v7342_v43  ;;  %2779 = vmatpush.msra.mxu2 %v10024_v11  ;;  %v4098_v11 = vsel %vm208_vm4, 1.0, %v5873_v28  ;;  %v7785_v21 = vadd.f32 %v1877_v16, %v1768_v6  ;;  %v2899_v16 = vand.u32 4294901760, %v2898_v61  ;;  %v10033_v61 = vand.u32 4294901760, %v7474_v55 }
 0x191   :  { %4492 = vmatpush.msk.msra.mxu3 %vm288_vm6, %v9719_v47  ;;  %4479 = vmatpush.msk.msra.mxu1 %vm279_vm12, %v9719_v47  ;;  %v7779_v43 = vadd.f32 %v1723_v52, %v1683_v20  ;;  %v10029_v20 = vld [vmem:[#allocation17_spill] sm:$0xff]  ;;  %v4095_v52 = vsel %vm9648_vm5, 1.0, %v5873_v28 }
 0x192   :  { %2657 = vmatpush.msra.mxu0 %v7373_v33  ;;  %2783 = vmatpush.msra.mxu2 %v10027_v0  ;;  %vm9651_vm6 = vcmp.eq.s32.totalorder %v10029_v20, %v7622_v18  ;;  %v10030_v33 = vand.u32 4294901760, %v7721_v62  ;;  %v7816_v0 = vsub.f32 %v4098_v11, %v4098_v11  ;;  %v2905_v11 = vand.u32 4294901760, %v2904_v30 }
 0x193   :  { %10026 = vst [vmem:[#allocation86_spill] sm:$0xff] %v7779_v43  ;;  %4493 = vmatpush.msk.msra.mxu3 %vm285_vm15, %v9719_v47  ;;  %4480 = vmatpush.msk.msra.mxu1 %vm276_vm1, %v9719_v47  ;;  %v7836_v32 = vsub.f32 %v4095_v52, %v4095_v52  ;;  %v10034_v43 = vld [vmem:[#allocation79_spill] sm:$0xff]  ;;  %v10039_v30 = vand.u32 4294901760, %v7793_v23 }
 0x194   :  { %v2910_v6 = vsub.f32 %v7721_v62, %v10030_v33  ;;  %2660 = vmatpush.msra.mxu0 %v7396_v60  ;;  %2787 = vmatpush.msra.mxu2 %v10031_v26  ;;  %v4092_v60 = vsel %vm9651_vm6, 1.0, %v5873_v28  ;;  %v10032_v33 = vld [vmem:[#allocation18_spill] sm:$0xff] }
 0x195   :  { %4494 = vmatpush.msk.msra.mxu3 %vm282_vm11, %v9719_v47  ;;  %4481 = vmatpush.msk.msra.mxu1 %vm273_vm13, %v9719_v47  ;;  %vm9653_vm8 = vcmp.eq.s32.totalorder %v10032_v33, %v7622_v18  ;;  %v7850_v52 = vsub.f32 %v4092_v60, %v4092_v60  ;;  %v10038_v60 = vld [vmem:[#allocation20_spill] sm:$0xff] }
 0x196   :  { %2663 = vmatpush.msra.mxu0 %v7415_v57  ;;  %2791 = vmatpush.msra.mxu2 %v10033_v61  ;;  %v2911_v37 = vand.u32 4294901760, %v2910_v6  ;;  %v2916_v57 = vsub.f32 %v7756_v24, %v10035_v40  ;;  %v10036_v61 = vld [vmem:[#allocation19_spill] sm:$0xff]  ;;  %v4089_v6 = vsel %vm9653_vm8, 1.0, %v5873_v28  ;;  %v10037_v40 = vand.u32 4294901760, %v7500_v13 }
 0x197   :  { %4495 = vmatpush.msk.msra.mxu3 %vm279_vm12, %v9719_v47  ;;  %2722 = vmatmul.f32.vlgmr.msra.gmra.mxu1 %v10034_v43  ;;  %v1686_v15 = vpop.f32.mrf.mxu0  ;;  %vm9654_vm15 = vcmp.eq.s32.totalorder %v10036_v61, %v7622_v18  ;;  %vm193_vm12 = vcmp.eq.s32.totalorder %v10038_v60, %v7622_v18 }
 0x198   :  { %2900 = vmatpush.msrb.mxu1 %v2899_v16  ;;  %2666 = vmatpush.msra.mxu0 %v7437_v12  ;;  %v1687_v26 = vadd.f32 %v1686_v15, %v7603_v42  ;;  %v1776_v12 = vpop.f32.mrf.mxu2  ;;  %v2922_v15 = vsub.f32 %v7793_v23, %v10039_v30  ;;  %v9637_v42 = vand.u32 4294901760, %v7836_v32  ;;  %v2917_v41 = vand.u32 4294901760, %v2916_v57  ;;  %v10041_v30 = vld [vmem:[#allocation21_spill] sm:$0xff] }
 0x199   :  { %2795 = vmatpush.msra.mxu2 %v10037_v40  ;;  %4496 = vmatpush.msk.msra.mxu3 %vm276_vm1, %v9719_v47  ;;  %v1881_v16 = vpop.f32.mrf.mxu3  ;;  %v4086_v40 = vsel %vm9654_vm15, 1.0, %v5873_v28  ;;  %v1727_v43 = vpop.f32.mrf.mxu1  ;;  %vm9655_vm1 = vcmp.eq.s32.totalorder %v10041_v30, %v7622_v18 }
 0x19a   :  { %2797 = vmatmul.f32.vlgmr.msra.gmra.mxu2 %v9992_v1  ;;  %2906 = vmatpush.msrb.mxu1 %v2905_v11  ;;  %v7874_v22 = vadd.f32 %v1881_v16, %v1776_v12  ;;  %v7878_v11 = vsub.f32 %v4089_v6, %v4089_v6  ;;  %v7880_v58 = vadd.f32 %v1727_v43, %v1687_v26  ;;  %v10042_v12 = vand.u32 4294901760, %v7816_v0 }
 0x19b   :  { %3002 = vmatpush.msrb.mxu2 %v7692_v27  ;;  %2669 = vmatpush.msra.mxu0 %v7458_v46  ;;  %v4083_v43 = vsel %vm193_vm12, 1.0, %v5873_v28  ;;  %v7898_v26 = vsub.f32 %v4086_v40, %v4086_v40  ;;  %v2934_v57 = vsub.f32 %v7836_v32, %v9637_v42  ;;  %v4080_v6 = vsel %vm9655_vm1, 1.0, %v5873_v28  ;;  %v10044_v40 = vld [vmem:[#allocation23_spill] sm:$0xff] }
 0x19c   :  { %10040 = vst [vmem:[#allocation30_spill] sm:$0xff] %v7880_v58  ;;  %4497 = vmatpush.msk.msra.mxu3 %vm273_vm13, %v9719_v47  ;;  %2912 = vmatpush.msrb.mxu1 %v2911_v37  ;;  %v2928_v16 = vsub.f32 %v7816_v0, %v10042_v12  ;;  %vm9662_vm13 = vcmp.eq.s32.totalorder %v10043_v10, %v7622_v18  ;;  %v2923_v37 = vand.u32 4294901760, %v2922_v15  ;;  %v10045_v15 = vand.u32 4294901760, %v7850_v52  ;;  %v10046_v12 = vld [vmem:[#allocation77_spill] sm:$0xff] }
 0x19d   :  { %2838 = vmatmul.f32.vlgmr.msra.gmra.mxu3 %v9992_v1  ;;  %3005 = vmatpush.msrb.mxu2 %v7711_v2  ;;  %vm184_vm11 = vcmp.eq.s32.totalorder %v10044_v40, %v7622_v18  ;;  %v7918_v46 = vsub.f32 %v4083_v43, %v4083_v43  ;;  %v10047_v43 = vld [vmem:[#allocation85_spill] sm:$0xff]  ;;  %v7935_v1 = vsub.f32 %v4080_v6, %v4080_v6  ;;  %v10049_v6 = vand.u32 4294901760, %v7878_v11 }
 0x19e   :  { %4514 = vmatpush.msk.msrb.mxu3 %vm223_vm2, %v9719_v47  ;;  %2672 = vmatpush.msra.mxu0 %v7474_v55  ;;  %v2929_v55 = vand.u32 4294901760, %v2928_v16  ;;  %v2940_v42 = vsub.f32 %v7850_v52, %v10045_v15  ;;  %v10048_v16 = vld [vmem:[#allocation24_spill] sm:$0xff]  ;;  %v2935_v15 = vand.u32 4294901760, %v2934_v57 }
 0x19f   :  { %2918 = vmatpush.msrb.mxu1 %v2917_v41  ;;  %3008 = vmatpush.msrb.mxu2 %v7721_v62  ;;  %v4077_v41 = vsel %vm9662_vm13, 1.0, %v5873_v28  ;;  %vm181_vm3 = vcmp.eq.s32.totalorder %v10048_v16, %v7622_v18  ;;  %v2946_v58 = vsub.f32 %v7878_v11, %v10049_v6  ;;  %v10052_v6 = vand.u32 4294901760, %v7898_v26 }
 0x1a0   :  { %4515 = vmatpush.msk.msrb.mxu3 %vm220_vm14, %v9719_v47  ;;  %2675 = vmatpush.msra.mxu0 %v7500_v13  ;;  %v4074_v13 = vsel %vm184_vm11, 1.0, %v5873_v28  ;;  %v4071_v57 = vsel %vm181_vm3, 1.0, %v5873_v28 }
 0x1a1   :  { %2678 = vmatmul.f32.vlgmr.msra.gmra.mxu0 %v10046_v12  ;;  %2728 = vmatmul.f32.gmra.mxu1 %v10047_v43  ;;  %v7956_v12 = vsub.f32 %v4077_v41, %v4077_v41  ;;  %v2941_v41 = vand.u32 4294901760, %v2940_v42  ;;  %v2952_v43 = vsub.f32 %v7898_v26, %v10052_v6  ;;  %v4068_v42 = vsel %vm178_vm10, 1.0, %v5873_v28 }
 0x1a2   :  { %4498 = vmatpush.msk.msrb.mxu0 %vm223_vm2, %v9719_v47  ;;  %2924 = vmatpush.msrb.mxu1 %v2923_v37  ;;  %v7965_v37 = vsub.f32 %v4074_v13, %v4074_v13  ;;  %v10053_v13 = vand.u32 4294901760, %v7918_v46  ;;  %v7993_v50 = vsub.f32 %v4071_v57, %v4071_v57 }
 0x1a3   :  { %3011 = vmatpush.msrb.mxu2 %v7756_v24  ;;  %4516 = vmatpush.msk.msrb.mxu3 %vm217_vm9, %v9719_v47  ;;  %v10107_v49 = vand.u32 4294901760, %v7956_v12 }
 0x1a4   :  { %2801 = vmatmul.f32.gmra.mxu2 %v10011_v48  ;;  %4499 = vmatpush.msk.msrb.mxu0 %vm220_vm14, %v9719_v47  ;;  %10051 = vst [vmem:[#allocation31_spill] sm:$0xff] %v7965_v37  ;;  %v2958_v6 = vsub.f32 %v7918_v46, %v10053_v13  ;;  %v8008_v13 = vsub.f32 %v4068_v42, %v4068_v42  ;;  %v10059_v42 = vld [vmem:[#allocation25_spill] sm:$0xff] }
 0x1a5   :  { %2930 = vmatpush.msrb.mxu1 %v2929_v55  ;;  %3014 = vmatpush.msrb.mxu2 %v7793_v23  ;;  %v2947_v55 = vand.u32 4294901760, %v2946_v58  ;;  %10054 = vst [vmem:[#allocation33_spill] sm:$0xff] %v7993_v50  ;;  %v2953_v58 = vand.u32 4294901760, %v2952_v43 }
 0x1a6   :  { %4517 = vmatpush.msk.msrb.mxu3 %vm9644_vm0, %v9719_v47  ;;  %4500 = vmatpush.msk.msrb.mxu0 %vm217_vm9, %v9719_v47  ;;  %10056 = vst [vmem:[#allocation34_spill] sm:$0xff] %v8008_v13  ;;  %v2959_v3 = vand.u32 4294901760, %v2958_v6 }
 0x1a7   :  { %2842 = vmatmul.f32.gmra.mxu3 %v10011_v48  ;;  %2936 = vmatpush.msrb.mxu1 %v2935_v15  ;;  %v10055_v15 = vand.u32 4294901760, %v7935_v1  ;;  %v10061_v48 = vld [vmem:[#allocation26_spill] sm:$0xff] }
 0x1a8   :  { %3017 = vmatpush.msrb.mxu2 %v7816_v0  ;;  %4518 = vmatpush.msk.msrb.mxu3 %vm9645_vm7, %v9719_v47 }
 0x1a9   :  { %4501 = vmatpush.msk.msrb.mxu0 %vm9644_vm0, %v9719_v47  ;;  %2942 = vmatpush.msrb.mxu1 %v2941_v41  ;;  %v2964_v57 = vsub.f32 %v7935_v1, %v10055_v15  ;;  %v10058_v41 = vand.u32 4294901760, %v7956_v12  ;;  %vm271_vm0 = vcmp.eq.s32.totalorder %v10059_v42, %v7622_v18  ;;  %v10060_v15 = vand.u32 4294901760, %v7965_v37 }
 0x1aa   :  { %3020 = vmatpush.msrb.mxu2 %v7836_v32  ;;  %4519 = vmatpush.msk.msrb.mxu3 %vm208_vm4, %v9719_v47 }
 0x1ab   :  { %2683 = vmatmul.f32.gmra.mxu0 %v10057_v9  ;;  %2948 = vmatpush.msrb.mxu1 %v2947_v55  ;;  %v2970_v43 = vsub.f32 %v7956_v12, %v10058_v41  ;;  %v2976_v55 = vsub.f32 %v7965_v37, %v10060_v15  ;;  %v2965_v6 = vand.u32 4294901760, %v2964_v57  ;;  %v4161_v15 = vsel %vm271_vm0, 1.0, %v5873_v28 }
 0x1ac   :  { %4502 = vmatpush.msk.msrb.mxu0 %vm9645_vm7, %v9719_v47  ;;  %3023 = vmatpush.msrb.mxu2 %v7850_v52  ;;  %vm9665_vm7 = vcmp.eq.s32.totalorder %v10061_v48, %v7622_v18  ;;  %v10062_v57 = vand.u32 4294901760, %v7993_v50  ;;  %v8065_v17 = vsub.f32 %v4161_v15, %v4161_v15 }
 0x1ad   :  { %4520 = vmatpush.msk.msrb.mxu3 %vm9648_vm5, %v9719_v47  ;;  %2954 = vmatpush.msrb.mxu1 %v2953_v58  ;;  %v2971_v58 = vand.u32 4294901760, %v2970_v43  ;;  %v2977_v9 = vand.u32 4294901760, %v2976_v55  ;;  %v10123_v42 = vld [vmem:[#allocation34_spill] sm:$0xff] }
 0x1ae   :  { %4503 = vmatpush.msk.msrb.mxu0 %vm208_vm4, %v9719_v47  ;;  %3026 = vmatpush.msrb.mxu2 %v7878_v11  ;;  %v2982_v41 = vsub.f32 %v7993_v50, %v10062_v57  ;;  %10064 = vst [vmem:[#allocation35_spill] sm:$0xff] %v8065_v17  ;;  %v4158_v57 = vsel %vm9665_vm7, 1.0, %v5873_v28 }
 0x1af   :  { %4521 = vmatpush.msk.msrb.mxu3 %vm9651_vm6, %v9719_v47  ;;  %2960 = vmatpush.msrb.mxu1 %v2959_v3  ;;  %v10063_v3 = vand.u32 4294901760, %v8008_v13  ;;  %v8088_v39 = vsub.f32 %v4158_v57, %v4158_v57 }
 0x1b0   :  { %4504 = vmatpush.msk.msrb.mxu0 %vm9648_vm5, %v9719_v47  ;;  %3029 = vmatpush.msrb.mxu2 %v7898_v26  ;;  %vm9666_vm5 = vcmp.eq.s32.totalorder %v10065_v44, %v7622_v18  ;;  %v2054_v57 = vpop.f32.mrf.mxu2 }
 0x1b1   :  { %4522 = vmatpush.msk.msrb.mxu3 %vm9653_vm8, %v9719_v47  ;;  %2966 = vmatpush.msrb.mxu1 %v2965_v6  ;;  %v2988_v43 = vsub.f32 %v8008_v13, %v10063_v3  ;;  %v2983_v6 = vand.u32 4294901760, %v2982_v41  ;;  %v1979_v3 = vpop.f32.mrf.mxu1  ;;  %v4155_v31 = vsel %vm9666_vm5, 1.0, %v5873_v28 }
 0x1b2   :  { %4505 = vmatpush.msk.msrb.mxu0 %vm9651_vm6, %v9719_v47  ;;  %3032 = vmatpush.msrb.mxu2 %v7918_v46  ;;  %v1935_v55 = vpop.f32.mrf.mxu0 }
 0x1b3   :  { %4523 = vmatpush.msk.msrb.mxu3 %vm9654_vm15, %v9719_v47  ;;  %2972 = vmatpush.msrb.mxu1 %v2971_v58  ;;  %v1936_v15 = vadd.f32 %v1935_v55, %v7785_v21  ;;  %v10066_v58 = vld [vmem:[#allocation28_spill] sm:$0xff]  ;;  %v2989_v21 = vand.u32 4294901760, %v2988_v43  ;;  %v2095_v41 = vpop.f32.mrf.mxu3 }
 0x1b4   :  { %4506 = vmatpush.msk.msrb.mxu0 %vm9653_vm8, %v9719_v47  ;;  %3035 = vmatpush.msrb.mxu2 %v7935_v1  ;;  %vm9669_vm6 = vcmp.eq.s32.totalorder %v10066_v58, %v7622_v18  ;;  %vm9670_vm8 = vcmp.eq.s32.totalorder %v10067_v38, %v7622_v18 }
 0x1b5   :  { %4524 = vmatpush.msk.msrb.mxu3 %vm193_vm12, %v9719_v47  ;;  %2978 = vmatpush.msrb.mxu1 %v2977_v9  ;;  %v1980_v55 = vadd.f32 %v1979_v3, %v1936_v15  ;;  %v8112_v9 = vsub.f32 %v4155_v31, %v4155_v31  ;;  %v4152_v43 = vsel %vm9669_vm6, 1.0, %v5873_v28  ;;  %v10069_v31 = vand.u32 4294901760, %v8065_v17 }
 0x1b6   :  { %4507 = vmatpush.msk.msrb.mxu0 %vm9654_vm15, %v9719_v47  ;;  %3038 = vmatpush.msrb.mxu2 %v7956_v12  ;;  %vm9671_vm15 = vcmp.eq.s32.totalorder %v9902_v51, %v7622_v18  ;;  %v8144_v3 = vsub.f32 %v4152_v43, %v4152_v43  ;;  %v10071_v43 = vand.u32 4294901760, %v8088_v39  ;;  %v10110_v12 = vld [vmem:[#allocation35_spill] sm:$0xff] }
 0x1b7   :  { %4525 = vmatpush.msk.msrb.mxu3 %vm9655_vm1, %v9719_v47  ;;  %2984 = vmatpush.msrb.mxu1 %v2983_v6  ;;  %10068 = vst [vmem:[#allocation36_spill] sm:$0xff] %v8112_v9  ;;  %v2055_v15 = vadd.f32 %v2054_v57, %v1980_v55  ;;  %v3270_v6 = vsub.f32 %v8065_v17, %v10069_v31  ;;  %v4149_v55 = vsel %vm9670_vm8, 1.0, %v5873_v28  ;;  %v10073_v17 = vld [vmem:[#allocation42_spill] sm:$0xff] }
 0x1b8   :  { %4508 = vmatpush.msk.msrb.mxu0 %vm193_vm12, %v9719_v47  ;;  %3041 = vmatpush.msrb.mxu2 %v7965_v37  ;;  %v8169_v31 = vsub.f32 %v4149_v55, %v4149_v55 }
 0x1b9   :  { %4526 = vmatpush.msk.msrb.mxu3 %vm9662_vm13, %v9719_v47  ;;  %2990 = vmatpush.msrb.mxu1 %v2989_v21  ;;  %v8137_v57 = vadd.f32 %v2095_v41, %v2055_v15  ;;  %v10070_v21 = vld [vmem:[#allocation41_spill] sm:$0xff]  ;;  %v4146_v41 = vsel %vm9671_vm15, 1.0, %v5873_v28  ;;  %v3276_v15 = vsub.f32 %v8088_v39, %v10071_v43  ;;  %v3271_v45 = vand.u32 4294901760, %v3270_v6  ;;  %v1985_v55 = vpop.f32.mrf.mxu1 }
 0x1ba   :  { %4509 = vmatpush.msk.msrb.mxu0 %vm9655_vm1, %v9719_v47  ;;  %3044 = vmatpush.msrb.mxu2 %v7993_v50  ;;  %vm253_vm1 = vcmp.eq.s32.totalorder %v9903_v59, %v7622_v18 }
 0x1bb   :  { %4527 = vmatpush.msk.msrb.mxu3 %vm184_vm11, %v9719_v47  ;;  %2992 = vmatmul.f32.vlgmr.msrb.gmra.mxu1 %v10070_v21  ;;  %v1940_v50 = vpop.f32.mrf.mxu0  ;;  %v4143_v6 = vsel %vm253_vm1, 1.0, %v5873_v28  ;;  %v3277_v56 = vand.u32 4294901760, %v3276_v15 }
 0x1bc   :  { %4530 = vmatpush.msk.msra.mxu1 %vm223_vm2, %v9719_v47  ;;  %4510 = vmatpush.msk.msrb.mxu0 %vm9662_vm13, %v9719_v47  ;;  %vm250_vm2 = vcmp.eq.s32.totalorder %v10072_v4, %v7622_v18  ;;  %v1941_v37 = vadd.f32 %v1940_v50, %v7874_v22  ;;  %vm247_vm13 = vcmp.eq.s32.totalorder %v9907_v8, %v7622_v18  ;;  %v10075_v22 = vand.u32 4294901760, %v8112_v9 }
 0x1bd   :  { %3047 = vmatpush.msrb.mxu2 %v8008_v13  ;;  %4528 = vmatpush.msk.msrb.mxu3 %vm181_vm3, %v9719_v47  ;;  %v8185_v13 = vsub.f32 %v4146_v41, %v4146_v41  ;;  %v4140_v43 = vsel %vm250_vm2, 1.0, %v5873_v28  ;;  %v4137_v15 = vsel %vm247_vm13, 1.0, %v5873_v28 }
 0x1be   :  { %3050 = vmatmul.f32.vlgmr.msrb.gmra.mxu2 %v10073_v17  ;;  %4531 = vmatpush.msk.msra.mxu1 %vm220_vm14, %v9719_v47  ;;  %v3282_v17 = vsub.f32 %v8112_v9, %v10075_v22  ;;  %v1986_v50 = vadd.f32 %v1985_v55, %v1941_v37  ;;  %v2058_v22 = vpop.f32.mrf.mxu2  ;;  %v10076_v37 = vld [vmem:[#allocation44_spill] sm:$0xff]  ;;  %v8222_v55 = vsub.f32 %v4143_v6, %v4143_v6 }
 0x1bf   :  { %10074 = vst [vmem:[#allocation37_spill] sm:$0xff] %v8185_v13  ;;  %4546 = vmatpush.msk.msra.mxu2 %vm271_vm0, %v9719_v47  ;;  %4511 = vmatpush.msk.msrb.mxu0 %vm184_vm11, %v9719_v47  ;;  %vm244_vm14 = vcmp.eq.s32.totalorder %v9909_v29, %v7622_v18  ;;  %v8246_v41 = vsub.f32 %v4140_v43, %v4140_v43 }
 0x1c0   :  { %4529 = vmatpush.msk.msrb.mxu3 %vm178_vm10, %v9719_v47  ;;  %4532 = vmatpush.msk.msra.mxu1 %vm217_vm9, %v9719_v47  ;;  %v2059_v7 = vadd.f32 %v2058_v22, %v1986_v50  ;;  %v2099_v22 = vpop.f32.mrf.mxu3  ;;  %vm10078_vm9 = vcmp.eq.s32.totalorder %v10018_v34, %v7622_v18  ;;  %v10079_v34 = vand.u32 4294901760, %v8169_v31  ;;  %v8259_v50 = vsub.f32 %v4137_v15, %v4137_v15 }
 0x1c1   :  { %3094 = vmatmul.f32.vlgmr.msrb.gmra.mxu3 %v10076_v37  ;;  %4547 = vmatpush.msk.msra.mxu2 %vm9665_vm7, %v9719_v47  ;;  %v10077_v37 = vand.u32 4294901760, %v8144_v3  ;;  %vm241_vm7 = vcmp.eq.s32.totalorder %v9912_v63, %v7622_v18  ;;  %v4134_v43 = vsel %vm244_vm14, 1.0, %v5873_v28 }
 0x1c2   :  { %3272 = vmatpush.msra.mxu3 %v3271_v45  ;;  %4512 = vmatpush.msk.msrb.mxu0 %vm181_vm3, %v9719_v47  ;;  %v3283_v45 = vand.u32 4294901760, %v3282_v17  ;;  %v8248_v9 = vadd.f32 %v2099_v22, %v2059_v7  ;;  %v10080_v17 = vld [vmem:[#allocation46_spill] sm:$0xff]  ;;  %v10081_v7 = vld [vmem:[#allocation47_spill] sm:$0xff]  ;;  %v10082_v22 = vand.u32 4294901760, %v7692_v27  ;;  %v3311_v27 = vand.u32 4294901760, %v8246_v41 }
 0x1c3   :  { %v3288_v6 = vsub.f32 %v8144_v3, %v10077_v37  ;;  %4533 = vmatpush.msk.msra.mxu1 %vm10078_vm9, %v9719_v47  ;;  %4548 = vmatpush.msk.msra.mxu2 %vm9666_vm5, %v9719_v47  ;;  %v3294_v37 = vsub.f32 %v8169_v31, %v10079_v34  ;;  %vm238_vm9 = vcmp.eq.s32.totalorder %v9914_v5, %v7622_v18  ;;  %v10084_v34 = vand.u32 4294901760, %v8185_v13 }
 0x1c4   :  { %3278 = vmatpush.msra.mxu3 %v3277_v56  ;;  %4513 = vmatpush.msk.msrb.mxu0 %vm178_vm10, %v9719_v47  ;;  %vm10083_vm5 = vcmp.eq.s32.totalorder %v10021_v35, %v7622_v18  ;;  %v4131_v56 = vsel %vm241_vm7, 1.0, %v5873_v28  ;;  %v8288_v35 = vsub.f32 %v4134_v43, %v4134_v43  ;;  %v10150_v59 = vand.u32 4294901760, %v8259_v50 }
 0x1c5   :  { %2883 = vmatmul.f32.vlgmr.msrb.gmra.mxu0 %v10080_v17  ;;  %2996 = vmatmul.f32.gmra.mxu1 %v10081_v7  ;;  %v3289_v15 = vand.u32 4294901760, %v3288_v6  ;;  %v3300_v17 = vsub.f32 %v8185_v13, %v10084_v34  ;;  %v10085_v6 = vld [vmem:[#allocation48_spill] sm:$0xff]  ;;  %v3295_v34 = vand.u32 4294901760, %v3294_v37  ;;  %v8311_v43 = vsub.f32 %v4131_v56, %v4131_v56  ;;  %v10089_v13 = vld [vmem:[#allocation50_spill] sm:$0xff] }
 0x1c6   :  { %3107 = vmatpush.msra.mxu0 %v10082_v22  ;;  %4534 = vmatpush.msk.msra.mxu1 %vm10083_vm5, %v9719_v47  ;;  %vm235_vm5 = vcmp.eq.s32.totalorder %v9917_v36, %v7622_v18  ;;  %v10086_v22 = vand.u32 4294901760, %v7711_v2  ;;  %v10087_v2 = vand.u32 4294901760, %v8222_v55  ;;  %v3312_v56 = vsub.f32 %v8246_v41, %v3311_v27 }
 0x1c7   :  { %4549 = vmatpush.msk.msra.mxu2 %vm9669_vm6, %v9719_v47  ;;  %3284 = vmatpush.msra.mxu3 %v3283_v45  ;;  %v4128_v45 = vsel %vm238_vm9, 1.0, %v5873_v28  ;;  %vm232_vm6 = vcmp.eq.s32.totalorder %v9918_v54, %v7622_v18  ;;  %v3301_v19 = vand.u32 4294901760, %v3300_v17 }
 0x1c8   :  { %3055 = vmatmul.f32.gmra.mxu2 %v10085_v6  ;;  %3111 = vmatpush.msra.mxu0 %v10086_v22  ;;  %v3306_v37 = vsub.f32 %v8222_v55, %v10087_v2  ;;  %v10088_v6 = vand.u32 4294901760, %v7721_v62  ;;  %v4125_v22 = vsel %vm235_vm5, 1.0, %v5873_v28  ;;  %v3323_v62 = vand.u32 4294901760, %v8288_v35 }
 0x1c9   :  { %4535 = vmatpush.msk.msra.mxu1 %vm208_vm4, %v9719_v47  ;;  %4550 = vmatpush.msk.msra.mxu2 %vm9670_vm8, %v9719_v47  ;;  %vm10090_vm4 = vcmp.eq.s32.totalorder %v10025_v14, %v7622_v18  ;;  %vm229_vm8 = vcmp.eq.s32.totalorder %v9920_v25, %v7622_v18  ;;  %v10091_v14 = vand.u32 4294901760, %v8259_v50  ;;  %v4122_v17 = vsel %vm232_vm6, 1.0, %v5873_v28 }
 0x1ca   :  { %3290 = vmatpush.msra.mxu3 %v3289_v15  ;;  %3115 = vmatpush.msra.mxu0 %v10088_v6  ;;  %v8330_v15 = vsub.f32 %v4128_v45, %v4128_v45  ;;  %v10092_v45 = vand.u32 4294901760, %v7756_v24  ;;  %v3307_v2 = vand.u32 4294901760, %v3306_v37  ;;  %v8352_v6 = vsub.f32 %v4125_v22, %v4125_v22 }
 0x1cb   :  { %3100 = vmatmul.f32.gmra.mxu3 %v10089_v13  ;;  %4536 = vmatpush.msk.msra.mxu1 %vm10090_vm4, %v9719_v47  ;;  %v3318_v13 = vsub.f32 %v8259_v50, %v10091_v14  ;;  %vm10093_vm4 = vcmp.eq.s32.totalorder %v10029_v20, %v7622_v18  ;;  %v4119_v24 = vsel %vm229_vm8, 1.0, %v5873_v28  ;;  %v10094_v20 = vld [vmem:[#allocation53_spill] sm:$0xff]  ;;  %v3313_v37 = vand.u32 4294901760, %v3312_v56 }
 0x1cc   :  { %4551 = vmatpush.msk.msra.mxu2 %vm9671_vm15, %v9719_v47  ;;  %3296 = vmatpush.msra.mxu3 %v3295_v34  ;;  %v3329_v34 = vand.u32 4294901760, %v8311_v43  ;;  %vm226_vm15 = vcmp.eq.s32.totalorder %v9924_v53, %v7622_v18  ;;  %v3335_v22 = vand.u32 4294901760, %v8330_v15  ;;  %v8373_v14 = vsub.f32 %v4122_v17, %v4122_v17  ;;  %v10176_v53 = vld [vmem:[#allocation69_spill] sm:$0xff] }
 0x1cd   :  { %3119 = vmatpush.msra.mxu0 %v10092_v45  ;;  %4537 = vmatpush.msk.msra.mxu1 %vm10093_vm4, %v9719_v47  ;;  %vm10095_vm4 = vcmp.eq.s32.totalorder %v10032_v33, %v7622_v18  ;;  %v10096_v45 = vand.u32 4294901760, %v7793_v23  ;;  %v3341_v56 = vand.u32 4294901760, %v8352_v6  ;;  %v8389_v23 = vsub.f32 %v4119_v24, %v4119_v24 }
 0x1ce   :  { %4552 = vmatpush.msk.msra.mxu2 %vm253_vm1, %v9719_v47  ;;  %3302 = vmatpush.msra.mxu3 %v3301_v19  ;;  %v3324_v19 = vsub.f32 %v8288_v35, %v3323_v62  ;;  %v3330_v33 = vsub.f32 %v8311_v43, %v3329_v34  ;;  %v4116_v17 = vsel %vm226_vm15, 1.0, %v5873_v28  ;;  %v3347_v24 = vand.u32 4294901760, %v8373_v14 }
 0x1cf   :  { %2891 = vmatmul.f32.gmra.mxu0 %v10094_v20  ;;  %4538 = vmatpush.msk.msra.mxu1 %vm10095_vm4, %v9719_v47  ;;  %v3319_v20 = vand.u32 4294901760, %v3318_v13  ;;  %vm10097_vm4 = vcmp.eq.s32.totalorder %v10036_v61, %v7622_v18  ;;  %v10098_v13 = vand.u32 4294901760, %v7816_v0  ;;  %v10099_v0 = vand.u32 4294901760, %v7836_v32 }
 0x1d0   :  { %3123 = vmatpush.msra.mxu0 %v10096_v45  ;;  %4553 = vmatpush.msk.msra.mxu2 %vm250_vm2, %v9719_v47  ;;  %v3325_v61 = vand.u32 4294901760, %v3324_v19  ;;  %v3331_v60 = vand.u32 4294901760, %v3330_v33  ;;  %v3342_v19 = vsub.f32 %v8352_v6, %v3341_v56  ;;  %v3353_v32 = vand.u32 4294901760, %v8389_v23 }
 0x1d1   :  { %3308 = vmatpush.msra.mxu3 %v3307_v2  ;;  %4539 = vmatpush.msk.msra.mxu1 %vm10097_vm4, %v9719_v47  ;;  %v3336_v2 = vsub.f32 %v8330_v15, %v3335_v22  ;;  %v10101_v45 = vand.u32 4294901760, %v7850_v52  ;;  %vm10102_vm4 = vcmp.eq.s32.totalorder %v10043_v10, %v7622_v18  ;;  %v3348_v33 = vsub.f32 %v8373_v14, %v3347_v24 }
 0x1d2   :  { %3127 = vmatpush.msra.mxu0 %v10098_v13  ;;  %4554 = vmatpush.msk.msra.mxu2 %vm247_vm13, %v9719_v47  ;;  %v2249_v13 = vpop.f32.mrf.mxu1  ;;  %v3343_v10 = vand.u32 4294901760, %v3342_v19  ;;  %v10105_v19 = vand.u32 4294901760, %v7918_v46  ;;  %v10106_v46 = vand.u32 4294901760, %v7935_v1 }
 0x1d3   :  { %3314 = vmatpush.msra.mxu3 %v3313_v37  ;;  %4540 = vmatpush.msk.msra.mxu1 %vm193_vm12, %v9719_v47  ;;  %v8415_v37 = vsub.f32 %v4116_v17, %v4116_v17  ;;  %vm10100_vm12 = vcmp.eq.s32.totalorder %v10041_v30, %v7622_v18  ;;  %v3337_v30 = vand.u32 4294901760, %v3336_v2  ;;  %v10103_v17 = vand.u32 4294901760, %v7878_v11 }
 0x1d4   :  { %3131 = vmatpush.msra.mxu0 %v10099_v0  ;;  %4555 = vmatpush.msk.msra.mxu2 %vm244_vm14, %v9719_v47  ;;  %v3354_v11 = vsub.f32 %v8389_v23, %v3353_v32  ;;  %v10104_v2 = vand.u32 4294901760, %v7898_v26  ;;  %v2307_v0 = vpop.f32.mrf.mxu2  ;;  %v3349_v40 = vand.u32 4294901760, %v3348_v33 }
 0x1d5   :  { %3320 = vmatpush.msra.mxu3 %v3319_v20  ;;  %4541 = vmatpush.msk.msra.mxu1 %vm10100_vm12, %v9719_v47 }
 0x1d6   :  { %3135 = vmatpush.msra.mxu0 %v10101_v45  ;;  %4556 = vmatpush.msk.msra.mxu2 %vm241_vm7, %v9719_v47  ;;  %v2140_v20 = vpop.f32.mrf.mxu0  ;;  %v3355_v16 = vand.u32 4294901760, %v3354_v11 }
 0x1d7   :  { %3326 = vmatpush.msra.mxu3 %v3325_v61  ;;  %4542 = vmatpush.msk.msra.mxu1 %vm10102_vm4, %v9719_v47  ;;  %v2141_v52 = vadd.f32 %v2140_v20, %v8137_v57  ;;  %v3359_v61 = vand.u32 4294901760, %v8415_v37  ;;  %v2351_v45 = vpop.f32.mrf.mxu3 }
 0x1d8   :  { %3139 = vmatpush.msra.mxu0 %v10103_v17  ;;  %4557 = vmatpush.msk.msra.mxu2 %vm238_vm9, %v9719_v47 }
 0x1d9   :  { %3332 = vmatpush.msra.mxu3 %v3331_v60  ;;  %4543 = vmatpush.msk.msra.mxu1 %vm184_vm11, %v9719_v47  ;;  %v2250_v57 = vadd.f32 %v2249_v13, %v2141_v52  ;;  %v3360_v26 = vsub.f32 %v8415_v37, %v3359_v61  ;;  %v10108_v52 = vld [vmem:[#allocation56_spill] sm:$0xff]  ;;  %vm10109_vm11 = vcmp.eq.s32.totalorder %v10061_v48, %v7622_v18  ;;  %v10111_v13 = vand.u32 4294901760, %v10110_v12  ;;  %v10128_v48 = vld [vmem:[#allocation62_spill] sm:$0xff] }
 0x1da   :  { %3143 = vmatpush.msra.mxu0 %v10104_v2  ;;  %4558 = vmatpush.msk.msra.mxu2 %vm235_vm5, %v9719_v47  ;;  %v2253_v17 = vpop.f32.mrf.mxu1  ;;  %v10115_v2 = vld [vmem:[#allocation43_spill] sm:$0xff]  ;;  %vm10122_vm12 = vmmov %vm10109_vm11 }
 0x1db   :  { %3338 = vmatpush.msra.mxu3 %v3337_v30  ;;  %4544 = vmatpush.msk.msra.mxu1 %vm181_vm3, %v9719_v47  ;;  %v2308_v60 = vadd.f32 %v2307_v0, %v2250_v57  ;;  %v3361_v30 = vand.u32 4294901760, %v3360_v26  ;;  %vm10114_vm3 = vcmp.eq.s32.totalorder %v10065_v44, %v7622_v18  ;;  %v10116_v0 = vand.u32 4294901760, %v8088_v39  ;;  %v10132_v44 = vld [vmem:[#allocation52_spill] sm:$0xff] }
 0x1dc   :  { %3147 = vmatpush.msra.mxu0 %v10105_v19  ;;  %4559 = vmatpush.msk.msra.mxu2 %vm232_vm6, %v9719_v47  ;;  %vm10127_vm4 = vmmov %vm10114_vm3 }
 0x1dd   :  { %3344 = vmatpush.msra.mxu3 %v3343_v10  ;;  %4545 = vmatpush.msk.msra.mxu1 %vm178_vm10, %v9719_v47  ;;  %v8476_v20 = vadd.f32 %v2351_v45, %v2308_v60  ;;  %v10112_v10 = vld [vmem:[#allocation31_spill] sm:$0xff]  ;;  %v10117_v60 = vld [vmem:[#allocation33_spill] sm:$0xff]  ;;  %vm10119_vm10 = vcmp.eq.s32.totalorder %v10066_v58, %v7622_v18  ;;  %v10120_v45 = vld [vmem:[#allocation36_spill] sm:$0xff] }
 0x1de   :  { %3151 = vmatpush.msra.mxu0 %v10106_v46  ;;  %4560 = vmatpush.msk.msra.mxu2 %vm229_vm8, %v9719_v47  ;;  %v10113_v11 = vand.u32 4294901760, %v10112_v10  ;;  %v10118_v19 = vand.u32 4294901760, %v10117_v60  ;;  %v10139_v58 = vld [vmem:[#allocation55_spill] sm:$0xff]  ;;  %v10154_v60 = vld [vmem:[#allocation61_spill] sm:$0xff] }
 0x1df   :  { %3350 = vmatpush.msra.mxu3 %v3349_v40  ;;  %3210 = vmatmul.f32.vlgmr.msra.gmra.mxu1 %v10070_v21  ;;  %v2148_v33 = vpop.f32.mrf.mxu0 }
 0x1e0   :  { %4562 = vmatpush.msk.msrb.mxu1 %vm271_vm0, %v9719_v47  ;;  %3155 = vmatpush.msra.mxu0 %v10107_v49  ;;  %v2149_v1 = vadd.f32 %v2148_v33, %v8248_v9  ;;  %v2312_v9 = vpop.f32.mrf.mxu2  ;;  %v10124_v49 = vand.u32 4294901760, %v10123_v42  ;;  %v10194_v33 = vld [vmem:[#allocation84_spill] sm:$0xff] }
 0x1e1   :  { %4561 = vmatpush.msk.msra.mxu2 %vm226_vm15, %v9719_v47  ;;  %3356 = vmatpush.msra.mxu3 %v3355_v16  ;;  %v2357_v26 = vpop.f32.mrf.mxu3  ;;  %v10121_v16 = vand.u32 4294901760, %v10120_v45 }
 0x1e2   :  { %3255 = vmatmul.f32.vlgmr.msra.gmra.mxu2 %v10108_v52  ;;  %4563 = vmatpush.msk.msrb.mxu1 %vm10109_vm11, %v9719_v47  ;;  %v2254_v57 = vadd.f32 %v2253_v17, %v2149_v1  ;;  %vm10129_vm11 = vcmp.eq.s32.totalorder %v9902_v51, %v7622_v18  ;;  %v10136_v1 = vld [vmem:[#allocation37_spill] sm:$0xff]  ;;  %v10196_v17 = vld [vmem:[#allocation83_spill] sm:$0xff] }
 0x1e3   :  { %3479 = vmatpush.msrb.mxu2 %v10111_v13  ;;  %3159 = vmatpush.msra.mxu0 %v10113_v11  ;;  %v10137_v52 = vand.u32 4294901760, %v10136_v1  ;;  %v10144_v13 = vld [vmem:[#allocation57_spill] sm:$0xff] }
 0x1e4   :  { %3362 = vmatpush.msra.mxu3 %v3361_v30  ;;  %4564 = vmatpush.msk.msrb.mxu1 %vm10114_vm3, %v9719_v47  ;;  %v2313_v40 = vadd.f32 %v2312_v9, %v2254_v57  ;;  %v10126_v30 = vand.u32 4294901760, %v8144_v3  ;;  %vm10131_vm3 = vmmov %vm10119_vm10 }
 0x1e5   :  { %3364 = vmatmul.f32.vlgmr.msra.gmra.mxu3 %v10115_v2  ;;  %3483 = vmatpush.msrb.mxu2 %v10116_v0  ;;  %v10151_v0 = vld [vmem:[#allocation60_spill] sm:$0xff] }
 0x1e6   :  { %4578 = vmatpush.msk.msrb.mxu3 %vm271_vm0, %v9719_v47  ;;  %3163 = vmatpush.msra.mxu0 %v10118_v19  ;;  %v8524_v46 = vadd.f32 %v2357_v26, %v2313_v40  ;;  %vm10125_vm0 = vcmp.eq.s32.totalorder %v10067_v38, %v7622_v18  ;;  %v10142_v38 = vand.u32 4294901760, %v8222_v55 }
 0x1e7   :  { %4565 = vmatpush.msk.msrb.mxu1 %vm10119_vm10, %v9719_v47  ;;  %3487 = vmatpush.msrb.mxu2 %v10121_v16  ;;  %vm8560_vm10 = vcmp.eq.s32.totalorder %v10132_v44, %v7622_v18  ;;  %v10157_v16 = vld [vmem:[#allocation63_spill] sm:$0xff] }
 0x1e8   :  { %4579 = vmatpush.msk.msrb.mxu3 %vm10122_vm12, %v9719_v47  ;;  %3167 = vmatpush.msra.mxu0 %v10124_v49  ;;  %vm10138_vm12 = vmmov %vm10125_vm0 }
 0x1e9   :  { %3169 = vmatmul.f32.vlgmr.msra.gmra.mxu0 %v10070_v21  ;;  %3214 = vmatmul.f32.gmra.mxu1 %v10081_v7  ;;  %v10130_v21 = vand.u32 4294901760, %v8169_v31 }
 0x1ea   :  { %3374 = vmatpush.msrb.mxu0 %v10110_v12  ;;  %4566 = vmatpush.msk.msrb.mxu1 %vm10125_vm0, %v9719_v47  ;;  %vm8577_vm0 = vcmp.eq.s32.totalorder %v10139_v58, %v7622_v18  ;;  %v4209_v12 = vsel %vm8560_vm10, 1.0, %v5873_v28 }
 0x1eb   :  { %3491 = vmatpush.msrb.mxu2 %v10126_v30  ;;  %4580 = vmatpush.msk.msrb.mxu3 %vm10127_vm4, %v9719_v47  ;;  %vm10143_vm4 = vmmov %vm10129_vm11  ;;  %v4206_v10 = vsel %vm8577_vm0, 1.0, %v5873_v28  ;;  %v8612_v51 = vsub.f32 %v4209_v12, %v4209_v12 }
 0x1ec   :  { %3263 = vmatmul.f32.gmra.mxu2 %v10128_v48  ;;  %3377 = vmatpush.msrb.mxu0 %v8088_v39  ;;  %v10135_v39 = vld [vmem:[#allocation51_spill] sm:$0xff]  ;;  %v8634_v11 = vsub.f32 %v4206_v10, %v4206_v10  ;;  %v10160_v48 = vld [vmem:[#allocation64_spill] sm:$0xff]  ;;  %v10166_v10 = vld [vmem:[#allocation49_spill] sm:$0xff] }
 0x1ed   :  { %4567 = vmatpush.msk.msrb.mxu1 %vm10129_vm11, %v9719_v47  ;;  %3495 = vmatpush.msrb.mxu2 %v10130_v21  ;;  %vm8597_vm11 = vcmp.eq.s32.totalorder %v10144_v13, %v7622_v18  ;;  %v8648_v57 = vand.u32 4294901760, %v8612_v51 }
 0x1ee   :  { %4581 = vmatpush.msk.msrb.mxu3 %vm10131_vm3, %v9719_v47  ;;  %3380 = vmatpush.msrb.mxu0 %v10120_v45 }
 0x1ef   :  { %3368 = vmatmul.f32.gmra.mxu3 %v10135_v39  ;;  %4568 = vmatpush.msk.msrb.mxu1 %vm253_vm1, %v9719_v47  ;;  %v3642_v29 = vsub.f32 %v8612_v51, %v8648_v57 }
 0x1f0   :  { %3499 = vmatpush.msrb.mxu2 %v10137_v52  ;;  %4582 = vmatpush.msk.msrb.mxu3 %vm10138_vm12, %v9719_v47  ;;  %v2467_v26 = vpop.f32.mrf.mxu1 }
 0x1f1   :  { %3383 = vmatpush.msrb.mxu0 %v8144_v3  ;;  %4569 = vmatpush.msk.msrb.mxu1 %vm250_vm2, %v9719_v47  ;;  %v3643_v5 = vand.u32 4294901760, %v3642_v29  ;;  %v10197_v3 = vld [vmem:[#allocation85_spill] sm:$0xff] }
 0x1f2   :  { %3503 = vmatpush.msrb.mxu2 %v10142_v38  ;;  %4583 = vmatpush.msk.msrb.mxu3 %vm10143_vm4, %v9719_v47 }
 0x1f3   :  { %3173 = vmatmul.f32.gmra.mxu0 %v10081_v7  ;;  %4570 = vmatpush.msk.msrb.mxu1 %vm247_vm13, %v9719_v47  ;;  %v4203_v7 = vsel %vm8597_vm11, 1.0, %v5873_v28 }
 0x1f4   :  { %3386 = vmatpush.msrb.mxu0 %v8169_v31  ;;  %3507 = vmatpush.msrb.mxu2 %v3311_v27  ;;  %v10147_v31 = vld [vmem:[#allocation59_spill] sm:$0xff]  ;;  %v8650_v9 = vsub.f32 %v4203_v7, %v4203_v7 }
 0x1f5   :  { %4584 = vmatpush.msk.msrb.mxu3 %vm253_vm1, %v9719_v47  ;;  %4571 = vmatpush.msk.msrb.mxu1 %vm244_vm14, %v9719_v47  ;;  %vm8627_vm3 = vcmp.eq.s32.totalorder %v10147_v31, %v7622_v18  ;;  %vm8657_vm1 = vcmp.eq.s32.totalorder %v10151_v0, %v7622_v18  ;;  %v10198_v27 = vld [vmem:[#allocation87_spill] sm:$0xff] }
 0x1f6   :  { %3389 = vmatpush.msrb.mxu0 %v10136_v1  ;;  %3511 = vmatpush.msrb.mxu2 %v10150_v59  ;;  %v4200_v4 = vsel %vm8627_vm3, 1.0, %v5873_v28  ;;  %v8701_v45 = vand.u32 4294901760, %v8650_v9 }
 0x1f7   :  { %4585 = vmatpush.msk.msrb.mxu3 %vm250_vm2, %v9719_v47  ;;  %4572 = vmatpush.msk.msrb.mxu1 %vm241_vm7, %v9719_v47  ;;  %vm8677_vm2 = vcmp.eq.s32.totalorder %v10154_v60, %v7622_v18  ;;  %v8689_v8 = vsub.f32 %v4200_v4, %v4200_v4 }
 0x1f8   :  { %3392 = vmatpush.msrb.mxu0 %v8222_v55  ;;  %3515 = vmatpush.msrb.mxu2 %v3323_v62  ;;  %v8673_v55 = vand.u32 4294901760, %v8634_v11  ;;  %v3654_v44 = vsub.f32 %v8650_v9, %v8701_v45 }
 0x1f9   :  { %4586 = vmatpush.msk.msrb.mxu3 %vm247_vm13, %v9719_v47  ;;  %4573 = vmatpush.msk.msrb.mxu1 %vm238_vm9, %v9719_v47  ;;  %vm8705_vm13 = vcmp.eq.s32.totalorder %v10157_v16, %v7622_v18  ;;  %v2512_v49 = vpop.f32.mrf.mxu2  ;;  %v10173_v16 = vld [vmem:[#allocation68_spill] sm:$0xff] }
 0x1fa   :  { %3395 = vmatpush.msrb.mxu0 %v8246_v41  ;;  %3519 = vmatpush.msrb.mxu2 %v3329_v34  ;;  %v2426_v62 = vpop.f32.mrf.mxu0  ;;  %v4197_v41 = vsel %vm8657_vm1, 1.0, %v5873_v28  ;;  %v4191_v30 = vsel %vm8705_vm13, 1.0, %v5873_v28  ;;  %v3655_v31 = vand.u32 4294901760, %v3654_v44 }
 0x1fb   :  { %4587 = vmatpush.msk.msrb.mxu3 %vm244_vm14, %v9719_v47  ;;  %4574 = vmatpush.msk.msrb.mxu1 %vm235_vm5, %v9719_v47  ;;  %v2427_v34 = vadd.f32 %v2426_v62, %v8476_v20  ;;  %v3648_v20 = vsub.f32 %v8634_v11, %v8673_v55  ;;  %v8725_v63 = vsub.f32 %v4197_v41, %v4197_v41  ;;  %v10170_v62 = vld [vmem:[#allocation67_spill] sm:$0xff]  ;;  %v2471_v41 = vpop.f32.mrf.mxu1 }
 0x1fc   :  { %3398 = vmatpush.msrb.mxu0 %v8259_v50  ;;  %3523 = vmatpush.msrb.mxu2 %v3335_v22  ;;  %v4194_v22 = vsel %vm8677_vm2, 1.0, %v5873_v28  ;;  %v2621_v52 = vpop.f32.mrf.mxu3  ;;  %v8776_v38 = vsub.f32 %v4191_v30, %v4191_v30 }
 0x1fd   :  { %4588 = vmatpush.msk.msrb.mxu3 %vm241_vm7, %v9719_v47  ;;  %4575 = vmatpush.msk.msrb.mxu1 %vm232_vm6, %v9719_v47  ;;  %v2468_v50 = vadd.f32 %v2467_v26, %v2427_v34  ;;  %vm8743_vm7 = vcmp.eq.s32.totalorder %v10160_v48, %v7622_v18  ;;  %v8752_v1 = vsub.f32 %v4194_v22, %v4194_v22  ;;  %v3649_v36 = vand.u32 4294901760, %v3648_v20 }
 0x1fe   :  { %3401 = vmatpush.msrb.mxu0 %v8288_v35  ;;  %3527 = vmatpush.msrb.mxu2 %v3341_v56  ;;  %v8736_v35 = vand.u32 4294901760, %v8689_v8  ;;  %v8774_v12 = vand.u32 4294901760, %v8725_v63  ;;  %v4188_v13 = vsel %vm8743_vm7, 1.0, %v5873_v28  ;;  %v8820_v25 = vand.u32 4294901760, %v8776_v38 }
 0x1ff   :  { %4589 = vmatpush.msk.msrb.mxu3 %vm238_vm9, %v9719_v47  ;;  %4576 = vmatpush.msk.msrb.mxu1 %vm229_vm8, %v9719_v47  ;;  %v2513_v56 = vadd.f32 %v2512_v49, %v2468_v50  ;;  %v8796_v59 = vand.u32 4294901760, %v8752_v1  ;;  %v8807_v0 = vsub.f32 %v4188_v13, %v4188_v13 }
 0x200   :  { %3404 = vmatpush.msrb.mxu0 %v8311_v43  ;;  %3531 = vmatpush.msrb.mxu2 %v3347_v24  ;;  %v10163_v24 = vld [vmem:[#allocation65_spill] sm:$0xff] }
 0x201   :  { %4590 = vmatpush.msk.msrb.mxu3 %vm235_vm5, %v9719_v47  ;;  %4577 = vmatpush.msk.msrb.mxu1 %vm226_vm15, %v9719_v47  ;;  %v8762_v43 = vadd.f32 %v2621_v52, %v2513_v56  ;;  %vm8766_vm14 = vcmp.eq.s32.totalorder %v10163_v24, %v7622_v18  ;;  %v8847_v20 = vand.u32 4294901760, %v8807_v0 }
 0x202   :  { %3407 = vmatpush.msrb.mxu0 %v8330_v15  ;;  %3535 = vmatpush.msrb.mxu2 %v3353_v32  ;;  %v3660_v15 = vsub.f32 %v8689_v8, %v8736_v35  ;;  %v10167_v32 = vld [vmem:[#allocation66_spill] sm:$0xff]  ;;  %v4185_v54 = vsel %vm8766_vm14, 1.0, %v5873_v28 }
 0x203   :  { %4591 = vmatpush.msk.msrb.mxu3 %vm232_vm6, %v9719_v47  ;;  %3466 = vmatmul.f32.vlgmr.msrb.gmra.mxu1 %v10166_v10  ;;  %vm8790_vm9 = vcmp.eq.s32.totalorder %v10167_v32, %v7622_v18  ;;  %vm8812_vm6 = vcmp.eq.s32.totalorder %v10170_v62, %v7622_v18  ;;  %v8827_v29 = vsub.f32 %v4185_v54, %v4185_v54  ;;  %v10182_v10 = vld [vmem:[#allocation45_spill] sm:$0xff] }
 0x204   :  { %3644 = vmatpush.msra.mxu1 %v3643_v5  ;;  %3410 = vmatpush.msrb.mxu0 %v8352_v6  ;;  %v2430_v4 = vpop.f32.mrf.mxu0  ;;  %v3661_v34 = vand.u32 4294901760, %v3660_v15  ;;  %v4179_v22 = vsel %vm8812_vm6, 1.0, %v5873_v28  ;;  %v10183_v15 = vld [vmem:[#allocation58_spill] sm:$0xff]  ;;  %v3684_v32 = vsub.f32 %v8807_v0, %v8847_v20 }
 0x205   :  { %3539 = vmatpush.msrb.mxu2 %v3359_v61  ;;  %4592 = vmatpush.msk.msrb.mxu3 %vm229_vm8, %v9719_v47  ;;  %v2431_v6 = vadd.f32 %v2430_v4, %v8524_v46  ;;  %v3666_v61 = vsub.f32 %v8725_v63, %v8774_v12  ;;  %v4182_v46 = vsel %vm8790_vm9, 1.0, %v5873_v28  ;;  %vm8831_vm8 = vcmp.eq.s32.totalorder %v10173_v16, %v7622_v18  ;;  %v10184_v4 = vld [vmem:[#allocation71_spill] sm:$0xff] }
 0x206   :  { %3541 = vmatmul.f32.vlgmr.msrb.gmra.mxu2 %v10115_v2  ;;  %3650 = vmatpush.msra.mxu1 %v3649_v36  ;;  %v8849_v56 = vsub.f32 %v4182_v46, %v4182_v46  ;;  %v2625_v48 = vpop.f32.mrf.mxu3  ;;  %v4176_v5 = vsel %vm8831_vm8, 1.0, %v5873_v28  ;;  %v8868_v44 = vand.u32 4294901760, %v8827_v29  ;;  %v8872_v24 = vsub.f32 %v4179_v22, %v4179_v22 }
 0x207   :  { %3746 = vmatpush.msra.mxu2 %v8612_v51  ;;  %3413 = vmatpush.msrb.mxu0 %v8373_v14  ;;  %v2472_v26 = vadd.f32 %v2471_v41, %v2431_v6  ;;  %v3672_v51 = vsub.f32 %v8752_v1, %v8796_v59  ;;  %v2520_v14 = vpop.f32.mrf.mxu2  ;;  %v8894_v54 = vsub.f32 %v4176_v5, %v4176_v5  ;;  %v3685_v16 = vand.u32 4294901760, %v3684_v32 }
 0x208   :  { %4593 = vmatpush.msk.msrb.mxu3 %vm226_vm15, %v9719_v47  ;;  %3656 = vmatpush.msra.mxu1 %v3655_v31  ;;  %vm8853_vm15 = vcmp.eq.s32.totalorder %v10176_v53, %v7622_v18  ;;  %v8892_v31 = vand.u32 4294901760, %v8849_v56  ;;  %vm8898_vm12 = vcmp.eq.s32.totalorder %v10184_v4, %v7622_v18  ;;  %v8915_v41 = vand.u32 4294901760, %v8872_v24 }
 0x209   :  { %3582 = vmatmul.f32.vlgmr.msrb.gmra.mxu3 %v10115_v2  ;;  %3749 = vmatpush.msra.mxu2 %v8634_v11  ;;  %v2521_v49 = vadd.f32 %v2520_v14, %v2472_v26  ;;  %v3667_v2 = vand.u32 4294901760, %v3666_v61  ;;  %v3678_v11 = vsub.f32 %v8776_v38, %v8820_v25  ;;  %v4173_v13 = vsel %vm8853_vm15, 1.0, %v5873_v28 }
 0x20a   :  { %4610 = vmatpush.msk.msra.mxu3 %vm8560_vm10, %v9719_v47  ;;  %3416 = vmatpush.msrb.mxu0 %v8389_v23  ;;  %v10179_v23 = vld [vmem:[#allocation70_spill] sm:$0xff]  ;;  %v3690_v61 = vsub.f32 %v8827_v29, %v8868_v44  ;;  %v8917_v46 = vsub.f32 %v4173_v13, %v4173_v13 }
 0x20b   :  { %3662 = vmatpush.msra.mxu1 %v3661_v34  ;;  %3752 = vmatpush.msra.mxu2 %v8650_v9  ;;  %v8870_v52 = vadd.f32 %v2625_v48, %v2521_v49  ;;  %vm8876_vm5 = vcmp.eq.s32.totalorder %v10179_v23, %v7622_v18  ;;  %v3673_v9 = vand.u32 4294901760, %v3672_v51  ;;  %v3679_v6 = vand.u32 4294901760, %v3678_v11  ;;  %v10187_v34 = vld [vmem:[#allocation72_spill] sm:$0xff] }
 0x20c   :  { %4611 = vmatpush.msk.msra.mxu3 %vm8577_vm0, %v9719_v47  ;;  %3419 = vmatpush.msrb.mxu0 %v8415_v37  ;;  %v4170_v62 = vsel %vm8876_vm5, 1.0, %v5873_v28  ;;  %vm8921_vm4 = vcmp.eq.s32.totalorder %v10187_v34, %v7622_v18  ;;  %v3696_v18 = vsub.f32 %v8849_v56, %v8892_v31  ;;  %v8936_v51 = vand.u32 4294901760, %v8894_v54 }
 0x20d   :  { %3422 = vmatmul.f32.vlgmr.msrb.gmra.mxu0 %v10182_v10  ;;  %3472 = vmatmul.f32.gmra.mxu1 %v10183_v15  ;;  %v8938_v14 = vsub.f32 %v4170_v62, %v4170_v62  ;;  %v3691_v22 = vand.u32 4294901760, %v3690_v61  ;;  %v3702_v49 = vsub.f32 %v8872_v24, %v8915_v41  ;;  %v8953_v53 = vand.u32 4294901760, %v8917_v46 }
 0x20e   :  { %4594 = vmatpush.msk.msra.mxu0 %vm8560_vm10, %v9719_v47  ;;  %3668 = vmatpush.msra.mxu1 %v3667_v2 }
 0x20f   :  { %3755 = vmatpush.msra.mxu2 %v8689_v8  ;;  %4612 = vmatpush.msk.msra.mxu3 %vm8597_vm11, %v9719_v47  ;;  %v4167_v8 = vsel %vm8898_vm12, 1.0, %v5873_v28  ;;  %v8965_v11 = vand.u32 4294901760, %v8938_v14  ;;  %v3703_v5 = vand.u32 4294901760, %v3702_v49  ;;  %v3714_v23 = vsub.f32 %v8917_v46, %v8953_v53  ;;  %v10193_v49 = vld [vmem:[#allocation79_spill] sm:$0xff] }
 0x210   :  { %3545 = vmatmul.f32.gmra.mxu2 %v10135_v39  ;;  %4595 = vmatpush.msk.msra.mxu0 %vm8577_vm0, %v9719_v47  ;;  %v3724_v2 = vsub.f32 %v4167_v8, %v4167_v8  ;;  %v10191_v8 = vld [vmem:[#allocation75_spill] sm:$0xff] }
 0x211   :  { %3674 = vmatpush.msra.mxu1 %v3673_v9  ;;  %3758 = vmatpush.msra.mxu2 %v8725_v63  ;;  %v4164_v63 = vsel %vm8921_vm4, 1.0, %v5873_v28  ;;  %v3697_v28 = vand.u32 4294901760, %v3696_v18  ;;  %v3720_v13 = vsub.f32 %v8938_v14, %v8965_v11 }
 0x212   :  { %4613 = vmatpush.msk.msra.mxu3 %vm8627_vm3, %v9719_v47  ;;  %4596 = vmatpush.msk.msra.mxu0 %vm8597_vm11, %v9719_v47  ;;  %v3730_v48 = vsub.f32 %v4164_v63, %v4164_v63  ;;  %v8974_v9 = vand.u32 4294901760, %v3724_v2 }
 0x213   :  { %3586 = vmatmul.f32.gmra.mxu3 %v10135_v39  ;;  %3680 = vmatpush.msra.mxu1 %v3679_v6  ;;  %v3708_v39 = vsub.f32 %v8894_v54, %v8936_v51 }
 0x214   :  { %3761 = vmatpush.msra.mxu2 %v8752_v1  ;;  %4614 = vmatpush.msk.msra.mxu3 %vm8657_vm1, %v9719_v47  ;;  %v10190_v1 = vld [vmem:[#allocation54_spill] sm:$0xff]  ;;  %v8985_v10 = vand.u32 4294901760, %v3730_v48  ;;  %v3726_v15 = vsub.f32 %v3724_v2, %v8974_v9  ;;  %v2723_v62 = vpop.f32.mrf.mxu1 }
 0x215   :  { %4597 = vmatpush.msk.msra.mxu0 %vm8627_vm3, %v9719_v47  ;;  %3686 = vmatpush.msra.mxu1 %v3685_v16 }
 0x216   :  { %3764 = vmatpush.msra.mxu2 %v8776_v38  ;;  %4615 = vmatpush.msk.msra.mxu3 %vm8677_vm2, %v9719_v47  ;;  %v3709_v38 = vand.u32 4294901760, %v3708_v39  ;;  %v3732_v32 = vsub.f32 %v3730_v48, %v8985_v10 }
 0x217   :  { %3427 = vmatmul.f32.gmra.mxu0 %v10190_v1  ;;  %3692 = vmatpush.msra.mxu1 %v3691_v22  ;;  %v9203_v1 = vpop.xlane.xlu1 %103 }
 0x218   :  { %4598 = vmatpush.msk.msra.mxu0 %vm8657_vm1, %v9719_v47  ;;  %3767 = vmatpush.msra.mxu2 %v8807_v0  ;;  %v3715_v0 = vand.u32 4294901760, %v3714_v23 }
 0x219   :  { %4616 = vmatpush.msk.msra.mxu3 %vm8705_vm13, %v9719_v47  ;;  %3698 = vmatpush.msra.mxu1 %v3697_v28 }
 0x21a   :  { %4599 = vmatpush.msk.msra.mxu0 %vm8677_vm2, %v9719_v47  ;;  %3770 = vmatpush.msra.mxu2 %v8827_v29  ;;  %v3721_v29 = vand.u32 4294901760, %v3720_v13 }
 0x21b   :  { %4617 = vmatpush.msk.msra.mxu3 %vm8743_vm7, %v9719_v47  ;;  %3704 = vmatpush.msra.mxu1 %v3703_v5 }
 0x21c   :  { %4600 = vmatpush.msk.msra.mxu0 %vm8705_vm13, %v9719_v47  ;;  %3773 = vmatpush.msra.mxu2 %v8849_v56  ;;  %v3727_v56 = vand.u32 4294901760, %v3726_v15 }
 0x21d   :  { %4618 = vmatpush.msk.msra.mxu3 %vm8766_vm14, %v9719_v47  ;;  %3710 = vmatpush.msra.mxu1 %v3709_v38  ;;  %v9205_v38 = vpop.xlane.xlu0 %100 }
 0x21e   :  { %4601 = vmatpush.msk.msra.mxu0 %vm8743_vm7, %v9719_v47  ;;  %3776 = vmatpush.msra.mxu2 %v8872_v24  ;;  %v2679_v4 = vpop.f32.mrf.mxu0  ;;  %v3733_v24 = vand.u32 4294901760, %v3732_v32  ;;  %v2729_v63 = vpop.f32.mrf.mxu1 }
 0x21f   :  { %4619 = vmatpush.msk.msra.mxu3 %vm8790_vm9, %v9719_v47  ;;  %3716 = vmatpush.msra.mxu1 %v3715_v0  ;;  %v2680_v6 = vadd.f32 %v2679_v4, %v8762_v43  ;;  %v2798_v43 = vpop.f32.mrf.mxu2 }
 0x220   :  { %4602 = vmatpush.msk.msra.mxu0 %vm8766_vm14, %v9719_v47  ;;  %3779 = vmatpush.msra.mxu2 %v8894_v54  ;;  %v2839_v34 = vpop.f32.mrf.mxu3 }
 0x221   :  { %4620 = vmatpush.msk.msra.mxu3 %vm8812_vm6, %v9719_v47  ;;  %3722 = vmatpush.msra.mxu1 %v3721_v29  ;;  %v2724_v61 = vadd.f32 %v2723_v62, %v2680_v6  ;;  %v9211_v6 = vpop.xlane.xlu1 %94 }
 0x222   :  { %4603 = vmatpush.msk.msra.mxu0 %vm8790_vm9, %v9719_v47  ;;  %3782 = vmatpush.msra.mxu2 %v8917_v46 }
 0x223   :  { %4621 = vmatpush.msk.msra.mxu3 %vm8831_vm8, %v9719_v47  ;;  %3728 = vmatpush.msra.mxu1 %v3727_v56  ;;  %v2799_v54 = vadd.f32 %v2798_v43, %v2724_v61 }
 0x224   :  { %4604 = vmatpush.msk.msra.mxu0 %vm8812_vm6, %v9719_v47  ;;  %3785 = vmatpush.msra.mxu2 %v8938_v14  ;;  %v10192_v14 = vld [vmem:[#allocation77_spill] sm:$0xff] }
 0x225   :  { %4622 = vmatpush.msk.msra.mxu3 %vm8853_vm15, %v9719_v47  ;;  %3734 = vmatpush.msra.mxu1 %v3733_v24  ;;  %v9032_v46 = vadd.f32 %v2839_v34, %v2799_v54  ;;  %v9213_v62 = vpop.xlane.xlu0 %109 }
 0x226   :  { %4605 = vmatpush.msk.msra.mxu0 %vm8831_vm8, %v9719_v47  ;;  %3788 = vmatpush.msra.mxu2 %v3724_v2 }
 0x227   :  { %4623 = vmatpush.msk.msra.mxu3 %vm8876_vm5, %v9719_v47  ;;  %3736 = vmatmul.f32.vlgmr.msra.gmra.mxu1 %v10191_v8 }
 0x228   :  { %4626 = vmatpush.msk.msrb.mxu1 %vm8560_vm10, %v9719_v47  ;;  %4606 = vmatpush.msk.msra.mxu0 %vm8853_vm15, %v9719_v47  ;;  %v2684_v16 = vpop.f32.mrf.mxu0 }
 0x229   :  { %3791 = vmatpush.msra.mxu2 %v3730_v48  ;;  %4624 = vmatpush.msk.msra.mxu3 %vm8898_vm12, %v9719_v47  ;;  %v2685_v18 = vadd.f32 %v2684_v16, %v8870_v52  ;;  %v2802_v52 = vpop.f32.mrf.mxu2  ;;  %v10195_v48 = vld [vmem:[#allocation81_spill] sm:$0xff] }
 0x22a   :  { %3794 = vmatmul.f32.vlgmr.msra.gmra.mxu2 %v10192_v14  ;;  %4627 = vmatpush.msk.msrb.mxu1 %vm8577_vm0, %v9719_v47  ;;  %v2843_v28 = vpop.f32.mrf.mxu3 }
 0x22b   :  { %4642 = vmatpush.msrb.mxu2 %v8648_v57  ;;  %4607 = vmatpush.msk.msra.mxu0 %vm8876_vm5, %v9719_v47  ;;  %v2730_v22 = vadd.f32 %v2729_v63, %v2685_v18 }
 0x22c   :  { %4625 = vmatpush.msk.msra.mxu3 %vm8921_vm4, %v9719_v47  ;;  %4628 = vmatpush.msk.msrb.mxu1 %vm8597_vm11, %v9719_v47 }
 0x22d   :  { %3838 = vmatmul.f32.vlgmr.msra.gmra.mxu3 %v10193_v49  ;;  %4643 = vmatpush.msrb.mxu2 %v8673_v55  ;;  %v2803_v2 = vadd.f32 %v2802_v52, %v2730_v22 }
 0x22e   :  { %4658 = vmatpush.msk.msrb.mxu3 %vm8560_vm10, %v9719_v47  ;;  %4608 = vmatpush.msk.msra.mxu0 %vm8898_vm12, %v9719_v47 }
 0x22f   :  { %4644 = vmatpush.msrb.mxu2 %v8701_v45  ;;  %4629 = vmatpush.msk.msrb.mxu1 %vm8627_vm3, %v9719_v47  ;;  %v9077_v39 = vadd.f32 %v2843_v28, %v2803_v2 }
 0x230   :  { %4659 = vmatpush.msk.msrb.mxu3 %vm8577_vm0, %v9719_v47  ;;  %4609 = vmatpush.msk.msra.mxu0 %vm8921_vm4, %v9719_v47  ;;  %vm4009_vm0 = vweird.f32 %v9203_v1 }
 0x231   :  { %3627 = vmatmul.f32.vlgmr.msra.gmra.mxu0 %v10194_v33  ;;  %3740 = vmatmul.f32.gmra.mxu1 %v10195_v48 }
 0x232   :  { %3851 = vmatpush.msrb.mxu0 %v8648_v57  ;;  %4645 = vmatpush.msrb.mxu2 %v8736_v35 }
 0x233   :  { %4660 = vmatpush.msk.msrb.mxu3 %vm8597_vm11, %v9719_v47  ;;  %4630 = vmatpush.msk.msrb.mxu1 %vm8657_vm1, %v9719_v47  ;;  %vm3995_vm11 = vweird.f32 %v9205_v38 }
 0x234   :  { %3799 = vmatmul.f32.gmra.mxu2 %v10196_v17  ;;  %3855 = vmatpush.msrb.mxu0 %v8673_v55 }
 0x235   :  { %4646 = vmatpush.msrb.mxu2 %v8774_v12  ;;  %4661 = vmatpush.msk.msrb.mxu3 %vm8627_vm3, %v9719_v47 }
 0x236   :  { %4631 = vmatpush.msk.msrb.mxu1 %vm8677_vm2, %v9719_v47  ;;  %3844 = vmatmul.f32.gmra.mxu3 %v10197_v3 }
 0x237   :  { %3859 = vmatpush.msrb.mxu0 %v8701_v45  ;;  %4647 = vmatpush.msrb.mxu2 %v8796_v59 }
 0x238   :  { %4662 = vmatpush.msk.msrb.mxu3 %vm8657_vm1, %v9719_v47  ;;  %4632 = vmatpush.msk.msrb.mxu1 %vm8705_vm13, %v9719_v47  ;;  %v2993_v40 = vpop.f32.mrf.mxu1 }
 0x239   :  { %3863 = vmatpush.msrb.mxu0 %v8736_v35  ;;  %4648 = vmatpush.msrb.mxu2 %v8820_v25 }
 0x23a   :  { %4663 = vmatpush.msk.msrb.mxu3 %vm8677_vm2, %v9719_v47  ;;  %4633 = vmatpush.msk.msrb.mxu1 %vm8743_vm7, %v9719_v47 }
 0x23b   :  { %3635 = vmatmul.f32.gmra.mxu0 %v10198_v27  ;;  %4649 = vmatpush.msrb.mxu2 %v8847_v20 }
 0x23c   :  { %3867 = vmatpush.msrb.mxu0 %v8774_v12  ;;  %4664 = vmatpush.msk.msrb.mxu3 %vm8705_vm13, %v9719_v47  ;;  %vm3967_vm13 = vweird.f32 %v9211_v6 }
 0x23d   :  { %4634 = vmatpush.msk.msrb.mxu1 %vm8766_vm14, %v9719_v47  ;;  %4650 = vmatpush.msrb.mxu2 %v8868_v44 }
 0x23e   :  { %3871 = vmatpush.msrb.mxu0 %v8796_v59  ;;  %4665 = vmatpush.msk.msrb.mxu3 %vm8743_vm7, %v9719_v47 }
 0x23f   :  { %4635 = vmatpush.msk.msrb.mxu1 %vm8790_vm9, %v9719_v47  ;;  %4651 = vmatpush.msrb.mxu2 %v8892_v31 }
 0x240   :  { %3875 = vmatpush.msrb.mxu0 %v8820_v25  ;;  %4666 = vmatpush.msk.msrb.mxu3 %vm8766_vm14, %v9719_v47 }
 0x241   :  { %4636 = vmatpush.msk.msrb.mxu1 %vm8812_vm6, %v9719_v47  ;;  %4652 = vmatpush.msrb.mxu2 %v8915_v41  ;;  %v3051_v55 = vpop.f32.mrf.mxu2 }
 0x242   :  { %3879 = vmatpush.msrb.mxu0 %v8847_v20  ;;  %4667 = vmatpush.msk.msrb.mxu3 %vm8790_vm9, %v9719_v47  ;;  %v2884_v57 = vpop.f32.mrf.mxu0  ;;  %v2997_v42 = vpop.f32.mrf.mxu1  ;;  %vm4037_vm9 = vweird.f32 %v9213_v62 }
 0x243   :  { %4637 = vmatpush.msk.msrb.mxu1 %vm8831_vm8, %v9719_v47  ;;  %4653 = vmatpush.msrb.mxu2 %v8936_v51  ;;  %v2994_v59 = vadd.f32 %v2993_v40, %v2884_v57 }
 0x244   :  { %3883 = vmatpush.msrb.mxu0 %v8868_v44  ;;  %4668 = vmatpush.msk.msrb.mxu3 %vm8812_vm6, %v9719_v47  ;;  %v3095_v45 = vpop.f32.mrf.mxu3 }
 0x245   :  { %4638 = vmatpush.msk.msrb.mxu1 %vm8853_vm15, %v9719_v47  ;;  %4654 = vmatpush.msrb.mxu2 %v8953_v53  ;;  %v3052_v50 = vadd.f32 %v3051_v55, %v2994_v59 }
 0x246   :  { %3887 = vmatpush.msrb.mxu0 %v8892_v31  ;;  %4669 = vmatpush.msk.msrb.mxu3 %vm8831_vm8, %v9719_v47 }
 0x247   :  { %4639 = vmatpush.msk.msrb.mxu1 %vm8876_vm5, %v9719_v47  ;;  %4655 = vmatpush.msrb.mxu2 %v8965_v11  ;;  %v3096_v31 = vadd.f32 %v3095_v45, %v3052_v50 }
 0x248   :  { %3891 = vmatpush.msrb.mxu0 %v8915_v41  ;;  %4670 = vmatpush.msk.msrb.mxu3 %vm8853_vm15, %v9719_v47 }
 0x249   :  { %4640 = vmatpush.msk.msrb.mxu1 %vm8898_vm12, %v9719_v47  ;;  %4656 = vmatpush.msrb.mxu2 %v8974_v9 }
 0x24a   :  { %3895 = vmatpush.msrb.mxu0 %v8936_v51  ;;  %4671 = vmatpush.msk.msrb.mxu3 %vm8876_vm5, %v9719_v47 }
 0x24b   :  { %4641 = vmatpush.msk.msrb.mxu1 %vm8921_vm4, %v9719_v47  ;;  %4657 = vmatpush.msrb.mxu2 %v8985_v10  ;;  %v3056_v35 = vpop.f32.mrf.mxu2 }
 0x24c   :  { %3954 = vmatmul.f32.vlgmr.msrb.gmra.mxu1 %v10191_v8  ;;  %3899 = vmatpush.msrb.mxu0 %v8953_v53  ;;  %v2892_v19 = vpop.f32.mrf.mxu0  ;;  %v9201_v53 = vpop.xlane.xlu2 %106 }
 0x24d   :  { %4672 = vmatpush.msk.msrb.mxu3 %vm8898_vm12, %v9719_v47  ;;  %3917 = vmatmul.f32.vlgmr.msrb.gmra.mxu2 %v10195_v48  ;;  %v2998_v60 = vadd.f32 %v2997_v42, %v2892_v19  ;;  %4692 = vrcp.f32 %v9201_v53  ;;  %v4029_v27 = vand.u32 2147483648, %v9201_v53  ;;  %vm4023_vm10 = vweird.f32 %v9201_v53 }
 0x24e   :  { %3903 = vmatpush.msrb.mxu0 %v8965_v11  ;;  %v3101_v58 = vpop.f32.mrf.mxu3  ;;  %4694 = vrcp.f32 %v9205_v38 }
 0x24f   :  { %4673 = vmatpush.msk.msrb.mxu3 %vm8921_vm4, %v9719_v47  ;;  %v3057_v20 = vadd.f32 %v3056_v35, %v2998_v60  ;;  %4696 = vrcp.f32 %v9203_v1  ;;  %v9245_v59 = vor.u32 1.1754944e-38, %v4029_v27 }
 0x250   :  { %3958 = vmatmul.f32.vlgmr.msrb.gmra.mxu3 %v10195_v48  ;;  %3907 = vmatpush.msrb.mxu0 %v8974_v9 }
 0x251   :  { %v3102_v37 = vadd.f32 %v3101_v58, %v3057_v20 }
 0x252   :  { %3911 = vmatpush.msrb.mxu0 %v8985_v10 }
 0x253   :  { %3913 = vmatmul.f32.vlgmr.msrb.gmra.mxu0 %v10191_v8  ;;  %v9219_v18 = vpop.eup %4692 }
 0x254   :  { %v9208_v4 = vpop.xlane.xlu2 %97  ;;  %v9221_v14 = vpop.eup %4694  ;;  %v4019_v3 = vmul.f32 %v9219_v18, %v9201_v53  ;;  %vm4024_vm3 = vweird.f32 %v9219_v18 }
 0x255   :  { %4698 = vrcp.f32 %v9208_v4  ;;  %v9223_v63 = vpop.eup %4696  ;;  %v3991_v33 = vmul.f32 %v9221_v14, %v9205_v38  ;;  %v3987_v60 = vand.u32 2147483648, %v9208_v4  ;;  %vm3981_vm1 = vweird.f32 %v9208_v4  ;;  %vm9284_vm15 = vmor %vm4023_vm10, %vm4024_vm3 }
 0x256   :  { %4700 = vrcp.f32 %v9211_v6  ;;  %v4005_v40 = vmul.f32 %v9223_v63, %v9203_v1  ;;  %vm3996_vm7 = vweird.f32 %v9221_v14  ;;  %vm4010_vm14 = vweird.f32 %v9223_v63 }
 0x257   :  { %4702 = vrcp.f32 %v9213_v62  ;;  %vm9275_vm8 = vmor %vm3995_vm11, %vm3996_vm7 }
 0x258   :  { %vm9302_vm4 = vmor %vm4009_vm0, %vm4010_vm14 }
 0x25b   :  { %v9225_v52 = vpop.eup %4698 }
 0x25c   :  { %v3211_v12 = vpop.f32.mrf.mxu1  ;;  %v9227_v28 = vpop.eup %4700  ;;  %v3977_v35 = vmul.f32 %v9225_v52, %v9208_v4  ;;  %vm3982_vm2 = vweird.f32 %v9225_v52 }
 0x25d   :  { %v9231_v17 = vpop.eup %4702  ;;  %v3963_v55 = vmul.f32 %v9227_v28, %v9211_v6  ;;  %vm3968_vm5 = vweird.f32 %v9227_v28  ;;  %vm9324_vm0 = vmor %vm3981_vm1, %vm3982_vm2 }
 0x25e   :  { %v4033_v58 = vmul.f32 %v9231_v17, %v9213_v62  ;;  %v3978_v20 = vsub.f32 1.0, %v3977_v35  ;;  %vm4038_vm6 = vweird.f32 %v9231_v17  ;;  %vm9339_vm1 = vmor %vm3967_vm13, %vm3968_vm5 }
 0x25f   :  { %v3964_v50 = vsub.f32 1.0, %v3963_v55  ;;  %vm9312_vm10 = vmor %vm4037_vm9, %vm4038_vm6 }
 0x265   :  { %v3256_v7 = vpop.f32.mrf.mxu2 }
 0x266   :  { %v3170_v21 = vpop.f32.mrf.mxu0  ;;  %v3215_v30 = vpop.f32.mrf.mxu1 }
 0x267   :  { %v3171_v41 = vadd.f32 %v3170_v21, %v3096_v31  ;;  %v3992_v21 = vsub.f32 1.0, %v3991_v33  ;;  %v3985_v31 = vand.u32 2147483647, %v9208_v4 }
 0x268   :  { %v3365_v25 = vpop.f32.mrf.mxu3 }
 0x269   :  { %v3212_v5 = vadd.f32 %v3211_v12, %v3171_v41  ;;  %vm3986_vm13 = vcmp.eq.f32.partialorder %v3985_v31, 8.507059e+37 }
 0x26b   :  { %v3257_v10 = vadd.f32 %v3256_v7, %v3212_v5  ;;  %v3973_v5 = vand.u32 2147483648, %v9211_v6 }
 0x26d   :  { %v3366_v29 = vadd.f32 %v3365_v25, %v3257_v10  ;;  %v4006_v25 = vsub.f32 1.0, %v4005_v40  ;;  %v3979_v10 = vmul.f32 %v9225_v52, %v3978_v20 }
 0x26f   :  { %v3264_v44 = vpop.f32.mrf.mxu2 }
 0x270   :  { %v3174_v47 = vpop.f32.mrf.mxu0 }
 0x271   :  { %v3175_v26 = vadd.f32 %v3174_v47, %v3102_v37  ;;  %v4020_v47 = vsub.f32 1.0, %v4019_v3  ;;  %v4013_v3 = vand.u32 2147483647, %v9203_v1 }
 0x272   :  { %v3369_v51 = vpop.f32.mrf.mxu3 }
 0x273   :  { %v3216_v23 = vadd.f32 %v3215_v30, %v3175_v26  ;;  %v3993_v30 = vmul.f32 %v9221_v14, %v3992_v21  ;;  %v4021_v26 = vmul.f32 %v9219_v18, %v4020_v47  ;;  %vm4014_vm2 = vcmp.eq.f32.partialorder %v4013_v3, 8.507059e+37 }
 0x275   :  { %v3265_v0 = vadd.f32 %v3264_v44, %v3216_v23  ;;  %v4034_v44 = vsub.f32 1.0, %v4033_v58 }
 0x277   :  { %v3370_v32 = vadd.f32 %v3369_v51, %v3265_v0  ;;  %v9255_v51 = vor.u32 1.1754944e-38, %v3987_v60  ;;  %v4035_v0 = vmul.f32 %v9231_v17, %v4034_v44 }
 0x279   :  { %v4036_v27 = vadd.f32 %v9231_v17, %v4035_v0 }
 0x280   :  { %v3467_v11 = vpop.f32.mrf.mxu1 }
 0x289   :  { %v3542_v9 = vpop.f32.mrf.mxu2 }
 0x28a   :  { %v3423_v36 = vpop.f32.mrf.mxu0  ;;  %v3473_v56 = vpop.f32.mrf.mxu1 }
 0x28b   :  { %v3424_v24 = vadd.f32 %v3423_v36, %v3366_v29  ;;  %v4001_v29 = vand.u32 2147483648, %v9205_v38 }
 0x28c   :  { %v3583_v15 = vpop.f32.mrf.mxu3 }
 0x28d   :  { %v3468_v34 = vadd.f32 %v3467_v11, %v3424_v24  ;;  %v3971_v11 = vand.u32 2147483647, %v9211_v6  ;;  %v4002_v35 = vor.u32 1.1754944e-38, %v4001_v29 }
 0x28f   :  { %v3543_v49 = vadd.f32 %v3542_v9, %v3468_v34  ;;  %v4007_v9 = vmul.f32 %v9223_v63, %v4006_v25  ;;  %v4015_v34 = vand.u32 2147483648, %v9203_v1  ;;  %vm9290_vm12 = vcmp.eq.f32.partialorder %v3971_v11, 8.507059e+37 }
 0x291   :  { %v3584_v19 = vadd.f32 %v3583_v15, %v3543_v49  ;;  %v3994_v15 = vadd.f32 %v9221_v14, %v3993_v30  ;;  %v4027_v49 = vand.u32 2147483647, %v9201_v53  ;;  %v4008_v33 = vadd.f32 %v9223_v63, %v4007_v9 }
 0x292   :  { %v4016_v21 = vor.u32 1.1754944e-38, %v4015_v34 }
 0x293   :  { %v3546_v43 = vpop.f32.mrf.mxu2  ;;  %v3998_v40 = vsel %vm9275_vm8, %v9221_v14, %v3994_v15  ;;  %vm4028_vm3 = vcmp.eq.f32.partialorder %v4027_v49, 8.507059e+37  ;;  %v4012_v60 = vsel %vm9302_vm4, %v9223_v63, %v4008_v33 }
 0x294   :  { %v3428_v13 = vpop.f32.mrf.mxu0 }
 0x295   :  { %v3429_v61 = vadd.f32 %v3428_v13, %v3370_v32  ;;  %v3965_v13 = vmul.f32 %v9227_v28, %v3964_v50  ;;  %v3999_v32 = vand.u32 2147483647, %v9205_v38  ;;  %v3974_v50 = vor.u32 1.1754944e-38, %v3973_v5 }
 0x296   :  { %v3587_v16 = vpop.f32.mrf.mxu3 }
 0x297   :  { %v3474_v8 = vadd.f32 %v3473_v56, %v3429_v61  ;;  %vm9328_vm11 = vcmp.eq.f32.partialorder %v3999_v32, 8.507059e+37 }
 0x298   :  { %v4003_v63 = vsel %vm9328_vm11, %v4002_v35, %v3998_v40 }
 0x299   :  { %v3547_v2 = vadd.f32 %v3546_v43, %v3474_v8  ;;  %v4043_v43 = vand.u32 2147483648, %v9213_v62 }
 0x29b   :  { %v3588_v45 = vadd.f32 %v3587_v16, %v3547_v2  ;;  %v3966_v16 = vadd.f32 %v9227_v28, %v3965_v13  ;;  %v4041_v2 = vand.u32 2147483647, %v9213_v62  ;;  %v4044_v62 = vor.u32 1.1754944e-38, %v4043_v43  ;;  %v10216_v13 = vld [vmem:[#allocation30_spill] sm:$0xff] }
 0x29d   :  { %vm4042_vm7 = vcmp.eq.f32.partialorder %v4041_v2, 8.507059e+37  ;;  %v3970_v6 = vsel %vm9339_vm1, %v9227_v28, %v3966_v16 }
 0x29e   :  { %v3975_v11 = vsel %vm9290_vm12, %v3974_v50, %v3970_v6 }
 0x2a4   :  { %v3737_v22 = vpop.f32.mrf.mxu1 }
 0x2ad   :  { %v3795_v48 = vpop.f32.mrf.mxu2 }
 0x2ae   :  { %v3628_v54 = vpop.f32.mrf.mxu0  ;;  %v3741_v36 = vpop.f32.mrf.mxu1 }
 0x2af   :  { %v3629_v12 = vadd.f32 %v3628_v54, %v3584_v19 }
 0x2b0   :  { %v3839_v42 = vpop.f32.mrf.mxu3 }
 0x2b1   :  { %v3738_v37 = vadd.f32 %v3737_v22, %v3629_v12  ;;  %v4022_v22 = vadd.f32 %v9219_v18, %v4021_v26 }
 0x2b3   :  { %v3796_v56 = vadd.f32 %v3795_v48, %v3738_v37  ;;  %v4048_v37 = vmul.f32 %v4003_v63, %v9032_v46 }
 0x2b5   :  { %v3840_v55 = vadd.f32 %v3839_v42, %v3796_v56  ;;  %v4026_v42 = vsel %vm9284_vm15, %v9219_v18, %v4022_v22  ;;  %v4040_v18 = vsel %vm9312_vm10, %v9231_v17, %v4036_v27 }
 0x2b6   :  { %v4031_v17 = vsel %vm4028_vm3, %v9245_v59, %v4026_v42  ;;  %v4045_v28 = vsel %vm4042_vm7, %v4044_v62, %v4040_v18 }
 0x2b7   :  { %v3800_v23 = vpop.f32.mrf.mxu2 }
 0x2b8   :  { %v3636_v57 = vpop.f32.mrf.mxu0 }
 0x2b9   :  { %v3637_v7 = vadd.f32 %v3636_v57, %v3588_v45  ;;  %v3845_v61 = vpop.f32.mrf.mxu3  ;;  %v3980_v57 = vadd.f32 %v9225_v52, %v3979_v10 }
 0x2bb   :  { %v3742_v41 = vadd.f32 %v3741_v36, %v3637_v7  ;;  %v3984_v20 = vsel %vm9324_vm0, %v9225_v52, %v3980_v57 }
 0x2bc   :  { %v3989_v31 = vsel %vm3986_vm13, %v9255_v51, %v3984_v20 }
 0x2bd   :  { %v3801_v24 = vadd.f32 %v3800_v23, %v3742_v41  ;;  %v4017_v41 = vsel %vm4014_vm2, %v4016_v21, %v4012_v60  ;;  %v10215_v23 = vld [vmem:[#allocation86_spill] sm:$0xff]  ;;  %v4047_v10 = vmul.f32 %v3989_v31, %v10216_v13 }
 0x2be   :  { %v4049_v52 = vmul.f32 %v4017_v41, %v9077_v39  ;;  %v4046_v4 = vmul.f32 %v3975_v11, %v10215_v23 }
 0x2bf   :  { %v3846_v19 = vadd.f32 %v3845_v61, %v3801_v24 }
 0x2c9   :  { %v3955_v25 = vpop.f32.mrf.mxu1 }
 0x2d0   :  { %v3914_v58 = vpop.f32.mrf.mxu0  ;;  %v3918_v12 = vpop.f32.mrf.mxu2 }
 0x2d1   :  { %v3915_v14 = vadd.f32 %v3914_v58, %v3840_v55  ;;  %v3919_v7 = vadd.f32 %v3918_v12, %v3846_v19 }
 0x2d3   :  { %v3956_v30 = vadd.f32 %v3955_v25, %v3915_v14  ;;  %v3959_v44 = vpop.f32.mrf.mxu3 }
 0x2d4   :  { %v3960_v36 = vadd.f32 %v3959_v44, %v3919_v7 }
 0x2d5   :  { %v4050_v26 = vmul.f32 %v4031_v17, %v3956_v30 }
 0x2d6   :  { %v4051_v5 = vmul.f32 %v4045_v28, %v3960_v36 }
 0x2d7   :  { %v4052_v9 = vadd.f32 %v4050_v26, %v4048_v37 }
 0x2d8   :  { %v4053_v59 = vadd.f32 %v4051_v5, %v4049_v52 }
 0x2d9   :  { %v4054_v0 = vadd.f32 %v4052_v9, %v4046_v4 }
 0x2da   :  { %v4055_v15 = vadd.f32 %v4053_v59, %v4047_v10 }
 0x2db   :  { %v4056_v46 = vsub.f32 0.0, %v4054_v0 }
 0x2dc   :  { %v4057_v29 = vsub.f32 0.0, %v4055_v15 }
 0x2dd   :  { %4058 = vst [vmem:[%s9377_s4] sm:$0xff] %v4056_v46 }
 0x2de   :  { %4059 = vst [vmem:[%s9377_s4 + $0x8] sm:$0xff] %v4057_v29 }
 0x2df   :  { %4064 = vsyncpa [#allocation4], 1 }
 0x2e0   :  { %4065 = vsyncpa [#allocation6], 1 }

</bundles_post_ra>
